<compile_context>
chip_gen: v7x
topology: tpu7x:2x2x1
jax: 0.10.0
libtpu: 0.0.40
codegen_flags: <defaults>
</compile_context>

<pallas_src>
import functools

import jax
import jax.numpy as jnp
import numpy as np
from jax.experimental import pallas as pl
from jax.experimental.pallas import tpu as pltpu

EMBED_SIZE = 32          # E
HIDDEN_SIZE = 32         # H   (4H = 128 = exactly one lane width)
MAX_CHILDREN = 4         # C
LEVEL_BATCH = 128        # B : forest-wide padded node batch per level (MXU rows)
NODE_TABLE_SIZE = 128    # N : padded size of the persistent (h,c) node-state table
VOCAB = 16


def _sigmoid(x):
    # exp lowers to the EUP; pl.reciprocal keeps the divide off the VPU path.
    # approx=False so the numpy cross-check stays tight (1e-5).
    return pl.reciprocal(1.0 + jnp.exp(-x))


def forest_level_kernel(counts_ref,          # SMEM (L,) int32 — scalar prefetch
                        x_ref,               # (1, B, E)   per-level embedded inputs
                        cid_ref,             # (1, B*C, 1) child global ids (-1 = none)
                        dest_ref,            # (1, 1, B)   dest node id per row (-1 = pad)
                        q_ref,               # (B*C, B)    node-row -> child-slot broadcast
                        p_ref,               # (B, B*C)    child-slot -> node-row pooling
                        w_ref,               # (E+H, 4H)   fused [x | h~] -> [i f o u]
                        b_ref,               # (1, 4H)
                        uf_ref,              # (H, H)
                        state_ref):          # (N, 2H) output, resident accumulator [h | c]
    lvl = pl.program_id(0)
    H = uf_ref.shape[0]
    n_pad = state_ref.shape[0]

    @pl.when(lvl == 0)
    def _init():
        state_ref[...] = jnp.zeros_like(state_ref)

    @pl.when(counts_ref[lvl] > 0)            # skip fully-padded levels
    def _level():
        x = x_ref[0]                          # (B, E)
        cids = cid_ref[0]                     # (B*C, 1) int32
        dest = dest_ref[0]                    # (1, B)   int32
        state = state_ref[...]                # (N, 2H)
        bc = cids.shape[0]
        bsz = x.shape[0]
        pmat = p_ref[...]                     # (B, B*C)

        # --- gather child (h,c) rows with one one-hot matmul (MXU). id == -1
        #     never matches the iota -> missing children contribute zeros. -----
        gat = (jax.lax.broadcasted_iota(jnp.int32, (bc, n_pad), 1) == cids
               ).astype(jnp.float32)                                        # (B*C, N)
        child_hc = jnp.dot(gat, state, preferred_element_type=jnp.float32)  # (B*C, 2H)
        hch = child_hc[:, :H]                                               # (B*C, H)
        cch = child_hc[:, H:]                                               # (B*C, H)

        # --- fused gate projection: ONE matmul for [i f o u], lhs = [x | h_tilde] ---
        h_tilde = jnp.dot(pmat, hch, preferred_element_type=jnp.float32)    # (B, H)
        lhs = jnp.concatenate([x, h_tilde], axis=-1)                        # (B, E+H)
        gates = (jnp.dot(lhs, w_ref[...], preferred_element_type=jnp.float32)
                 + b_ref[...])                                              # (B, 4H)
        sg = _sigmoid(gates)                       # one full 128-lane pass
        i_g = sg[:, 0 * H:1 * H]
        o_g = sg[:, 2 * H:3 * H]
        u_g = jnp.tanh(gates[:, 3 * H:4 * H])      # fix up the u lanes with tanh
        fx = gates[:, 1 * H:2 * H]                 # pre-activation forget (x Wf + bf)

        # --- per-child forget gates: ONE batched matmul over all B*C child slots ---
        f_rec = jnp.dot(hch, uf_ref[...], preferred_element_type=jnp.float32)  # (B*C, H)
        fx_bc = jnp.dot(q_ref[...], fx, preferred_element_type=jnp.float32)    # (B*C, H)
        f_c = _sigmoid(fx_bc + f_rec) * cch                                    # (B*C, H)
        fc_sum = jnp.dot(pmat, f_c, preferred_element_type=jnp.float32)        # (B, H)

        c_new = i_g * u_g + fc_sum
        h_new = o_g * jnp.tanh(c_new)
        hc_new = jnp.concatenate([h_new, c_new], axis=-1)                      # (B, 2H)

        # --- scatter into the node-state table with a one-hot matmul; padded
        #     rows have dest == -1 and therefore contribute nothing. ------------
        scat = (jax.lax.broadcasted_iota(jnp.int32, (n_pad, bsz), 0) == dest
                ).astype(jnp.float32)                                          # (N, B)
        state_ref[...] = state + jnp.dot(scat, hc_new,
                                         preferred_element_type=jnp.float32)


@functools.partial(jax.jit, static_argnames=("n_pad",))
def encode_forest(params, cat_ids, child_ids, dest_ids, counts, root_ids, *, n_pad):
    """Run the whole forest (all levels, all trees) in a single pallas_call."""
    L, B = cat_ids.shape
    E = params["embedding"].shape[1]
    H = params["uf"].shape[0]
    C = child_ids.shape[1] // B

    # On-device embedding gather (no host numpy lookups).
    x_emb = jnp.take(params["embedding"], cat_ids, axis=0)          # (L, B, E)

    # Fused gate weight: rows = [x ; h_tilde], cols = [i f o u]; the forget
    # column gets no h_tilde contribution (per-child recurrence handled by Uf).
    uh = params["uh"]                                                # (H, 3H) = [i o u]
    uh4 = jnp.concatenate([uh[:, :H], jnp.zeros((H, H), jnp.float32),
                           uh[:, H:2 * H], uh[:, 2 * H:]], axis=1)   # (H, 4H)
    w_fused = jnp.concatenate([params["wx"], uh4], axis=0)           # (E+H, 4H)

    # Constant child-slot <-> node-row maps (resident in VMEM across all levels).
    q = (jnp.arange(B * C)[:, None] // C == jnp.arange(B)[None, :]
         ).astype(jnp.float32)                                       # (B*C, B)
    p = q.T                                                          # (B, B*C)

    state = pl.pallas_call(
        forest_level_kernel,
        out_shape=jax.ShapeDtypeStruct((n_pad, 2 * H), jnp.float32),
        grid_spec=pltpu.PrefetchScalarGridSpec(
            num_scalar_prefetch=1,
            grid=(L,),
            in_specs=[
                pl.BlockSpec((1, B, E), lambda l, c: (l, 0, 0)),         # x_emb
                pl.BlockSpec((1, B * C, 1), lambda l, c: (l, 0, 0)),     # child ids
                pl.BlockSpec((1, 1, B), lambda l, c: (l, 0, 0)),         # dest ids
                pl.BlockSpec((B * C, B), lambda l, c: (0, 0)),           # Q (resident)
                pl.BlockSpec((B, B * C), lambda l, c: (0, 0)),           # P (resident)
                pl.BlockSpec((E + H, 4 * H), lambda l, c: (0, 0)),       # W fused
                pl.BlockSpec((1, 4 * H), lambda l, c: (0, 0)),           # bias
                pl.BlockSpec((H, H), lambda l, c: (0, 0)),               # Uf
            ],
            out_specs=pl.BlockSpec((n_pad, 2 * H), lambda l, c: (0, 0)),  # resident
        ),
        compiler_params=pltpu.CompilerParams(
            dimension_semantics=("arbitrary",)),      # level axis carries state
    )(counts, x_emb, child_ids, dest_ids, q, p, w_fused, params["b"], params["uf"])

    roots_hc = jnp.take(state, root_ids, axis=0)      # (R, 2H) = [h | c]
    return roots_hc[:, :H], roots_hc[:, H:]


# ---------------------------------------------------------------------------
# Host-side, ONE-TIME forest -> table construction (tree bookkeeping only).
# ---------------------------------------------------------------------------

def init_params(key, embed_size, hidden_size):
    ks = jax.random.split(key, 5)
    scale = 0.1
    return dict(
        embedding=scale * jax.random.normal(ks[0], (VOCAB, embed_size), jnp.float32),
        wx=scale * jax.random.normal(ks[1], (embed_size, 4 * hidden_size), jnp.float32),
        uh=scale * jax.random.normal(ks[2], (hidden_size, 3 * hidden_size), jnp.float32),
        uf=scale * jax.random.normal(ks[3], (hidden_size, hidden_size), jnp.float32),
        b=scale * jax.random.normal(ks[4], (1, 4 * hidden_size), jnp.float32),
    )


def build_forest_tables(forest, level_batch=LEVEL_BATCH, max_children=MAX_CHILDREN,
                        n_pad=NODE_TABLE_SIZE):
    """forest: list of trees; tree: list of levels; level: list of (cat_id, [child local ids])."""
    L = max(len(tree) for tree in forest)
    B, C = level_batch, max_children
    cat_ids = np.zeros((L, B), np.int32)
    child_ids = np.full((L, B * C, 1), -1, np.int32)
    dest_ids = np.full((L, 1, B), -1, np.int32)
    counts = np.zeros((L,), np.int32)
    root_ids = []
    base = 0
    for tree in forest:
        n_tree = sum(len(level) for level in tree)
        local = 0
        for li, level in enumerate(tree):
            for cid, children in level:
                b = int(counts[li])
                assert b < B, "LEVEL_BATCH too small for this forest"
                assert len(children) <= C, "MAX_CHILDREN too small"
                cat_ids[li, b] = cid
                dest_ids[li, 0, b] = base + local
                for k, ch in enumerate(children):
                    child_ids[li, b * C + k, 0] = base + ch
                counts[li] += 1
                local += 1
        # PyTorch reference returns the LAST cell call's outputs per tree (root level).
        last = len(tree[-1])
        root_ids.extend(range(base + n_tree - last, base + n_tree))
        base += n_tree
    assert base <= n_pad, "NODE_TABLE_SIZE too small for this forest"
    return (jnp.asarray(cat_ids), jnp.asarray(child_ids), jnp.asarray(dest_ids),
            jnp.asarray(counts), jnp.asarray(np.asarray(root_ids, np.int32)))


def reference_forward(params_np, forest):
    """Pure-numpy Child-Sum Tree-LSTM, level by level per tree (same math)."""
    H = HIDDEN_SIZE
    def sig(v):
        return 1.0 / (1.0 + np.exp(-v))
    emb, wx, uh = params_np["embedding"], params_np["wx"], params_np["uh"]
    uf, b = params_np["uf"], params_np["b"]
    outs_h, outs_c = [], []
    for tree in forest:
        states, last_h, last_c = [], None, None
        for level in tree:
            hs, cs = [], []
            for cid, children in level:
                xg = emb[cid] @ wx + b[0]
                h_tilde = np.zeros(H, np.float32)
                for ch in children:
                    h_tilde = h_tilde + states[ch][0]
                hg = h_tilde @ uh
                i_g = sig(xg[:H] + hg[:H])
                o_g = sig(xg[2 * H:3 * H] + hg[H:2 * H])
                u_g = np.tanh(xg[3 * H:] + hg[2 * H:])
                fc = np.zeros(H, np.float32)
                for ch in children:
                    hk, ck = states[ch]
                    fc = fc + sig(xg[H:2 * H] + hk @ uf) * ck
                c = i_g * u_g + fc
                h = o_g * np.tanh(c)
                hs.append(h)
                cs.append(c)
            states.extend(zip(hs, cs))
            last_h, last_c = np.stack(hs, 0), np.stack(cs, 0)
        outs_h.append(last_h)
        outs_c.append(last_c)
    return np.concatenate(outs_h, 0), np.concatenate(outs_c, 0)


if __name__ == "__main__":
    key = jax.random.PRNGKey(0)
    params = init_params(key, EMBED_SIZE, HIDDEN_SIZE)

    # Synthetic forest of 2 trees; node ids are per-tree, level-major order.
    tree1 = [
        [(1, []), (2, []), (3, []), (4, [])],        # leaves: local ids 0..3
        [(5, [0, 1]), (6, [2, 3])],                  # internal: local ids 4,5
        [(7, [4, 5])],                               # root: local id 6
    ]
    tree2 = [
        [(8, []), (9, [])],                          # leaves: local ids 0,1
        [(10, [0, 1])],                              # root: local id 2
    ]
    forest = [tree1, tree2]

    cat_ids, child_ids, dest_ids, counts, root_ids = build_forest_tables(forest)

    h_out, c_out = encode_forest(params, cat_ids, child_ids, dest_ids, counts,
                                 root_ids, n_pad=NODE_TABLE_SIZE)
    jax.block_until_ready((h_out, c_out))

    params_np = {k: np.asarray(v) for k, v in params.items()}
    h_ref, c_ref = reference_forward(params_np, forest)

    h_np, c_np = np.asarray(h_out), np.asarray(c_out)
    assert h_np.shape == (2, HIDDEN_SIZE) and c_np.shape == (2, HIDDEN_SIZE)
    np.testing.assert_allclose(h_np, h_ref, rtol=1e-5, atol=1e-5)
    np.testing.assert_allclose(c_np, c_ref, rtol=1e-5, atol=1e-5)

    print("KERNEL_OK")
</pallas_src>

<mosaic_0001>
module attributes {stable_mosaic.version = 11 : i64} {
  func.func @forest_level_kernel(%arg0: i32, %arg1: memref<3xi32, #tpu.memory_space<smem>>, %arg2: memref<1x128x32xf32, #tpu.memory_space<vmem>>, %arg3: memref<1x512x1xi32, #tpu.memory_space<vmem>>, %arg4: memref<1x1x128xi32, #tpu.memory_space<vmem>>, %arg5: memref<512x128xf32, #tpu.memory_space<vmem>>, %arg6: memref<128x512xf32, #tpu.memory_space<vmem>>, %arg7: memref<64x128xf32, #tpu.memory_space<vmem>>, %arg8: memref<1x128xf32, #tpu.memory_space<vmem>>, %arg9: memref<32x32xf32, #tpu.memory_space<vmem>>, %arg10: memref<128x64xf32, #tpu.memory_space<vmem>>) attributes {dimension_semantics = [#tpu.dimension_semantics<arbitrary>], iteration_bounds = array<i64: 3>, scalar_prefetch = 1 : i64, scratch_operands = 0 : i64, tpu.core_type = #tpu.core_type<tc>, window_params = [{transform_indices = @transform_0, window_bounds = array<i64: 1, 128, 32>}, {transform_indices = @transform_1, window_bounds = array<i64: 1, 512, 1>}, {transform_indices = @transform_2, window_bounds = array<i64: 1, 1, 128>}, {pipeline_mode = #tpu.pipeline_mode<synchronous>, transform_indices = @transform_3, window_bounds = array<i64: 512, 128>}, {pipeline_mode = #tpu.pipeline_mode<synchronous>, transform_indices = @transform_4, window_bounds = array<i64: 128, 512>}, {pipeline_mode = #tpu.pipeline_mode<synchronous>, transform_indices = @transform_5, window_bounds = array<i64: 64, 128>}, {pipeline_mode = #tpu.pipeline_mode<synchronous>, transform_indices = @transform_6, window_bounds = array<i64: 1, 128>}, {pipeline_mode = #tpu.pipeline_mode<synchronous>, transform_indices = @transform_7, window_bounds = array<i64: 32, 32>}, {pipeline_mode = #tpu.pipeline_mode<synchronous>, transform_indices = @transform_8, window_bounds = array<i64: 128, 64>}]} {
    %c0_i32 = arith.constant 0 : i32
    %0 = arith.cmpi eq, %arg0, %c0_i32 : i32
    %1 = arith.extui %0 : i1 to i32
    %c0_i32_0 = arith.constant 0 : i32
    %2 = arith.cmpi ne, %1, %c0_i32_0 : i32
    scf.if %2 {
      %cst = arith.constant 0.000000e+00 : f32
      %8 = vector.broadcast %cst : f32 to vector<128x64xf32>
      %c0 = arith.constant 0 : index
      %c0_3 = arith.constant 0 : index
      %9 = vector.load %arg10[%c0, %c0_3] : memref<128x64xf32, #tpu.memory_space<vmem>>, vector<128x64xf32>
      tpu.vector_store %arg10[%c0, %c0_3], %8 {strides = array<i32>} : memref<128x64xf32, #tpu.memory_space<vmem>>, vector<128x64xf32>,
    } else {
    }
    %3 = arith.index_cast %arg0 : i32 to index
    %4 = memref.load %arg1[%3] : memref<3xi32, #tpu.memory_space<smem>>
    %c0_i32_1 = arith.constant 0 : i32
    %5 = arith.cmpi sgt, %4, %c0_i32_1 : i32
    %6 = arith.extui %5 : i1 to i32
    %c0_i32_2 = arith.constant 0 : i32
    %7 = arith.cmpi ne, %6, %c0_i32_2 : i32
    scf.if %7 {
      %c0 = arith.constant 0 : index
      %c0_3 = arith.constant 0 : index
      %c0_4 = arith.constant 0 : index
      %8 = vector.load %arg2[%c0, %c0_3, %c0_4] : memref<1x128x32xf32, #tpu.memory_space<vmem>>, vector<1x128x32xf32>
      %9 = vector.shape_cast %8 : vector<1x128x32xf32> to vector<128x32xf32>
      %c0_5 = arith.constant 0 : index
      %c0_6 = arith.constant 0 : index
      %c0_7 = arith.constant 0 : index
      %10 = vector.load %arg3[%c0_5, %c0_6, %c0_7] : memref<1x512x1xi32, #tpu.memory_space<vmem>>, vector<1x512x1xi32>
      %11 = vector.shape_cast %10 : vector<1x512x1xi32> to vector<512x1xi32>
      %c0_8 = arith.constant 0 : index
      %c0_9 = arith.constant 0 : index
      %c0_10 = arith.constant 0 : index
      %12 = vector.load %arg4[%c0_8, %c0_9, %c0_10] : memref<1x1x128xi32, #tpu.memory_space<vmem>>, vector<1x1x128xi32>
      %13 = vector.shape_cast %12 : vector<1x1x128xi32> to vector<1x128xi32>
      %c0_11 = arith.constant 0 : index
      %c0_12 = arith.constant 0 : index
      %14 = vector.load %arg10[%c0_11, %c0_12] : memref<128x64xf32, #tpu.memory_space<vmem>>, vector<128x64xf32>
      %c0_13 = arith.constant 0 : index
      %c0_14 = arith.constant 0 : index
      %15 = vector.load %arg6[%c0_13, %c0_14] : memref<128x512xf32, #tpu.memory_space<vmem>>, vector<128x512xf32>
      %16 = tpu.iota {dimensions = array<i32: 1>} : vector<512x128xi32>
      %17 = vector.broadcast %11 : vector<512x1xi32> to vector<512x128xi32>
      %18 = arith.cmpi eq, %16, %17 : vector<512x128xi32>
      %19 = arith.extui %18 : vector<512x128xi1> to vector<512x128xi32>
      %20 = arith.sitofp %19 : vector<512x128xi32> to vector<512x128xf32>
      %cst = arith.constant dense<0.000000e+00> : vector<512x64xf32>
      %21 = tpu.matmul %20, %14, %cst {dimension_numbers = #tpu.dot_dimension_numbers<[1], [0], [0], [1], [0, 0, 1, 1], [], []>} : vector<512x128xf32>, vector<128x64xf32>, vector<512x64xf32> -> vector<512x64xf32>
      %22 = vector.extract_strided_slice %21 {offsets = [0, 0], sizes = [512, 32], strides = [1, 1]} : vector<512x64xf32> to vector<512x32xf32>
      %23 = vector.extract_strided_slice %21 {offsets = [0, 32], sizes = [512, 32], strides = [1, 1]} : vector<512x64xf32> to vector<512x32xf32>
      %cst_15 = arith.constant dense<0.000000e+00> : vector<128x32xf32>
      %24 = tpu.matmul %15, %22, %cst_15 {dimension_numbers = #tpu.dot_dimension_numbers<[1], [0], [0], [1], [0, 0, 1, 1], [], []>} : vector<128x512xf32>, vector<512x32xf32>, vector<128x32xf32> -> vector<128x32xf32>
      %25 = tpu.concatenate %9, %24 in 1 : vector<128x32xf32>, vector<128x32xf32> -> vector<128x64xf32>
      %c0_16 = arith.constant 0 : index
      %c0_17 = arith.constant 0 : index
      %26 = vector.load %arg7[%c0_16, %c0_17] : memref<64x128xf32, #tpu.memory_space<vmem>>, vector<64x128xf32>
      %cst_18 = arith.constant dense<0.000000e+00> : vector<128x128xf32>
      %27 = tpu.matmul %25, %26, %cst_18 {dimension_numbers = #tpu.dot_dimension_numbers<[1], [0], [0], [1], [0, 0, 1, 1], [], []>} : vector<128x64xf32>, vector<64x128xf32>, vector<128x128xf32> -> vector<128x128xf32>
      %c0_19 = arith.constant 0 : index
      %c0_20 = arith.constant 0 : index
      %28 = vector.load %arg8[%c0_19, %c0_20] : memref<1x128xf32, #tpu.memory_space<vmem>>, vector<1x128xf32>
      %29 = vector.broadcast %28 : vector<1x128xf32> to vector<128x128xf32>
      %30 = arith.addf %27, %29 : vector<128x128xf32>
      %cst_21 = arith.constant 0.000000e+00 : f32
      %31 = vector.broadcast %cst_21 : f32 to vector<128x128xf32>
      %32 = arith.subf %31, %30 : vector<128x128xf32>
      %33 = math.exp %32 : vector<128x128xf32>
      %cst_22 = arith.constant 1.000000e+00 : f32
      %34 = vector.broadcast %cst_22 : f32 to vector<128x128xf32>
      %35 = arith.addf %34, %33 : vector<128x128xf32>
      %36 = tpu.reciprocal %35 : vector<128x128xf32> -> vector<128x128xf32>
      %37 = vector.extract_strided_slice %36 {offsets = [0, 0], sizes = [128, 32], strides = [1, 1]} : vector<128x128xf32> to vector<128x32xf32>
      %38 = vector.extract_strided_slice %36 {offsets = [0, 64], sizes = [128, 32], strides = [1, 1]} : vector<128x128xf32> to vector<128x32xf32>
      %39 = vector.extract_strided_slice %30 {offsets = [0, 96], sizes = [128, 32], strides = [1, 1]} : vector<128x128xf32> to vector<128x32xf32>
      %40 = math.tanh %39 : vector<128x32xf32>
      %41 = vector.extract_strided_slice %30 {offsets = [0, 32], sizes = [128, 32], strides = [1, 1]} : vector<128x128xf32> to vector<128x32xf32>
      %c0_23 = arith.constant 0 : index
      %c0_24 = arith.constant 0 : index
      %42 = vector.load %arg9[%c0_23, %c0_24] : memref<32x32xf32, #tpu.memory_space<vmem>>, vector<32x32xf32>
      %cst_25 = arith.constant dense<0.000000e+00> : vector<512x32xf32>
      %43 = tpu.matmul %22, %42, %cst_25 {dimension_numbers = #tpu.dot_dimension_numbers<[1], [0], [0], [1], [0, 0, 1, 1], [], []>} : vector<512x32xf32>, vector<32x32xf32>, vector<512x32xf32> -> vector<512x32xf32>
      %c0_26 = arith.constant 0 : index
      %c0_27 = arith.constant 0 : index
      %44 = vector.load %arg5[%c0_26, %c0_27] : memref<512x128xf32, #tpu.memory_space<vmem>>, vector<512x128xf32>
      %cst_28 = arith.constant dense<0.000000e+00> : vector<512x32xf32>
      %45 = tpu.matmul %44, %41, %cst_28 {dimension_numbers = #tpu.dot_dimension_numbers<[1], [0], [0], [1], [0, 0, 1, 1], [], []>} : vector<512x128xf32>, vector<128x32xf32>, vector<512x32xf32> -> vector<512x32xf32>
      %46 = arith.addf %45, %43 : vector<512x32xf32>
      %cst_29 = arith.constant 0.000000e+00 : f32
      %47 = vector.broadcast %cst_29 : f32 to vector<512x32xf32>
      %48 = arith.subf %47, %46 : vector<512x32xf32>
      %49 = math.exp %48 : vector<512x32xf32>
      %cst_30 = arith.constant 1.000000e+00 : f32
      %50 = vector.broadcast %cst_30 : f32 to vector<512x32xf32>
      %51 = arith.addf %50, %49 : vector<512x32xf32>
      %52 = tpu.reciprocal %51 : vector<512x32xf32> -> vector<512x32xf32>
      %53 = arith.mulf %52, %23 : vector<512x32xf32>
      %cst_31 = arith.constant dense<0.000000e+00> : vector<128x32xf32>
      %54 = tpu.matmul %15, %53, %cst_31 {dimension_numbers = #tpu.dot_dimension_numbers<[1], [0], [0], [1], [0, 0, 1, 1], [], []>} : vector<128x512xf32>, vector<512x32xf32>, vector<128x32xf32> -> vector<128x32xf32>
      %55 = arith.mulf %37, %40 : vector<128x32xf32>
      %56 = arith.addf %55, %54 : vector<128x32xf32>
      %57 = math.tanh %56 : vector<128x32xf32>
      %58 = arith.mulf %38, %57 : vector<128x32xf32>
      %59 = tpu.concatenate %58, %56 in 1 : vector<128x32xf32>, vector<128x32xf32> -> vector<128x64xf32>
      %60 = tpu.iota {dimensions = array<i32: 0>} : vector<128x128xi32>
      %61 = vector.broadcast %13 : vector<1x128xi32> to vector<128x128xi32>
      %62 = arith.cmpi eq, %60, %61 : vector<128x128xi32>
      %63 = arith.extui %62 : vector<128x128xi1> to vector<128x128xi32>
      %64 = arith.sitofp %63 : vector<128x128xi32> to vector<128x128xf32>
      %cst_32 = arith.constant dense<0.000000e+00> : vector<128x64xf32>
      %65 = tpu.matmul %64, %59, %cst_32 {dimension_numbers = #tpu.dot_dimension_numbers<[1], [0], [0], [1], [0, 0, 1, 1], [], []>} : vector<128x128xf32>, vector<128x64xf32>, vector<128x64xf32> -> vector<128x64xf32>
      %66 = arith.addf %14, %65 : vector<128x64xf32>
      %c0_33 = arith.constant 0 : index
      %c0_34 = arith.constant 0 : index
      %67 = vector.load %arg10[%c0_33, %c0_34] : memref<128x64xf32, #tpu.memory_space<vmem>>, vector<128x64xf32>
      tpu.vector_store %arg10[%c0_33, %c0_34], %66 {strides = array<i32>} : memref<128x64xf32, #tpu.memory_space<vmem>>, vector<128x64xf32>,
    } else {
    }
    return
  }
  func.func @transform_0(%arg0: i32, %arg1: memref<3xi32, #tpu.memory_space<smem>>) -> (i32, i32, i32) {
    %c0_i32 = arith.constant 0 : i32
    %c0_i32_0 = arith.constant 0 : i32
    %c0_i32_1 = arith.constant 0 : i32
    return %arg0, %c0_i32, %c0_i32_0 : i32, i32, i32
  }
  func.func @transform_1(%arg0: i32, %arg1: memref<3xi32, #tpu.memory_space<smem>>) -> (i32, i32, i32) {
    %c0_i32 = arith.constant 0 : i32
    %c0_i32_0 = arith.constant 0 : i32
    %c0_i32_1 = arith.constant 0 : i32
    return %arg0, %c0_i32, %c0_i32_0 : i32, i32, i32
  }
  func.func @transform_2(%arg0: i32, %arg1: memref<3xi32, #tpu.memory_space<smem>>) -> (i32, i32, i32) {
    %c0_i32 = arith.constant 0 : i32
    %c0_i32_0 = arith.constant 0 : i32
    %c0_i32_1 = arith.constant 0 : i32
    return %arg0, %c0_i32, %c0_i32_0 : i32, i32, i32
  }
  func.func @transform_3(%arg0: i32, %arg1: memref<3xi32, #tpu.memory_space<smem>>) -> (i32, i32) {
    %c0_i32 = arith.constant 0 : i32
    %c0_i32_0 = arith.constant 0 : i32
    %c0_i32_1 = arith.constant 0 : i32
    return %c0_i32, %c0_i32_0 : i32, i32
  }
  func.func @transform_4(%arg0: i32, %arg1: memref<3xi32, #tpu.memory_space<smem>>) -> (i32, i32) {
    %c0_i32 = arith.constant 0 : i32
    %c0_i32_0 = arith.constant 0 : i32
    %c0_i32_1 = arith.constant 0 : i32
    return %c0_i32, %c0_i32_0 : i32, i32
  }
  func.func @transform_5(%arg0: i32, %arg1: memref<3xi32, #tpu.memory_space<smem>>) -> (i32, i32) {
    %c0_i32 = arith.constant 0 : i32
    %c0_i32_0 = arith.constant 0 : i32
    %c0_i32_1 = arith.constant 0 : i32
    return %c0_i32, %c0_i32_0 : i32, i32
  }
  func.func @transform_6(%arg0: i32, %arg1: memref<3xi32, #tpu.memory_space<smem>>) -> (i32, i32) {
    %c0_i32 = arith.constant 0 : i32
    %c0_i32_0 = arith.constant 0 : i32
    %c0_i32_1 = arith.constant 0 : i32
    return %c0_i32, %c0_i32_0 : i32, i32
  }
  func.func @transform_7(%arg0: i32, %arg1: memref<3xi32, #tpu.memory_space<smem>>) -> (i32, i32) {
    %c0_i32 = arith.constant 0 : i32
    %c0_i32_0 = arith.constant 0 : i32
    %c0_i32_1 = arith.constant 0 : i32
    return %c0_i32, %c0_i32_0 : i32, i32
  }
  func.func @transform_8(%arg0: i32, %arg1: memref<3xi32, #tpu.memory_space<smem>>) -> (i32, i32) {
    %c0_i32 = arith.constant 0 : i32
    %c0_i32_0 = arith.constant 0 : i32
    %c0_i32_1 = arith.constant 0 : i32
    return %c0_i32, %c0_i32_0 : i32, i32
  }
}

</mosaic_0001>

<bundles_post_ra>
// kernel: encode_forest.1
= control target key start
LH: loop header
LB: loop body
LE: loop exit
PB: predicated region body
PF: predicated region fallthrough
CT: control target
= control target key end

     0   :  { %s9299_s0 = inlined_call_operand.vmem [shape: s32[3], index: 0, kind: input, shape index: {}]   ;;  %s9300_s1 = inlined_call_operand.vmem [shape: f32[3,128,32], index: 1, kind: input, shape index: {}]   ;;  %s9301_s2 = inlined_call_operand.vmem [shape: s32[3,512,1], index: 2, kind: input, shape index: {}]   ;;  %s9302_s3 = inlined_call_operand.vmem [shape: s32[3,1,128], index: 3, kind: input, shape index: {}]   ;;  %s9303_s4 = inlined_call_operand.vmem [shape: f32[512,128], index: 4, kind: input, shape index: {}]   ;;  %s9304_s5 = inlined_call_operand.vmem [shape: f32[128,512], index: 5, kind: input, shape index: {}]   ;;  %s9305_s6 = inlined_call_operand.vmem [shape: f32[64,128], index: 6, kind: input, shape index: {}]   ;;  %s9306_s7 = inlined_call_operand.vmem [shape: f32[1,128], index: 7, kind: input, shape index: {}]   ;;  %s9307_s8 = inlined_call_operand.vmem [shape: f32[32,32], index: 8, kind: input, shape index: {}]   ;;  %s9308_s9 = inlined_call_operand.vmem [shape: f32[128,64], index: 9, kind: output, shape index: {}]  }
   0x1   :  { %s14_s11 = sshll.u32 %s9299_s0, 4  ;;  %s15_s11 = int_to_ptr.vmem [resolvable:$true] %s14_s11 }
   0x2   :  { %s6802_s12 = scalar_lea.vmem %s15_s11, 16  ;;  %p6807_p1 = scmp.lt.s32.totalorder %s15_s11, %s15_s11 }
   0x3   :  { %p6803_p0 = scmp.ne.s32.totalorder %s15_s11, %s6802_s12  ;;  %p6808_p2 = scmp.lt.s32.totalorder %s6802_s12, %s6802_s12 }
   0x5   :  { %p6809_p3 = por %p6808_p2, %p6807_p1 }
   0x7   :  { %p6810_p4 = pnand %p6809_p3, %p6803_p0 }
   0x9   :  { %6813 = shalt.err (!%p6810_p4)  }
   0xa   :  { %s6824_s13 = smov [#allocation3]  }
   0xb   :  { %17 = dma.vmem_to_smem %s15_s11, 16, %s6824_s13, [#allocation2] }
   0xc   :  { %6818 = dma.done.wait [#allocation2], 16 }
   0xd   :  { %6819 = vsyncadd [#allocation2], 4294967280 }
   0xe   :  { %19 = sfence }
   0xf   :  { %s6884_s14 = smov 0  }
  0x10 LB: > { %s6890_s0 = sadd.s32 4294967295, %s6822_s14   ;;  %p4560_p5 = scmp.ge.s32.totalorder %s6822_s14, 1  ;;  %s6822_s14 = sphi %s6884_s14, %s25_s14  }
  0x11   : > { %p282_p6 = scmp.lt.s32.totalorder %s6822_s14, 4 }
  0x13   : > { %p283_p7 = pnand %p4560_p5, %p282_p6 }
  0x14   : > { %p319_p8 = scmp.lt.s32.totalorder (!%p283_p7), %s6890_s0, 2  ;;  %p4565_p9 = scmp.ne.s32.totalorder (!%p283_p7), %s6890_s0, 0 }
  0x15   : > { %286 = sbr.rel (%p283_p7) target bundleno = 2418 (0x972), region = 52 }
  0x1c   : > { %s6896_s15 = scalar_select %p319_p8, %s6890_s0, 2 }
  0x1d   : > { %335 = sbr.rel (%p4565_p9) target bundleno = 38 (0x26), region = 56  ;;  %vm336_vm0 = vcmask (!%p4565_p9), 523264   ;;  %v6825_v0 = vmov (!%p4565_p9), 0.0  }
  0x1e   : > { %s4811_s16 = sshll.u32 %s6896_s15, 7  ;;  %s4812_s17 = sshll.u32 %s6896_s15, 9  ;;  %337 = vst.msk [vmem:[%s9308_s9] sm:$0xff] (!%p4565_p9), %vm336_vm0, %v6825_v0  ;;  %338 = vst.msk [vmem:[%s9308_s9 + $0x8] sm:$0xff] (!%p4565_p9), %vm336_vm0, %v6825_v0 }
  0x1f   : > { %s6903_s20 = scalar_lea.vmem %s9300_s1, %s4811_s16  ;;  %s6908_s23 = scalar_lea.vmem %s9301_s2, %s4812_s17  ;;  %339 = vst.msk [vmem:[%s9308_s9 + $0x10] sm:$0xff] (!%p4565_p9), %vm336_vm0, %v6825_v0  ;;  %340 = vst.msk [vmem:[%s9308_s9 + $0x18] sm:$0xff] (!%p4565_p9), %vm336_vm0, %v6825_v0 }
  0x20   : > { %s331_s26 = scalar_lea.vmem %s9302_s3, %s6896_s15  ;;  %341 = vst.msk [vmem:[%s9308_s9 + $0x20] sm:$0xff] (!%p4565_p9), %vm336_vm0, %v6825_v0  ;;  %342 = vst.msk [vmem:[%s9308_s9 + $0x28] sm:$0xff] (!%p4565_p9), %vm336_vm0, %v6825_v0 }
  0x21   : > { %343 = vst.msk [vmem:[%s9308_s9 + $0x30] sm:$0xff] (!%p4565_p9), %vm336_vm0, %v6825_v0  ;;  %344 = vst.msk [vmem:[%s9308_s9 + $0x38] sm:$0xff] (!%p4565_p9), %vm336_vm0, %v6825_v0 }
  0x22   : > { %345 = vst.msk [vmem:[%s9308_s9 + $0x40] sm:$0xff] (!%p4565_p9), %vm336_vm0, %v6825_v0  ;;  %346 = vst.msk [vmem:[%s9308_s9 + $0x48] sm:$0xff] (!%p4565_p9), %vm336_vm0, %v6825_v0 }
  0x23   : > { %347 = vst.msk [vmem:[%s9308_s9 + $0x50] sm:$0xff] (!%p4565_p9), %vm336_vm0, %v6825_v0  ;;  %348 = vst.msk [vmem:[%s9308_s9 + $0x58] sm:$0xff] (!%p4565_p9), %vm336_vm0, %v6825_v0 }
  0x24   : > { %349 = vst.msk [vmem:[%s9308_s9 + $0x60] sm:$0xff] %vm336_vm0, %v6825_v0  ;;  %350 = vst.msk [vmem:[%s9308_s9 + $0x68] sm:$0xff] %vm336_vm0, %v6825_v0 }
  0x25   : > { %351 = vst.msk [vmem:[%s9308_s9 + $0x70] sm:$0xff] %vm336_vm0, %v6825_v0  ;;  %352 = vst.msk [vmem:[%s9308_s9 + $0x78] sm:$0xff] %vm336_vm0, %v6825_v0 }
  0x26 PF: > { %s353_s27 = sld [smem:[#allocation3 + %s6890_s0]] }
  0x2c   : > { %p4566_p10 = scmp.le.s32.totalorder %s353_s27, 0 }
  0x2e   : > { %357 = sbr.rel (%p4566_p10) target bundleno = 2418 (0x972), region = 60 }
  0x35   : > { %v376_v1 = vld [vmem:[%s6908_s23 + $0x10] sm:$0xff]  ;;  %v374_v2 = vld [vmem:[%s6908_s23] sm:$0xff]  ;;  %v6826_v3 = vmov 0   ;;  %v377_v4 = vld [vmem:[%s6908_s23 + $0x18] sm:$0xff]  ;;  %s6828_s11 = smov 32   ;;  %s6830_s21 = smov 64  }
  0x36   : > { %6217 = vset.pattern.permute.xlu1 %v6826_v3  ;;  %6216 = vset.pattern.permute.xlu0 %v6826_v3  ;;  %v375_v5 = vld [vmem:[%s6908_s23 + $0x8] sm:$0xff]  ;;  %v378_v7 = vld [vmem:[%s6908_s23 + $0x20] sm:$0xff]  ;;  %v381_v8 = vld [vmem:[%s6908_s23 + $0x38] sm:$0xff] }
  0x37   : > { %528 = vperm.xlu1 %6217, %v376_v1   ;;  %522 = vperm.xlu0 %6216, %v374_v2   ;;  %v379_v6 = vld [vmem:[%s6908_s23 + $0x28] sm:$0xff]  ;;  %v380_v9 = vld [vmem:[%s6908_s23 + $0x30] sm:$0xff]  ;;  %v382_v11 = vld [vmem:[%s6908_s23 + $0x40] sm:$0xff] }
  0x38   : > { %v383_v10 = vld [vmem:[%s6908_s23 + $0x48] sm:$0xff]  ;;  %v439_v12 = vld [vmem:[%s9308_s9] sm:$0xff]  ;;  %v441_v15 = vld [vmem:[%s9308_s9 + $0x10] sm:$0xff] }
  0x39   : > { %v440_v13 = vld [vmem:[%s9308_s9 + $0x8] sm:$0xff]  ;;  %v385_v16 = vld [vmem:[%s6908_s23 + $0x58] sm:$0xff]  ;;  %v384_v17 = vld [vmem:[%s6908_s23 + $0x50] sm:$0xff] }
  0x3a   : > { %v5873_v14 = vpack.c.bf16 %v440_v13, %v439_v12  ;;  %v442_v18 = vld [vmem:[%s9308_s9 + $0x18] sm:$0xff]  ;;  %v443_v20 = vld [vmem:[%s9308_s9 + $0x20] sm:$0xff]  ;;  %v444_v21 = vld [vmem:[%s9308_s9 + $0x28] sm:$0xff] }
  0x3b   : > { %531 = vperm.xlu1 %6217, %v377_v4   ;;  %525 = vperm.xlu0 %6216, %v375_v5   ;;  %v5877_v19 = vpack.c.bf16 %v442_v18, %v441_v15  ;;  %v387_v22 = vld [vmem:[%s6908_s23 + $0x68] sm:$0xff]  ;;  %v386_v23 = vld [vmem:[%s6908_s23 + $0x60] sm:$0xff]  ;;  %v5881_v24 = vpack.c.bf16 %v444_v21, %v443_v20  ;;  %v445_v25 = vld [vmem:[%s9308_s9 + $0x30] sm:$0xff] }
  0x3c   : > { %5874 = vmatprep.subr.bf16.mxu0 %v5873_v14  ;;  %v446_v26 = vld [vmem:[%s9308_s9 + $0x38] sm:$0xff]  ;;  %v388_v28 = vld [vmem:[%s6908_s23 + $0x70] sm:$0xff]  ;;  %v447_v30 = vld [vmem:[%s9308_s9 + $0x40] sm:$0xff] }
  0x3d   : > { %5876 = vmatpush3.bf16.msra.mxu0 %v5873_v14  ;;  %v389_v27 = vld [vmem:[%s6908_s23 + $0x78] sm:$0xff]  ;;  %v5885_v29 = vpack.c.bf16 %v446_v26, %v445_v25  ;;  %v448_v31 = vld [vmem:[%s9308_s9 + $0x48] sm:$0xff]  ;;  %v390_v33 = vld [vmem:[%s6908_s23 + $0x80] sm:$0xff] }
  0x3e   : > { %5878 = vmatprep.subr.bf16.mxu0 %v5877_v19  ;;  %v391_v32 = vld [vmem:[%s6908_s23 + $0x88] sm:$0xff]  ;;  %v5889_v34 = vpack.c.bf16 %v448_v31, %v447_v30  ;;  %v449_v35 = vld [vmem:[%s9308_s9 + $0x50] sm:$0xff]  ;;  %v450_v36 = vld [vmem:[%s9308_s9 + $0x58] sm:$0xff]  ;;  %v9309_v30 = vmov 1.0  }
  0x3f   : > { %537 = vperm.xlu1 %6217, %v379_v6   ;;  %534 = vperm.xlu0 %6216, %v378_v7   ;;  %v393_v37 = vld [vmem:[%s6908_s23 + $0x98] sm:$0xff]  ;;  %v392_v38 = vld [vmem:[%s6908_s23 + $0x90] sm:$0xff]  ;;  %v5893_v39 = vpack.c.bf16 %v450_v36, %v449_v35  ;;  %v451_v40 = vld [vmem:[%s9308_s9 + $0x60] sm:$0xff] }
  0x40   : > { %v452_v41 = vld [vmem:[%s9308_s9 + $0x68] sm:$0xff]  ;;  %v394_v43 = vld [vmem:[%s6908_s23 + $0xa0] sm:$0xff]  ;;  %v453_v45 = vld [vmem:[%s9308_s9 + $0x70] sm:$0xff] }
  0x41   : > { %5880 = vmatpush3.bf16.msra.mxu0 %v5877_v19  ;;  %v395_v42 = vld [vmem:[%s6908_s23 + $0xa8] sm:$0xff]  ;;  %v5897_v44 = vpack.c.bf16 %v452_v41, %v451_v40  ;;  %v454_v46 = vld [vmem:[%s9308_s9 + $0x78] sm:$0xff]  ;;  %v396_v48 = vld [vmem:[%s6908_s23 + $0xb0] sm:$0xff] }
  0x42   : > { %5882 = vmatprep.subr.bf16.mxu0 %v5881_v24  ;;  %v397_v47 = vld [vmem:[%s6908_s23 + $0xb8] sm:$0xff]  ;;  %v5901_v49 = vpack.c.bf16 %v454_v46, %v453_v45  ;;  %v399_v50 = vld [vmem:[%s6908_s23 + $0xc8] sm:$0xff]  ;;  %v398_v51 = vld [vmem:[%s6908_s23 + $0xc0] sm:$0xff] }
  0x43   : > { %543 = vperm.xlu1 %6217, %v381_v8   ;;  %540 = vperm.xlu0 %6216, %v380_v9   ;;  %v401_v52 = vld [vmem:[%s6908_s23 + $0xd8] sm:$0xff]  ;;  %v400_v53 = vld [vmem:[%s6908_s23 + $0xd0] sm:$0xff]  ;;  %v403_v54 = vld [vmem:[%s6908_s23 + $0xe8] sm:$0xff] }
  0x44   : > { %v402_v55 = vld [vmem:[%s6908_s23 + $0xe0] sm:$0xff]  ;;  %v405_v56 = vld [vmem:[%s6908_s23 + $0xf8] sm:$0xff]  ;;  %v404_v57 = vld [vmem:[%s6908_s23 + $0xf0] sm:$0xff] }
  0x45   : > { %5884 = vmatpush3.bf16.msra.mxu0 %v5881_v24  ;;  %v407_v58 = vld [vmem:[%s6908_s23 + $0x108] sm:$0xff]  ;;  %v406_v59 = vld [vmem:[%s6908_s23 + $0x100] sm:$0xff]  ;;  %v409_v60 = vld [vmem:[%s6908_s23 + $0x118] sm:$0xff]  ;;  %v9311_v24 = vlaneseq }
  0x46   : > { %5886 = vmatprep.subr.bf16.mxu0 %v5885_v29  ;;  %v408_v61 = vld [vmem:[%s6908_s23 + $0x110] sm:$0xff]  ;;  %v411_v62 = vld [vmem:[%s6908_s23 + $0x128] sm:$0xff]  ;;  %v410_v63 = vld [vmem:[%s6908_s23 + $0x120] sm:$0xff] }
  0x47   : > { %549 = vperm.xlu1 %6217, %v383_v10   ;;  %546 = vperm.xlu0 %6216, %v382_v11   ;;  %v413_v0 = vld [vmem:[%s6908_s23 + $0x138] sm:$0xff]  ;;  %v412_v1 = vld [vmem:[%s6908_s23 + $0x130] sm:$0xff]  ;;  %v415_v2 = vld [vmem:[%s6908_s23 + $0x148] sm:$0xff] }
  0x48   : > { %v414_v3 = vld [vmem:[%s6908_s23 + $0x140] sm:$0xff]  ;;  %v417_v4 = vld [vmem:[%s6908_s23 + $0x158] sm:$0xff]  ;;  %v416_v5 = vld [vmem:[%s6908_s23 + $0x150] sm:$0xff] }
  0x49   : > { %5888 = vmatpush3.bf16.msra.mxu0 %v5885_v29  ;;  %v419_v6 = vld [vmem:[%s6908_s23 + $0x168] sm:$0xff]  ;;  %v418_v7 = vld [vmem:[%s6908_s23 + $0x160] sm:$0xff]  ;;  %v421_v8 = vld [vmem:[%s6908_s23 + $0x178] sm:$0xff] }
  0x4a   : > { %5890 = vmatprep.subr.bf16.mxu0 %v5889_v34  ;;  %v420_v9 = vld [vmem:[%s6908_s23 + $0x170] sm:$0xff]  ;;  %v423_v10 = vld [vmem:[%s6908_s23 + $0x188] sm:$0xff]  ;;  %v422_v11 = vld [vmem:[%s6908_s23 + $0x180] sm:$0xff] }
  0x4b   : > { %555 = vperm.xlu1 %6217, %v385_v16   ;;  %552 = vperm.xlu0 %6216, %v384_v17   ;;  %v425_v12 = vld [vmem:[%s6908_s23 + $0x198] sm:$0xff]  ;;  %v424_v13 = vld [vmem:[%s6908_s23 + $0x190] sm:$0xff]  ;;  %v427_v14 = vld [vmem:[%s6908_s23 + $0x1a8] sm:$0xff] }
  0x4c   : > { %v426_v15 = vld [vmem:[%s6908_s23 + $0x1a0] sm:$0xff]  ;;  %v429_v16 = vld [vmem:[%s6908_s23 + $0x1b8] sm:$0xff]  ;;  %v428_v17 = vld [vmem:[%s6908_s23 + $0x1b0] sm:$0xff] }
  0x4d   : > { %5892 = vmatpush3.bf16.msra.mxu0 %v5889_v34  ;;  %v431_v18 = vld [vmem:[%s6908_s23 + $0x1c8] sm:$0xff]  ;;  %v430_v19 = vld [vmem:[%s6908_s23 + $0x1c0] sm:$0xff]  ;;  %v433_v20 = vld [vmem:[%s6908_s23 + $0x1d8] sm:$0xff] }
  0x4e   : > { %5894 = vmatprep.subr.bf16.mxu0 %v5893_v39  ;;  %v432_v21 = vld [vmem:[%s6908_s23 + $0x1d0] sm:$0xff]  ;;  %v437_v25 = vld [vmem:[%s6908_s23 + $0x1f8] sm:$0xff] }
  0x4f   : > { %561 = vperm.xlu1 %6217, %v387_v22   ;;  %558 = vperm.xlu0 %6216, %v386_v23   ;;  %v435_v22 = vld [vmem:[%s6908_s23 + $0x1e8] sm:$0xff]  ;;  %v434_v23 = vld [vmem:[%s6908_s23 + $0x1e0] sm:$0xff]  ;;  %v436_v26 = vld [vmem:[%s6908_s23 + $0x1f0] sm:$0xff] }
  0x51   : > { %5896 = vmatpush3.bf16.msra.mxu0 %v5893_v39 }
  0x52   : > { %5898 = vmatprep.subr.bf16.mxu0 %v5897_v44 }
  0x53   : > { %567 = vperm.xlu1 %6217, %v389_v27   ;;  %564 = vperm.xlu0 %6216, %v388_v28   ;;  %v7093_v27 = vand.u32 127, %v9311_v24 }
  0x55   : > { %5900 = vmatpush3.bf16.msra.mxu0 %v5897_v44 }
  0x56   : > { %5902 = vmatprep.subr.bf16.mxu0 %v5901_v49 }
  0x57   : > { %573 = vperm.xlu1 %6217, %v391_v32   ;;  %570 = vperm.xlu0 %6216, %v390_v33  }
  0x59   : > { %5904 = vmatpush3.bf16.msra.mxu0 %v5901_v49 }
  0x5b   : > { %579 = vperm.xlu1 %6217, %v393_v37   ;;  %576 = vperm.xlu0 %6216, %v392_v38  }
  0x5f   : > { %585 = vperm.xlu1 %6217, %v395_v42   ;;  %582 = vperm.xlu0 %6216, %v394_v43  }
  0x63   : > { %591 = vperm.xlu1 %6217, %v397_v47   ;;  %588 = vperm.xlu0 %6216, %v396_v48  }
  0x67   : > { %597 = vperm.xlu1 %6217, %v399_v50   ;;  %594 = vperm.xlu0 %6216, %v398_v51  }
  0x6b   : > { %603 = vperm.xlu1 %6217, %v401_v52   ;;  %600 = vperm.xlu0 %6216, %v400_v53  }
  0x6f   : > { %609 = vperm.xlu1 %6217, %v403_v54   ;;  %606 = vperm.xlu0 %6216, %v402_v55  }
  0x73   : > { %615 = vperm.xlu1 %6217, %v405_v56   ;;  %612 = vperm.xlu0 %6216, %v404_v57  }
  0x77   : > { %621 = vperm.xlu1 %6217, %v407_v58   ;;  %618 = vperm.xlu0 %6216, %v406_v59  }
  0x7b   : > { %627 = vperm.xlu1 %6217, %v409_v60   ;;  %624 = vperm.xlu0 %6216, %v408_v61  }
  0x7f   : > { %633 = vperm.xlu1 %6217, %v411_v62   ;;  %630 = vperm.xlu0 %6216, %v410_v63  }
  0x83   : > { %639 = vperm.xlu1 %6217, %v413_v0   ;;  %636 = vperm.xlu0 %6216, %v412_v1  }
  0x87   : > { %645 = vperm.xlu1 %6217, %v415_v2   ;;  %642 = vperm.xlu0 %6216, %v414_v3  }
  0x8b   : > { %651 = vperm.xlu1 %6217, %v417_v4   ;;  %648 = vperm.xlu0 %6216, %v416_v5  }
  0x8f   : > { %657 = vperm.xlu1 %6217, %v419_v6   ;;  %654 = vperm.xlu0 %6216, %v418_v7  }
  0x93   : > { %663 = vperm.xlu1 %6217, %v421_v8   ;;  %660 = vperm.xlu0 %6216, %v420_v9  }
  0x97   : > { %669 = vperm.xlu1 %6217, %v423_v10   ;;  %666 = vperm.xlu0 %6216, %v422_v11  }
  0x9b   : > { %675 = vperm.xlu1 %6217, %v425_v12   ;;  %672 = vperm.xlu0 %6216, %v424_v13  }
  0x9f   : > { %681 = vperm.xlu1 %6217, %v427_v14   ;;  %678 = vperm.xlu0 %6216, %v426_v15  }
  0xa3   : > { %687 = vperm.xlu1 %6217, %v429_v16   ;;  %684 = vperm.xlu0 %6216, %v428_v17  }
  0xa7   : > { %693 = vperm.xlu1 %6217, %v431_v18   ;;  %690 = vperm.xlu0 %6216, %v430_v19  }
  0xab   : > { %699 = vperm.xlu1 %6217, %v433_v20   ;;  %696 = vperm.xlu0 %6216, %v432_v21  }
  0xaf   : > { %705 = vperm.xlu1 %6217, %v435_v22   ;;  %702 = vperm.xlu0 %6216, %v434_v23  }
  0xb3   : > { %711 = vperm.xlu1 %6217, %v437_v25   ;;  %708 = vperm.xlu0 %6216, %v436_v26  }
  0xb6   : > { %v529_v28 = vpop.permute.xlu1 %528  ;;  %v523_v29 = vpop.permute.xlu0 %522 }
  0xb7   : > { %vm713_vm1 = vcmp.eq.s32.totalorder %v7093_v27, %v523_v29  ;;  %vm715_vm2 = vcmp.eq.s32.totalorder %v7093_v27, %v529_v28 }
  0xb8   : > { %5449 = vmatprep.mubr.msk.f32.mxu0 %vm713_vm1, %v9309_v30 }
  0xba   : > { %v532_v31 = vpop.permute.xlu1 %531  ;;  %v526_v32 = vpop.permute.xlu0 %525 }
  0xbb   : > { %vm714_vm3 = vcmp.eq.s32.totalorder %v7093_v27, %v526_v32  ;;  %vm716_vm4 = vcmp.eq.s32.totalorder %v7093_v27, %v532_v31  ;;  %v488_v32 = vld [vmem:[%s9304_s5 + $0x108] sm:$0xff] }
  0xbc   : > { %5450 = vmatmul.mubr.msk.f32.vlgmr.msra.gmra.mrb[0].mxu0 %vm714_vm3, %v9309_v30  ;;  %1394 = vmatprep.mubr.f32.mxu1 %v488_v32  ;;  %v496_v32 = vld [vmem:[%s9304_s5 + $0x148] sm:$0xff] }
  0xbd   : > { %5452 = vmatprep.mubr.msk.f32.mxu0 %vm715_vm2, %v9309_v30 }
  0xbe   : > { %v538_v33 = vpop.permute.xlu1 %537  ;;  %v535_v34 = vpop.permute.xlu0 %534 }
  0xbf   : > { %vm717_vm5 = vcmp.eq.s32.totalorder %v7093_v27, %v535_v34  ;;  %vm718_vm6 = vcmp.eq.s32.totalorder %v7093_v27, %v538_v33 }
  0xc0   : > { %5453 = vmatmul.mubr.msk.f32.gmra.mrb[2].mxu0 %vm716_vm4, %v9309_v30 }
  0xc1   : > { %5455 = vmatprep.mubr.msk.f32.mxu0 %vm717_vm5, %v9309_v30 }
  0xc2   : > { %v544_v35 = vpop.permute.xlu1 %543  ;;  %v541_v36 = vpop.permute.xlu0 %540 }
  0xc3   : > { %vm719_vm7 = vcmp.eq.s32.totalorder %v7093_v27, %v541_v36  ;;  %vm720_vm8 = vcmp.eq.s32.totalorder %v7093_v27, %v544_v35  ;;  %v456_v35 = vld [vmem:[%s9304_s5 + $0x8] sm:$0xff] }
  0xc4   : > { %5456 = vmatmul.mubr.msk.f32.gmra.mrb[4].mxu0 %vm718_vm6, %v9309_v30 }
  0xc5   : > { %5458 = vmatprep.mubr.msk.f32.mxu0 %vm719_vm7, %v9309_v30 }
  0xc6   : > { %v550_v37 = vpop.permute.xlu1 %549  ;;  %v547_v38 = vpop.permute.xlu0 %546 }
  0xc7   : > { %vm721_vm9 = vcmp.eq.s32.totalorder %v7093_v27, %v547_v38  ;;  %vm722_vm10 = vcmp.eq.s32.totalorder %v7093_v27, %v550_v37 }
  0xc8   : > { %5459 = vmatmul.mubr.msk.f32.gmra.mrb[6].mxu0 %vm720_vm8, %v9309_v30 }
  0xc9   : > { %5461 = vmatprep.mubr.msk.f32.mxu0 %vm721_vm9, %v9309_v30 }
  0xca   : > { %v556_v39 = vpop.permute.xlu1 %555  ;;  %v553_v40 = vpop.permute.xlu0 %552 }
  0xcb   : > { %vm723_vm11 = vcmp.eq.s32.totalorder %v7093_v27, %v553_v40  ;;  %vm724_vm12 = vcmp.eq.s32.totalorder %v7093_v27, %v556_v39 }
  0xcc   : > { %5462 = vmatmul.mubr.msk.f32.gmra.mrb[8].mxu0 %vm722_vm10, %v9309_v30 }
  0xcd   : > { %5464 = vmatprep.mubr.msk.f32.mxu0 %vm723_vm11, %v9309_v30 }
  0xce   : > { %v562_v41 = vpop.permute.xlu1 %561  ;;  %v559_v42 = vpop.permute.xlu0 %558 }
  0xcf   : > { %vm725_vm13 = vcmp.eq.s32.totalorder %v7093_v27, %v559_v42  ;;  %vm726_vm14 = vcmp.eq.s32.totalorder %v7093_v27, %v562_v41 }
  0xd0   : > { %5465 = vmatmul.mubr.msk.f32.gmra.mrb[10].mxu0 %vm724_vm12, %v9309_v30 }
  0xd1   : > { %5467 = vmatprep.mubr.msk.f32.mxu0 %vm725_vm13, %v9309_v30 }
  0xd2   : > { %v568_v43 = vpop.permute.xlu1 %567  ;;  %v565_v44 = vpop.permute.xlu0 %564 }
  0xd3   : > { %vm727_vm15 = vcmp.eq.s32.totalorder %v7093_v27, %v565_v44  ;;  %vm728_vm0 = vcmp.eq.s32.totalorder %v7093_v27, %v568_v43 }
  0xd4   : > { %5468 = vmatmul.mubr.msk.f32.gmra.mrb[12].mxu0 %vm726_vm14, %v9309_v30 }
  0xd5   : > { %5470 = vmatprep.mubr.msk.f32.mxu0 %vm727_vm15, %v9309_v30 }
  0xd6   : > { %v574_v45 = vpop.permute.xlu1 %573  ;;  %v571_v46 = vpop.permute.xlu0 %570 }
  0xd7   : > { %vm729_vm1 = vcmp.eq.s32.totalorder %v7093_v27, %v571_v46  ;;  %vm730_vm2 = vcmp.eq.s32.totalorder %v7093_v27, %v574_v45 }
  0xd8   : > { %5471 = vmatmul.mubr.msk.f32.gmra.mrb[14].mxu0 %vm728_vm0, %v9309_v30 }
  0xd9   : > { %5473 = vmatprep.mubr.msk.f32.mxu0 %vm729_vm1, %v9309_v30 }
  0xda   : > { %v580_v47 = vpop.permute.xlu1 %579  ;;  %v577_v48 = vpop.permute.xlu0 %576 }
  0xdb   : > { %vm731_vm3 = vcmp.eq.s32.totalorder %v7093_v27, %v577_v48  ;;  %vm732_vm4 = vcmp.eq.s32.totalorder %v7093_v27, %v580_v47 }
  0xdc   : > { %5474 = vmatmul.mubr.msk.f32.gmra.mrb[16].mxu0 %vm730_vm2, %v9309_v30 }
  0xdd   : > { %5476 = vmatprep.mubr.msk.f32.mxu0 %vm731_vm3, %v9309_v30 }
  0xde   : > { %v586_v49 = vpop.permute.xlu1 %585  ;;  %v583_v50 = vpop.permute.xlu0 %582 }
  0xdf   : > { %vm733_vm5 = vcmp.eq.s32.totalorder %v7093_v27, %v583_v50  ;;  %vm734_vm6 = vcmp.eq.s32.totalorder %v7093_v27, %v586_v49 }
  0xe0   : > { %5477 = vmatmul.mubr.msk.f32.gmra.mrb[18].mxu0 %vm732_vm4, %v9309_v30 }
  0xe1   : > { %5479 = vmatprep.mubr.msk.f32.mxu0 %vm733_vm5, %v9309_v30 }
  0xe2   : > { %v592_v51 = vpop.permute.xlu1 %591  ;;  %v589_v52 = vpop.permute.xlu0 %588 }
  0xe3   : > { %vm735_vm7 = vcmp.eq.s32.totalorder %v7093_v27, %v589_v52  ;;  %vm736_vm8 = vcmp.eq.s32.totalorder %v7093_v27, %v592_v51 }
  0xe4   : > { %5480 = vmatmul.mubr.msk.f32.gmra.mrb[20].mxu0 %vm734_vm6, %v9309_v30 }
  0xe5   : > { %5482 = vmatprep.mubr.msk.f32.mxu0 %vm735_vm7, %v9309_v30 }
  0xe6   : > { %v598_v53 = vpop.permute.xlu1 %597  ;;  %v595_v54 = vpop.permute.xlu0 %594 }
  0xe7   : > { %vm737_vm9 = vcmp.eq.s32.totalorder %v7093_v27, %v595_v54  ;;  %vm738_vm10 = vcmp.eq.s32.totalorder %v7093_v27, %v598_v53 }
  0xe8   : > { %5483 = vmatmul.mubr.msk.f32.gmra.mrb[22].mxu0 %vm736_vm8, %v9309_v30 }
  0xe9   : > { %5485 = vmatprep.mubr.msk.f32.mxu0 %vm737_vm9, %v9309_v30 }
  0xea   : > { %v604_v55 = vpop.permute.xlu1 %603  ;;  %v601_v56 = vpop.permute.xlu0 %600 }
  0xeb   : > { %vm739_vm11 = vcmp.eq.s32.totalorder %v7093_v27, %v601_v56  ;;  %vm740_vm12 = vcmp.eq.s32.totalorder %v7093_v27, %v604_v55 }
  0xec   : > { %5486 = vmatmul.mubr.msk.f32.gmra.mrb[24].mxu0 %vm738_vm10, %v9309_v30 }
  0xed   : > { %5488 = vmatprep.mubr.msk.f32.mxu0 %vm739_vm11, %v9309_v30 }
  0xee   : > { %v610_v57 = vpop.permute.xlu1 %609  ;;  %v607_v58 = vpop.permute.xlu0 %606 }
  0xef   : > { %vm741_vm13 = vcmp.eq.s32.totalorder %v7093_v27, %v607_v58  ;;  %vm742_vm14 = vcmp.eq.s32.totalorder %v7093_v27, %v610_v57 }
  0xf0   : > { %5489 = vmatmul.mubr.msk.f32.gmra.mrb[26].mxu0 %vm740_vm12, %v9309_v30 }
  0xf1   : > { %5491 = vmatprep.mubr.msk.f32.mxu0 %vm741_vm13, %v9309_v30 }
  0xf2   : > { %v616_v59 = vpop.permute.xlu1 %615  ;;  %v613_v60 = vpop.permute.xlu0 %612 }
  0xf3   : > { %vm743_vm15 = vcmp.eq.s32.totalorder %v7093_v27, %v613_v60  ;;  %vm744_vm0 = vcmp.eq.s32.totalorder %v7093_v27, %v616_v59 }
  0xf4   : > { %5492 = vmatmul.mubr.msk.f32.gmra.mrb[28].mxu0 %vm742_vm14, %v9309_v30 }
  0xf5   : > { %5494 = vmatprep.mubr.msk.f32.mxu0 %vm743_vm15, %v9309_v30 }
  0xf6   : > { %v622_v61 = vpop.permute.xlu1 %621  ;;  %v619_v62 = vpop.permute.xlu0 %618 }
  0xf7   : > { %vm745_vm1 = vcmp.eq.s32.totalorder %v7093_v27, %v619_v62  ;;  %vm746_vm2 = vcmp.eq.s32.totalorder %v7093_v27, %v622_v61 }
  0xf8   : > { %5495 = vmatmul.mubr.msk.f32.gmra.mrb[30].mxu0 %vm744_vm0, %v9309_v30 }
  0xf9   : > { %5497 = vmatprep.mubr.msk.f32.mxu0 %vm745_vm1, %v9309_v30 }
  0xfa   : > { %v628_v63 = vpop.permute.xlu1 %627  ;;  %v625_v0 = vpop.permute.xlu0 %624 }
  0xfb   : > { %vm747_vm3 = vcmp.eq.s32.totalorder %v7093_v27, %v625_v0  ;;  %vm748_vm4 = vcmp.eq.s32.totalorder %v7093_v27, %v628_v63 }
  0xfc   : > { %5498 = vmatmul.mubr.msk.f32.gmra.mrb[32].mxu0 %vm746_vm2, %v9309_v30 }
  0xfd   : > { %5500 = vmatprep.mubr.msk.f32.mxu0 %vm747_vm3, %v9309_v30 }
  0xfe   : > { %v634_v1 = vpop.permute.xlu1 %633  ;;  %v631_v2 = vpop.permute.xlu0 %630 }
  0xff   : > { %vm749_vm5 = vcmp.eq.s32.totalorder %v7093_v27, %v631_v2  ;;  %vm750_vm6 = vcmp.eq.s32.totalorder %v7093_v27, %v634_v1 }
 0x100   : > { %5501 = vmatmul.mubr.msk.f32.gmra.mrb[34].mxu0 %vm748_vm4, %v9309_v30 }
 0x101   : > { %5503 = vmatprep.mubr.msk.f32.mxu0 %vm749_vm5, %v9309_v30 }
 0x102   : > { %v640_v3 = vpop.permute.xlu1 %639  ;;  %v637_v4 = vpop.permute.xlu0 %636 }
 0x103   : > { %vm751_vm7 = vcmp.eq.s32.totalorder %v7093_v27, %v637_v4  ;;  %vm752_vm8 = vcmp.eq.s32.totalorder %v7093_v27, %v640_v3 }
 0x104   : > { %5504 = vmatmul.mubr.msk.f32.gmra.mrb[36].mxu0 %vm750_vm6, %v9309_v30 }
 0x105   : > { %5506 = vmatprep.mubr.msk.f32.mxu0 %vm751_vm7, %v9309_v30 }
 0x106   : > { %v646_v5 = vpop.permute.xlu1 %645  ;;  %v643_v6 = vpop.permute.xlu0 %642 }
 0x107   : > { %vm753_vm9 = vcmp.eq.s32.totalorder %v7093_v27, %v643_v6  ;;  %vm754_vm10 = vcmp.eq.s32.totalorder %v7093_v27, %v646_v5 }
 0x108   : > { %5507 = vmatmul.mubr.msk.f32.gmra.mrb[38].mxu0 %vm752_vm8, %v9309_v30 }
 0x109   : > { %5509 = vmatprep.mubr.msk.f32.mxu0 %vm753_vm9, %v9309_v30 }
 0x10a   : > { %v652_v7 = vpop.permute.xlu1 %651  ;;  %v649_v8 = vpop.permute.xlu0 %648 }
 0x10b   : > { %vm755_vm11 = vcmp.eq.s32.totalorder %v7093_v27, %v649_v8  ;;  %vm756_vm12 = vcmp.eq.s32.totalorder %v7093_v27, %v652_v7 }
 0x10c   : > { %5510 = vmatmul.mubr.msk.f32.gmra.mrb[40].mxu0 %vm754_vm10, %v9309_v30 }
 0x10d   : > { %5512 = vmatprep.mubr.msk.f32.mxu0 %vm755_vm11, %v9309_v30 }
 0x10e   : > { %v658_v9 = vpop.permute.xlu1 %657  ;;  %v655_v10 = vpop.permute.xlu0 %654 }
 0x10f   : > { %vm757_vm13 = vcmp.eq.s32.totalorder %v7093_v27, %v655_v10  ;;  %vm758_vm14 = vcmp.eq.s32.totalorder %v7093_v27, %v658_v9 }
 0x110   : > { %5513 = vmatmul.mubr.msk.f32.gmra.mrb[42].mxu0 %vm756_vm12, %v9309_v30 }
 0x111   : > { %5515 = vmatprep.mubr.msk.f32.mxu0 %vm757_vm13, %v9309_v30 }
 0x112   : > { %v664_v11 = vpop.permute.xlu1 %663  ;;  %v661_v12 = vpop.permute.xlu0 %660 }
 0x113   : > { %vm759_vm15 = vcmp.eq.s32.totalorder %v7093_v27, %v661_v12  ;;  %vm760_vm0 = vcmp.eq.s32.totalorder %v7093_v27, %v664_v11 }
 0x114   : > { %5516 = vmatmul.mubr.msk.f32.gmra.mrb[44].mxu0 %vm758_vm14, %v9309_v30 }
 0x115   : > { %5518 = vmatprep.mubr.msk.f32.mxu0 %vm759_vm15, %v9309_v30 }
 0x116   : > { %v670_v13 = vpop.permute.xlu1 %669  ;;  %v667_v14 = vpop.permute.xlu0 %666 }
 0x117   : > { %vm761_vm1 = vcmp.eq.s32.totalorder %v7093_v27, %v667_v14  ;;  %vm762_vm2 = vcmp.eq.s32.totalorder %v7093_v27, %v670_v13 }
 0x118   : > { %5519 = vmatmul.mubr.msk.f32.gmra.mrb[46].mxu0 %vm760_vm0, %v9309_v30 }
 0x119   : > { %5521 = vmatprep.mubr.msk.f32.mxu0 %vm761_vm1, %v9309_v30  ;;  %vm1644_vm1 = vcmask 261120  }
 0x11a   : > { %v676_v15 = vpop.permute.xlu1 %675  ;;  %v673_v16 = vpop.permute.xlu0 %672 }
 0x11b   : > { %vm763_vm3 = vcmp.eq.s32.totalorder %v7093_v27, %v673_v16  ;;  %vm764_vm4 = vcmp.eq.s32.totalorder %v7093_v27, %v676_v15 }
 0x11c   : > { %5522 = vmatmul.mubr.msk.f32.gmra.mrb[48].mxu0 %vm762_vm2, %v9309_v30  ;;  %vm9368_vm2 = vcmask 523264  }
 0x11d   : > { %5524 = vmatprep.mubr.msk.f32.mxu0 %vm763_vm3, %v9309_v30 }
 0x11e   : > { %v682_v17 = vpop.permute.xlu1 %681  ;;  %v679_v18 = vpop.permute.xlu0 %678 }
 0x11f   : > { %vm765_vm5 = vcmp.eq.s32.totalorder %v7093_v27, %v679_v18  ;;  %vm766_vm6 = vcmp.eq.s32.totalorder %v7093_v27, %v682_v17 }
 0x120   : > { %5525 = vmatmul.mubr.msk.f32.gmra.mrb[50].mxu0 %vm764_vm4, %v9309_v30 }
 0x121   : > { %5527 = vmatprep.mubr.msk.f32.mxu0 %vm765_vm5, %v9309_v30 }
 0x122   : > { %v688_v19 = vpop.permute.xlu1 %687  ;;  %v685_v20 = vpop.permute.xlu0 %684 }
 0x123   : > { %vm767_vm7 = vcmp.eq.s32.totalorder %v7093_v27, %v685_v20  ;;  %vm768_vm8 = vcmp.eq.s32.totalorder %v7093_v27, %v688_v19  ;;  %v487_v19 = vld [vmem:[%s9304_s5 + $0x100] sm:$0xff] }
 0x124   : > { %5528 = vmatmul.mubr.msk.f32.gmra.mrb[52].mxu0 %vm766_vm6, %v9309_v30  ;;  %v455_v20 = vld [vmem:[%s9304_s5] sm:$0xff] }
 0x125   : > { %5530 = vmatprep.mubr.msk.f32.mxu0 %vm767_vm7, %v9309_v30 }
 0x126   : > { %v694_v21 = vpop.permute.xlu1 %693  ;;  %v691_v22 = vpop.permute.xlu0 %690 }
 0x127   : > { %vm769_vm9 = vcmp.eq.s32.totalorder %v7093_v27, %v691_v22  ;;  %vm770_vm10 = vcmp.eq.s32.totalorder %v7093_v27, %v694_v21  ;;  %v492_v22 = vld [vmem:[%s9304_s5 + $0x128] sm:$0xff] }
 0x128   : > { %5531 = vmatmul.mubr.msk.f32.gmra.mrb[54].mxu0 %vm768_vm8, %v9309_v30 }
 0x129   : > { %5533 = vmatprep.mubr.msk.f32.mxu0 %vm769_vm9, %v9309_v30 }
 0x12a   : > { %v700_v23 = vpop.permute.xlu1 %699  ;;  %v697_v25 = vpop.permute.xlu0 %696 }
 0x12b   : > { %vm771_vm11 = vcmp.eq.s32.totalorder %v7093_v27, %v697_v25  ;;  %vm772_vm12 = vcmp.eq.s32.totalorder %v7093_v27, %v700_v23  ;;  %v460_v23 = vld [vmem:[%s9304_s5 + $0x28] sm:$0xff] }
 0x12c   : > { %5534 = vmatmul.mubr.msk.f32.gmra.mrb[56].mxu0 %vm770_vm10, %v9309_v30 }
 0x12d   : > { %5536 = vmatprep.mubr.msk.f32.mxu0 %vm771_vm11, %v9309_v30 }
 0x12e   : > { %v706_v26 = vpop.permute.xlu1 %705  ;;  %v703_v28 = vpop.permute.xlu0 %702 }
 0x12f   : > { %vm773_vm13 = vcmp.eq.s32.totalorder %v7093_v27, %v703_v28  ;;  %vm774_vm14 = vcmp.eq.s32.totalorder %v7093_v27, %v706_v26  ;;  %v491_v28 = vld [vmem:[%s9304_s5 + $0x120] sm:$0xff] }
 0x130   : > { %5537 = vmatmul.mubr.msk.f32.gmra.mrb[58].mxu0 %vm772_vm12, %v9309_v30 }
 0x131   : > { %5539 = vmatprep.mubr.msk.f32.mxu0 %vm773_vm13, %v9309_v30 }
 0x132   : > { %v709_v29 = vpop.permute.xlu0 %708  ;;  %v712_v31 = vpop.permute.xlu1 %711 }
 0x133   : > { %vm775_vm15 = vcmp.eq.s32.totalorder %v7093_v27, %v709_v29  ;;  %vm776_vm0 = vcmp.eq.s32.totalorder %v7093_v27, %v712_v31  ;;  %v459_v29 = vld [vmem:[%s9304_s5 + $0x20] sm:$0xff] }
 0x134   : > { %5540 = vmatmul.mubr.msk.f32.gmra.mrb[60].mxu0 %vm774_vm14, %v9309_v30 }
 0x135   : > { %5542 = vmatprep.mubr.msk.f32.mxu0 %vm775_vm15, %v9309_v30 }
 0x138   : > { %5543 = vmatmul.mubr.msk.f32.gmra.mrb[62].mxu0 %vm776_vm0, %v9309_v30 }
 0x139   : > { %1354 = vmatprep.mubr.f32.mxu0 %v456_v35  ;;  %v464_v35 = vld [vmem:[%s9304_s5 + $0x48] sm:$0xff] }
 0x18f   : > { %v7226_v33 = vpop.f32.mrb[0].mxu0 }
 0x190   : > { %v7228_v34 = vpop.f32.mrb[1].mxu0 }
 0x191   : > { %v5907_v36 = vpack.c.bf16 %v7226_v33, %v7228_v34 }
 0x193   : > { %v7235_v27 = vpop.f32.mrb[2].mxu0 }
 0x194   : > { %v7237_v37 = vpop.f32.mrb[3].mxu0 }
 0x195   : > { %v5911_v38 = vpack.c.bf16 %v7235_v27, %v7237_v37 }
 0x197   : > { %v7241_v39 = vpop.f32.mrb[4].mxu0 }
 0x198   : > { %v7243_v40 = vpop.f32.mrb[5].mxu0 }
 0x199   : > { %v5915_v41 = vpack.c.bf16 %v7241_v39, %v7243_v40 }
 0x19b   : > { %v7247_v42 = vpop.f32.mrb[6].mxu0 }
 0x19c   : > { %v7249_v43 = vpop.f32.mrb[7].mxu0 }
 0x19d   : > { %v5919_v44 = vpack.c.bf16 %v7247_v42, %v7249_v43 }
 0x19f   : > { %v7253_v45 = vpop.f32.mrb[8].mxu0 }
 0x1a0   : > { %v7255_v46 = vpop.f32.mrb[9].mxu0 }
 0x1a1   : > { %v5923_v47 = vpack.c.bf16 %v7253_v45, %v7255_v46 }
 0x1a3   : > { %v7259_v48 = vpop.f32.mrb[10].mxu0 }
 0x1a4   : > { %v7261_v49 = vpop.f32.mrb[11].mxu0 }
 0x1a5   : > { %v5927_v50 = vpack.c.bf16 %v7259_v48, %v7261_v49 }
 0x1a7   : > { %v7265_v51 = vpop.f32.mrb[12].mxu0 }
 0x1a8   : > { %v7267_v52 = vpop.f32.mrb[13].mxu0 }
 0x1a9   : > { %v5931_v53 = vpack.c.bf16 %v7265_v51, %v7267_v52 }
 0x1ab   : > { %v7271_v54 = vpop.f32.mrb[14].mxu0 }
 0x1ac   : > { %v7273_v55 = vpop.f32.mrb[15].mxu0 }
 0x1ad   : > { %v5935_v56 = vpack.c.bf16 %v7271_v54, %v7273_v55 }
 0x1af   : > { %v7277_v57 = vpop.f32.mrb[16].mxu0 }
 0x1b0   : > { %v7279_v58 = vpop.f32.mrb[17].mxu0 }
 0x1b1   : > { %v5905_v59 = vpack.c.bf16 %v7277_v57, %v7279_v58 }
 0x1b3   : > { %v7283_v60 = vpop.f32.mrb[18].mxu0  ;;  %5906 = vmatprep.subr.bf16.mxu0 %v5905_v59  ;;  %6121 = vmatprep.subr.bf16.mxu1 %v5905_v59 }
 0x1b4   : > { %v7285_v61 = vpop.f32.mrb[19].mxu0  ;;  %5908 = vmatpush3.bf16.msra.mxu0 %v5907_v36  ;;  %6129 = vmatpush3.bf16.msra.mxu1 %v5907_v36 }
 0x1b5   : > { %v5909_v62 = vpack.c.bf16 %v7283_v60, %v7285_v61 }
 0x1b7   : > { %v7289_v63 = vpop.f32.mrb[20].mxu0  ;;  %5910 = vmatprep.subr.bf16.mxu0 %v5909_v62  ;;  %6122 = vmatprep.subr.bf16.mxu1 %v5909_v62  ;;  %v499_v62 = vld [vmem:[%s9304_s5 + $0x160] sm:$0xff] }
 0x1b8   : > { %v7291_v0 = vpop.f32.mrb[21].mxu0  ;;  %5912 = vmatpush3.bf16.msra.mxu0 %v5911_v38  ;;  %6130 = vmatpush3.bf16.msra.mxu1 %v5911_v38 }
 0x1b9   : > { %v5913_v1 = vpack.c.bf16 %v7289_v63, %v7291_v0 }
 0x1bb   : > { %v7295_v2 = vpop.f32.mrb[22].mxu0  ;;  %5914 = vmatprep.subr.bf16.mxu0 %v5913_v1  ;;  %6123 = vmatprep.subr.bf16.mxu1 %v5913_v1  ;;  %v467_v1 = vld [vmem:[%s9304_s5 + $0x60] sm:$0xff] }
 0x1bc   : > { %v7297_v3 = vpop.f32.mrb[23].mxu0  ;;  %5916 = vmatpush3.bf16.msra.mxu0 %v5915_v41  ;;  %6131 = vmatpush3.bf16.msra.mxu1 %v5915_v41  ;;  %v495_v41 = vld [vmem:[%s9304_s5 + $0x140] sm:$0xff] }
 0x1bd   : > { %v5917_v4 = vpack.c.bf16 %v7295_v2, %v7297_v3 }
 0x1bf   : > { %v7301_v5 = vpop.f32.mrb[24].mxu0  ;;  %5918 = vmatprep.subr.bf16.mxu0 %v5917_v4  ;;  %6124 = vmatprep.subr.bf16.mxu1 %v5917_v4 }
 0x1c0   : > { %v7303_v6 = vpop.f32.mrb[25].mxu0  ;;  %5920 = vmatpush3.bf16.msra.mxu0 %v5919_v44  ;;  %6132 = vmatpush3.bf16.msra.mxu1 %v5919_v44  ;;  %v463_v44 = vld [vmem:[%s9304_s5 + $0x40] sm:$0xff] }
 0x1c1   : > { %v5921_v7 = vpack.c.bf16 %v7301_v5, %v7303_v6 }
 0x1c3   : > { %v7307_v8 = vpop.f32.mrb[26].mxu0  ;;  %5922 = vmatprep.subr.bf16.mxu0 %v5921_v7  ;;  %6125 = vmatprep.subr.bf16.mxu1 %v5921_v7  ;;  %v504_v7 = vld [vmem:[%s9304_s5 + $0x188] sm:$0xff] }
 0x1c4   : > { %v7309_v9 = vpop.f32.mrb[27].mxu0  ;;  %5924 = vmatpush3.bf16.msra.mxu0 %v5923_v47  ;;  %6133 = vmatpush3.bf16.msra.mxu1 %v5923_v47 }
 0x1c5   : > { %v5925_v10 = vpack.c.bf16 %v7307_v8, %v7309_v9 }
 0x1c7   : > { %v7313_v11 = vpop.f32.mrb[28].mxu0  ;;  %5926 = vmatprep.subr.bf16.mxu0 %v5925_v10  ;;  %6126 = vmatprep.subr.bf16.mxu1 %v5925_v10  ;;  %v472_v10 = vld [vmem:[%s9304_s5 + $0x88] sm:$0xff] }
 0x1c8   : > { %v7315_v12 = vpop.f32.mrb[29].mxu0  ;;  %5928 = vmatpush3.bf16.msra.mxu0 %v5927_v50  ;;  %6134 = vmatpush3.bf16.msra.mxu1 %v5927_v50  ;;  %v500_v50 = vld [vmem:[%s9304_s5 + $0x168] sm:$0xff] }
 0x1c9   : > { %v5929_v13 = vpack.c.bf16 %v7313_v11, %v7315_v12 }
 0x1cb   : > { %v7319_v14 = vpop.f32.mrb[30].mxu0  ;;  %5930 = vmatprep.subr.bf16.mxu0 %v5929_v13  ;;  %6127 = vmatprep.subr.bf16.mxu1 %v5929_v13 }
 0x1cc   : > { %v7321_v15 = vpop.f32.mrb[31].mxu0  ;;  %5932 = vmatpush3.bf16.msra.mxu0 %v5931_v53  ;;  %6135 = vmatpush3.bf16.msra.mxu1 %v5931_v53  ;;  %v468_v53 = vld [vmem:[%s9304_s5 + $0x68] sm:$0xff] }
 0x1cd   : > { %v5933_v16 = vpack.c.bf16 %v7319_v14, %v7321_v15 }
 0x1cf   : > { %v7325_v17 = vpop.f32.mrb[32].mxu0  ;;  %5934 = vmatprep.subr.bf16.mxu0 %v5933_v16  ;;  %6128 = vmatprep.subr.bf16.mxu1 %v5933_v16 }
 0x1d0   : > { %9369 = vst [vmem:[#allocation5_spill] sm:$0xff] %v7325_v17  ;;  %v7327_v18 = vpop.f32.mrb[33].mxu0  ;;  %5936 = vmatpush3.bf16.msra.mxu0 %v5935_v56  ;;  %6136 = vmatpush3.bf16.msra.mxu1 %v5935_v56 }
 0x1d1   : > { %9370 = vst [vmem:[#allocation6_spill] sm:$0xff] %v7327_v18  ;;  %v5939_v21 = vpack.c.bf16 %v7325_v17, %v7327_v18 }
 0x1d3   : > { %v7343_v25 = vpop.f32.mrb[34].mxu0  ;;  %1395 = vmatmul.mubr.f32.vlgmr.msra.gmra.mrb[0].mxu1 %v487_v19  ;;  %1355 = vmatmul.mubr.f32.vlgmr.msra.gmra.mrb[64].mxu0 %v455_v20  ;;  %v503_v19 = vld [vmem:[%s9304_s5 + $0x180] sm:$0xff] }
 0x1d4   : > { %9371 = vst [vmem:[#allocation7_spill] sm:$0xff] %v7343_v25  ;;  %v7345_v26 = vpop.f32.mrb[35].mxu0  ;;  %1399 = vmatprep.mubr.f32.mxu1 %v492_v22  ;;  %1359 = vmatprep.mubr.f32.mxu0 %v460_v23  ;;  %v471_v20 = vld [vmem:[%s9304_s5 + $0x80] sm:$0xff]  ;;  %v508_v23 = vld [vmem:[%s9304_s5 + $0x1a8] sm:$0xff] }
 0x1d5   : > { %9372 = vst [vmem:[#allocation8_spill] sm:$0xff] %v7345_v26  ;;  %v5943_v31 = vpack.c.bf16 %v7343_v25, %v7345_v26 }
 0x1d7   : > { %v7361_v36 = vpop.f32.mrb[36].mxu0  ;;  %1400 = vmatmul.mubr.f32.gmra.mrb[2].mxu1 %v491_v28  ;;  %1360 = vmatmul.mubr.f32.gmra.mrb[66].mxu0 %v459_v29  ;;  %v476_v28 = vld [vmem:[%s9304_s5 + $0xa8] sm:$0xff] }
 0x1d8   : > { %9373 = vst [vmem:[#allocation9_spill] sm:$0xff] %v7361_v36  ;;  %v7363_v38 = vpop.f32.mrb[37].mxu0  ;;  %1404 = vmatprep.mubr.f32.mxu1 %v496_v32  ;;  %1364 = vmatprep.mubr.f32.mxu0 %v464_v35  ;;  %v507_v35 = vld [vmem:[%s9304_s5 + $0x1a0] sm:$0xff] }
 0x1d9   : > { %9374 = vst [vmem:[#allocation10_spill] sm:$0xff] %v7363_v38  ;;  %v5947_v47 = vpack.c.bf16 %v7361_v36, %v7363_v38 }
 0x1db   : > { %v7379_v56 = vpop.f32.mrb[38].mxu0  ;;  %1405 = vmatmul.mubr.f32.gmra.mrb[4].mxu1 %v495_v41  ;;  %1365 = vmatmul.mubr.f32.gmra.mrb[68].mxu0 %v463_v44  ;;  %v475_v41 = vld [vmem:[%s9304_s5 + $0xa0] sm:$0xff] }
 0x1dc   : > { %9375 = vst [vmem:[#allocation11_spill] sm:$0xff] %v7379_v56  ;;  %v7381_v59 = vpop.f32.mrb[39].mxu0  ;;  %1409 = vmatprep.mubr.f32.mxu1 %v500_v50  ;;  %1369 = vmatprep.mubr.f32.mxu0 %v468_v53  ;;  %v512_v50 = vld [vmem:[%s9304_s5 + $0x1c8] sm:$0xff] }
 0x1dd   : > { %9376 = vst [vmem:[#allocation12_spill] sm:$0xff] %v7381_v59  ;;  %v480_v53 = vld [vmem:[%s9304_s5 + $0xc8] sm:$0xff] }
 0x1df   : > { %v7397_v13 = vpop.f32.mrb[40].mxu0  ;;  %1410 = vmatmul.mubr.f32.gmra.mrb[6].mxu1 %v499_v62  ;;  %1370 = vmatmul.mubr.f32.gmra.mrb[70].mxu0 %v467_v1 }
 0x1e0   : > { %9377 = vst [vmem:[#allocation13_spill] sm:$0xff] %v7397_v13  ;;  %v7399_v16 = vpop.f32.mrb[41].mxu0  ;;  %1414 = vmatprep.mubr.f32.mxu1 %v504_v7  ;;  %1374 = vmatprep.mubr.f32.mxu0 %v472_v10  ;;  %v511_v7 = vld [vmem:[%s9304_s5 + $0x1c0] sm:$0xff] }
 0x1e1   : > { %9378 = vst [vmem:[#allocation14_spill] sm:$0xff] %v7399_v16  ;;  %v479_v10 = vld [vmem:[%s9304_s5 + $0xc0] sm:$0xff] }
 0x1e3   : > { %v7415_v29 = vpop.f32.mrb[42].mxu0  ;;  %1415 = vmatmul.mubr.f32.gmra.mrb[8].mxu1 %v503_v19  ;;  %1375 = vmatmul.mubr.f32.gmra.mrb[72].mxu0 %v471_v20  ;;  %v516_v20 = vld [vmem:[%s9304_s5 + $0x1e8] sm:$0xff] }
 0x1e4   : > { %9379 = vst [vmem:[#allocation15_spill] sm:$0xff] %v7415_v29  ;;  %v7417_v32 = vpop.f32.mrb[43].mxu0  ;;  %1419 = vmatprep.mubr.f32.mxu1 %v508_v23  ;;  %1379 = vmatprep.mubr.f32.mxu0 %v476_v28  ;;  %v484_v23 = vld [vmem:[%s9304_s5 + $0xe8] sm:$0xff] }
 0x1e5   : > { %9380 = vst [vmem:[#allocation16_spill] sm:$0xff] %v7417_v32  ;;  %v5959_v44 = vpack.c.bf16 %v7415_v29, %v7417_v32 }
 0x1e7   : > { %v7433_v62 = vpop.f32.mrb[44].mxu0  ;;  %1420 = vmatmul.mubr.f32.gmra.mrb[10].mxu1 %v507_v35  ;;  %1380 = vmatmul.mubr.f32.gmra.mrb[74].mxu0 %v475_v41  ;;  %v515_v41 = vld [vmem:[%s9304_s5 + $0x1e0] sm:$0xff] }
 0x1e8   : > { %9381 = vst [vmem:[#allocation17_spill] sm:$0xff] %v7433_v62  ;;  %v7435_v1 = vpop.f32.mrb[45].mxu0  ;;  %1424 = vmatprep.mubr.f32.mxu1 %v512_v50  ;;  %1384 = vmatprep.mubr.f32.mxu0 %v480_v53  ;;  %v483_v50 = vld [vmem:[%s9304_s5 + $0xe0] sm:$0xff] }
 0x1e9   : > { %9382 = vst [vmem:[#allocation18_spill] sm:$0xff] %v7435_v1  ;;  %v5963_v19 = vpack.c.bf16 %v7433_v62, %v7435_v1 }
 0x1eb   : > { %v7451_v28 = vpop.f32.mrb[46].mxu0  ;;  %1425 = vmatmul.mubr.f32.gmra.mrb[12].mxu1 %v511_v7  ;;  %1385 = vmatmul.mubr.f32.gmra.mrb[76].mxu0 %v479_v10  ;;  %v458_v7 = vld [vmem:[%s9304_s5 + $0x18] sm:$0xff] }
 0x1ec   : > { %9383 = vst [vmem:[#allocation19_spill] sm:$0xff] %v7451_v28  ;;  %v7453_v35 = vpop.f32.mrb[47].mxu0  ;;  %1429 = vmatprep.mubr.f32.mxu1 %v516_v20  ;;  %1389 = vmatprep.mubr.f32.mxu0 %v484_v23 }
 0x1ed   : > { %9384 = vst [vmem:[#allocation20_spill] sm:$0xff] %v7453_v35  ;;  %v5967_v53 = vpack.c.bf16 %v7451_v28, %v7453_v35 }
 0x1ef   : > { %v7466_v10 = vpop.f32.mrb[48].mxu0  ;;  %1430 = vmatmul.mubr.f32.gmra.mrb[14].mxu1 %v515_v41  ;;  %1390 = vmatmul.mubr.f32.gmra.mrb[78].mxu0 %v483_v50 }
 0x1f0   : > { %9385 = vst [vmem:[#allocation21_spill] sm:$0xff] %v7466_v10  ;;  %v7468_v20 = vpop.f32.mrb[49].mxu0  ;;  %1499 = vmatprep.mubr.f32.mxu1 %v458_v7 }
 0x1f1   : > { %v5937_v23 = vpack.c.bf16 %v7466_v10, %v7468_v20 }
 0x1f3   : > { %v7472_v30 = vpop.f32.mrb[50].mxu0  ;;  %5938 = vmatprep.subr.bf16.mxu1 %v5937_v23 }
 0x1f4   : > { %9386 = vst [vmem:[#allocation22_spill] sm:$0xff] %v7472_v30  ;;  %v7474_v24 = vpop.f32.mrb[51].mxu0  ;;  %5940 = vmatpush3.bf16.msra.mxu1 %v5939_v21 }
 0x1f5   : > { %9387 = vst [vmem:[#allocation23_spill] sm:$0xff] %v7474_v24  ;;  %v5941_v22 = vpack.c.bf16 %v7472_v30, %v7474_v24 }
 0x1f7   : > { %v7481_v41 = vpop.f32.mrb[52].mxu0  ;;  %5942 = vmatprep.subr.bf16.mxu1 %v5941_v22 }
 0x1f8   : > { %9388 = vst [vmem:[#allocation24_spill] sm:$0xff] %v7481_v41  ;;  %v7483_v50 = vpop.f32.mrb[53].mxu0  ;;  %5944 = vmatpush3.bf16.msra.mxu1 %v5943_v31  ;;  %v9394_v31 = vpack.c.bf16 %v7379_v56, %v7381_v59 }
 0x1f9   : > { %9389 = vst [vmem:[#allocation25_spill] sm:$0xff] %v7483_v50  ;;  %v5945_v7 = vpack.c.bf16 %v7481_v41, %v7483_v50 }
 0x1fb   : > { %v7490_v23 = vpop.f32.mrb[54].mxu0  ;;  %5946 = vmatprep.subr.bf16.mxu1 %v5945_v7 }
 0x1fc   : > { %9390 = vst [vmem:[#allocation26_spill] sm:$0xff] %v7490_v23  ;;  %v7492_v4 = vpop.f32.mrb[55].mxu0  ;;  %5948 = vmatpush3.bf16.msra.mxu1 %v5947_v47  ;;  %v9397_v47 = vpack.c.bf16 %v7397_v13, %v7399_v16 }
 0x1fd   : > { %9391 = vst [vmem:[#allocation27_spill] sm:$0xff] %v7492_v4  ;;  %v5949_v21 = vpack.c.bf16 %v7490_v23, %v7492_v4 }
 0x1ff   : > { %v7499_v22 = vpop.f32.mrb[56].mxu0  ;;  %5950 = vmatprep.subr.bf16.mxu1 %v5949_v21 }
 0x200   : > { %9392 = vst [vmem:[#allocation28_spill] sm:$0xff] %v7499_v22  ;;  %v7501_v30 = vpop.f32.mrb[57].mxu0  ;;  %5952 = vmatpush3.bf16.msra.mxu1 %v9394_v31 }
 0x201   : > { %9393 = vst [vmem:[#allocation29_spill] sm:$0xff] %v7501_v30  ;;  %v5953_v7 = vpack.c.bf16 %v7499_v22, %v7501_v30 }
 0x203   : > { %v7508_v41 = vpop.f32.mrb[58].mxu0  ;;  %5954 = vmatprep.subr.bf16.mxu1 %v5953_v7  ;;  %v1966_v7 = vld [vmem:[%s9307_s8] sm:$0xff] }
 0x204   : > { %9395 = vst [vmem:[#allocation30_spill] sm:$0xff] %v7508_v41  ;;  %v7510_v50 = vpop.f32.mrb[59].mxu0  ;;  %5956 = vmatpush3.bf16.msra.mxu1 %v9397_v47  ;;  %v1967_v47 = vld [vmem:[%s9307_s8 + $0x8] sm:$0xff] }
 0x205   : > { %9396 = vst [vmem:[#allocation31_spill] sm:$0xff] %v7510_v50  ;;  %v5957_v21 = vpack.c.bf16 %v7508_v41, %v7510_v50 }
 0x207   : > { %v7517_v23 = vpop.f32.mrb[60].mxu0  ;;  %5958 = vmatprep.subr.bf16.mxu1 %v5957_v21  ;;  %v5985_v21 = vpack.c.bf16 %v1967_v47, %v1966_v7  ;;  %v461_v47 = vld [vmem:[%s9304_s5 + $0x30] sm:$0xff] }
 0x208   : > { %9398 = vst [vmem:[#allocation32_spill] sm:$0xff] %v7517_v23  ;;  %v7519_v4 = vpop.f32.mrb[61].mxu0  ;;  %5960 = vmatpush3.bf16.msra.mxu1 %v5959_v44 }
 0x209   : > { %9399 = vst [vmem:[#allocation33_spill] sm:$0xff] %v7519_v4  ;;  %v5961_v31 = vpack.c.bf16 %v7517_v23, %v7519_v4  ;;  %v1968_v23 = vld [vmem:[%s9307_s8 + $0x10] sm:$0xff]  ;;  %v1969_v4 = vld [vmem:[%s9307_s8 + $0x18] sm:$0xff] }
 0x20a   : > { %v5989_v7 = vpack.c.bf16 %v1969_v4, %v1968_v23  ;;  %v470_v4 = vld [vmem:[%s9304_s5 + $0x78] sm:$0xff]  ;;  %v469_v23 = vld [vmem:[%s9304_s5 + $0x70] sm:$0xff] }
 0x20b   : > { %v7529_v22 = vpop.f32.mrb[62].mxu0  ;;  %5962 = vmatprep.subr.bf16.mxu1 %v5961_v31  ;;  %v457_v31 = vld [vmem:[%s9304_s5 + $0x10] sm:$0xff] }
 0x20c   : > { %9400 = vst [vmem:[#allocation34_spill] sm:$0xff] %v7529_v22  ;;  %v7531_v41 = vpop.f32.mrb[63].mxu0  ;;  %5964 = vmatpush3.bf16.msra.mxu1 %v5963_v19  ;;  %v462_v19 = vld [vmem:[%s9304_s5 + $0x38] sm:$0xff] }
 0x20d   : > { %9401 = vst [vmem:[#allocation35_spill] sm:$0xff] %v7531_v41  ;;  %v5965_v44 = vpack.c.bf16 %v7529_v22, %v7531_v41 }
 0x20f   : > { %5966 = vmatprep.subr.bf16.mxu1 %v5965_v44  ;;  %v465_v44 = vld [vmem:[%s9304_s5 + $0x50] sm:$0xff] }
 0x210   : > { %5968 = vmatpush3.bf16.msra.mxu1 %v5967_v53  ;;  %v466_v53 = vld [vmem:[%s9304_s5 + $0x58] sm:$0xff] }
 0x211   : > { %5986 = vmatprep.subr.bf16.mxu1 %v5985_v21 }
 0x213   : > { %1500 = vmatmul.mubr.f32.vlgmr.msra.gmra.mrb[16].mxu1 %v457_v31  ;;  %v473_v31 = vld [vmem:[%s9304_s5 + $0x90] sm:$0xff] }
 0x214   : > { %1504 = vmatprep.mubr.f32.mxu1 %v462_v19  ;;  %5988 = vmatpush3.bf16.msra.mxu1 %v5985_v21  ;;  %v474_v21 = vld [vmem:[%s9304_s5 + $0x98] sm:$0xff] }
 0x215   : > { %5990 = vmatprep.subr.bf16.mxu1 %v5989_v7  ;;  %v478_v19 = vld [vmem:[%s9304_s5 + $0xb8] sm:$0xff] }
 0x217   : > { %1505 = vmatmul.mubr.f32.gmra.mrb[18].mxu1 %v461_v47  ;;  %v482_v47 = vld [vmem:[%s9304_s5 + $0xd8] sm:$0xff] }
 0x218   : > { %1509 = vmatprep.mubr.f32.mxu1 %v466_v53  ;;  %5992 = vmatpush3.bf16.msra.mxu1 %v5989_v7  ;;  %v477_v7 = vld [vmem:[%s9304_s5 + $0xb0] sm:$0xff] }
 0x219   : > { %v481_v53 = vld [vmem:[%s9304_s5 + $0xd0] sm:$0xff] }
 0x21b   : > { %1510 = vmatmul.mubr.f32.gmra.mrb[20].mxu1 %v465_v44  ;;  %v486_v44 = vld [vmem:[%s9304_s5 + $0xf8] sm:$0xff] }
 0x21c   : > { %1514 = vmatprep.mubr.f32.mxu1 %v470_v4  ;;  %v485_v4 = vld [vmem:[%s9304_s5 + $0xf0] sm:$0xff] }
 0x21f   : > { %1515 = vmatmul.mubr.f32.gmra.mrb[22].mxu1 %v469_v23  ;;  %v490_v23 = vld [vmem:[%s9304_s5 + $0x118] sm:$0xff] }
 0x220   : > { %1519 = vmatprep.mubr.f32.mxu1 %v474_v21  ;;  %v489_v21 = vld [vmem:[%s9304_s5 + $0x110] sm:$0xff] }
 0x223   : > { %1520 = vmatmul.mubr.f32.gmra.mrb[24].mxu1 %v473_v31  ;;  %v494_v31 = vld [vmem:[%s9304_s5 + $0x138] sm:$0xff] }
 0x224   : > { %1524 = vmatprep.mubr.f32.mxu1 %v478_v19  ;;  %v493_v19 = vld [vmem:[%s9304_s5 + $0x130] sm:$0xff] }
 0x227   : > { %1525 = vmatmul.mubr.f32.gmra.mrb[26].mxu1 %v477_v7  ;;  %v498_v7 = vld [vmem:[%s9304_s5 + $0x158] sm:$0xff] }
 0x228   : > { %1529 = vmatprep.mubr.f32.mxu1 %v482_v47  ;;  %v497_v47 = vld [vmem:[%s9304_s5 + $0x150] sm:$0xff] }
 0x22b   : > { %1530 = vmatmul.mubr.f32.gmra.mrb[28].mxu1 %v481_v53  ;;  %v502_v53 = vld [vmem:[%s9304_s5 + $0x178] sm:$0xff] }
 0x22c   : > { %1534 = vmatprep.mubr.f32.mxu1 %v486_v44  ;;  %v501_v44 = vld [vmem:[%s9304_s5 + $0x170] sm:$0xff] }
 0x22f   : > { %1535 = vmatmul.mubr.f32.gmra.mrb[30].mxu1 %v485_v4  ;;  %v506_v4 = vld [vmem:[%s9304_s5 + $0x198] sm:$0xff] }
 0x230   : > { %1539 = vmatprep.mubr.f32.mxu1 %v490_v23  ;;  %v505_v23 = vld [vmem:[%s9304_s5 + $0x190] sm:$0xff] }
 0x233   : > { %1540 = vmatmul.mubr.f32.gmra.mrb[32].mxu1 %v489_v21  ;;  %v510_v21 = vld [vmem:[%s9304_s5 + $0x1b8] sm:$0xff] }
 0x234   : > { %1544 = vmatprep.mubr.f32.mxu1 %v494_v31  ;;  %v509_v31 = vld [vmem:[%s9304_s5 + $0x1b0] sm:$0xff] }
 0x237   : > { %1545 = vmatmul.mubr.f32.gmra.mrb[34].mxu1 %v493_v19  ;;  %v514_v19 = vld [vmem:[%s9304_s5 + $0x1d8] sm:$0xff] }
 0x238   : > { %1549 = vmatprep.mubr.f32.mxu1 %v498_v7  ;;  %v513_v7 = vld [vmem:[%s9304_s5 + $0x1d0] sm:$0xff] }
 0x23b   : > { %1550 = vmatmul.mubr.f32.gmra.mrb[36].mxu1 %v497_v47  ;;  %v518_v47 = vld [vmem:[%s9304_s5 + $0x1f8] sm:$0xff] }
 0x23c   : > { %1554 = vmatprep.mubr.f32.mxu1 %v502_v53  ;;  %v517_v53 = vld [vmem:[%s9304_s5 + $0x1f0] sm:$0xff] }
 0x23f   : > { %1555 = vmatmul.mubr.f32.gmra.mrb[38].mxu1 %v501_v44 }
 0x240   : > { %1559 = vmatprep.mubr.f32.mxu1 %v506_v4 }
 0x243   : > { %1560 = vmatmul.mubr.f32.gmra.mrb[40].mxu1 %v505_v23 }
 0x244   : > { %1564 = vmatprep.mubr.f32.mxu1 %v510_v21 }
 0x247   : > { %1565 = vmatmul.mubr.f32.gmra.mrb[42].mxu1 %v509_v31 }
 0x248   : > { %1569 = vmatprep.mubr.f32.mxu1 %v514_v19 }
 0x24b   : > { %1570 = vmatmul.mubr.f32.gmra.mrb[44].mxu1 %v513_v7  ;;  %v1661_v7 = vld [vmem:[%s9305_s6] sm:$0xff] }
 0x24c   : > { %1574 = vmatprep.mubr.f32.mxu1 %v518_v47  ;;  %v1662_v47 = vld [vmem:[%s9305_s6 + $0x8] sm:$0xff] }
 0x24f   : > { %1575 = vmatmul.mubr.f32.gmra.mrb[46].mxu1 %v517_v53  ;;  %v1663_v53 = vld [vmem:[%s9305_s6 + $0x10] sm:$0xff] }
 0x250   : > { %5593 = vmatprep.mubr.msk.f32.mxu1 %vm1644_vm1, %v7228_v34 }
 0x253   : > { %5594 = vmatmul.mubr.msk.f32.vlgmr.msra.gmra.mrb[48].mxu1 %vm1644_vm1, %v7226_v33 }
 0x254   : > { %5596 = vmatprep.mubr.msk.f32.mxu1 %vm1644_vm1, %v7237_v37 }
 0x257   : > { %5597 = vmatmul.mubr.msk.f32.gmra.mrb[50].mxu1 %vm1644_vm1, %v7235_v27 }
 0x258   : > { %5599 = vmatprep.mubr.msk.f32.mxu1 %vm1644_vm1, %v7243_v40 }
 0x25b   : > { %5600 = vmatmul.mubr.msk.f32.gmra.mrb[52].mxu1 %vm1644_vm1, %v7241_v39 }
 0x25c   : > { %5602 = vmatprep.mubr.msk.f32.mxu1 %vm1644_vm1, %v7249_v43 }
 0x25f   : > { %5603 = vmatmul.mubr.msk.f32.gmra.mrb[54].mxu1 %vm1644_vm1, %v7247_v42 }
 0x260   : > { %5605 = vmatprep.mubr.msk.f32.mxu1 %vm1644_vm1, %v7255_v46 }
 0x263   : > { %5606 = vmatmul.mubr.msk.f32.gmra.mrb[56].mxu1 %vm1644_vm1, %v7253_v45 }
 0x264   : > { %5608 = vmatprep.mubr.msk.f32.mxu1 %vm1644_vm1, %v7261_v49 }
 0x267   : > { %5609 = vmatmul.mubr.msk.f32.gmra.mrb[58].mxu1 %vm1644_vm1, %v7259_v48 }
 0x268   : > { %5611 = vmatprep.mubr.msk.f32.mxu1 %vm1644_vm1, %v7267_v52 }
 0x26b   : > { %5612 = vmatmul.mubr.msk.f32.gmra.mrb[60].mxu1 %vm1644_vm1, %v7265_v51 }
 0x26c   : > { %5614 = vmatprep.mubr.msk.f32.mxu1 %vm1644_vm1, %v7273_v55 }
 0x26f   : > { %5615 = vmatmul.mubr.msk.f32.gmra.mrb[62].mxu1 %vm1644_vm1, %v7271_v54 }
 0x270   : > { %5617 = vmatprep.mubr.msk.f32.mxu1 %vm1644_vm1, %v7279_v58 }
 0x273   : > { %5618 = vmatmul.mubr.msk.f32.gmra.mrb[64].mxu1 %vm1644_vm1, %v7277_v57 }
 0x274   : > { %5620 = vmatprep.mubr.msk.f32.mxu1 %vm1644_vm1, %v7285_v61 }
 0x277   : > { %5621 = vmatmul.mubr.msk.f32.gmra.mrb[66].mxu1 %vm1644_vm1, %v7283_v60 }
 0x278   : > { %5623 = vmatprep.mubr.msk.f32.mxu1 %vm1644_vm1, %v7291_v0 }
 0x27b   : > { %5624 = vmatmul.mubr.msk.f32.gmra.mrb[68].mxu1 %vm1644_vm1, %v7289_v63 }
 0x27c   : > { %5626 = vmatprep.mubr.msk.f32.mxu1 %vm1644_vm1, %v7297_v3 }
 0x27f   : > { %5627 = vmatmul.mubr.msk.f32.gmra.mrb[70].mxu1 %vm1644_vm1, %v7295_v2 }
 0x280   : > { %5629 = vmatprep.mubr.msk.f32.mxu1 %vm1644_vm1, %v7303_v6 }
 0x283   : > { %5630 = vmatmul.mubr.msk.f32.gmra.mrb[72].mxu1 %vm1644_vm1, %v7301_v5 }
 0x284   : > { %5632 = vmatprep.mubr.msk.f32.mxu1 %vm1644_vm1, %v7309_v9 }
 0x287   : > { %5633 = vmatmul.mubr.msk.f32.gmra.mrb[74].mxu1 %vm1644_vm1, %v7307_v8 }
 0x288   : > { %5635 = vmatprep.mubr.msk.f32.mxu1 %vm1644_vm1, %v7315_v12 }
 0x28b   : > { %5636 = vmatmul.mubr.msk.f32.gmra.mrb[76].mxu1 %vm1644_vm1, %v7313_v11 }
 0x28c   : > { %5638 = vmatprep.mubr.msk.f32.mxu1 %vm1644_vm1, %v7321_v15 }
 0x28f   : > { %5639 = vmatmul.mubr.msk.f32.gmra.mrb[78].mxu1 %vm1644_vm1, %v7319_v14 }
 0x290   : > { %5641 = vmatprep.mubr.msk.f32.mxu1 %vm1644_vm1, %v7327_v18  ;;  %v9407_v18 = vld [vmem:[#allocation28_spill] sm:$0xff] }
 0x293   : > { %5642 = vmatmul.mubr.msk.f32.gmra.mrb[80].mxu1 %vm1644_vm1, %v7325_v17 }
 0x294   : > { %5644 = vmatprep.mubr.msk.f32.mxu1 %vm1644_vm1, %v7345_v26 }
 0x297   : > { %5645 = vmatmul.mubr.msk.f32.gmra.mrb[82].mxu1 %vm1644_vm1, %v7343_v25 }
 0x298   : > { %5647 = vmatprep.mubr.msk.f32.mxu1 %vm1644_vm1, %v7363_v38 }
 0x29b   : > { %5648 = vmatmul.mubr.msk.f32.gmra.mrb[84].mxu1 %vm1644_vm1, %v7361_v36 }
 0x29c   : > { %5650 = vmatprep.mubr.msk.f32.mxu1 %vm1644_vm1, %v7381_v59 }
 0x29f   : > { %5651 = vmatmul.mubr.msk.f32.gmra.mrb[86].mxu1 %vm1644_vm1, %v7379_v56 }
 0x2a0   : > { %5653 = vmatprep.mubr.msk.f32.mxu1 %vm1644_vm1, %v7399_v16 }
 0x2a3   : > { %5654 = vmatmul.mubr.msk.f32.gmra.mrb[88].mxu1 %vm1644_vm1, %v7397_v13 }
 0x2a4   : > { %5656 = vmatprep.mubr.msk.f32.mxu1 %vm1644_vm1, %v7417_v32  ;;  %v1666_v32 = vld [vmem:[%s9305_s6 + $0x28] sm:$0xff] }
 0x2a6   : > { %v4949_v44 = vpop.f32.mrb[0].mxu1  ;;  %v4925_v4 = vpop.f32.mrb[64].mxu0 }
 0x2a7   : > { %5657 = vmatmul.mubr.msk.f32.gmra.mrb[90].mxu1 %vm1644_vm1, %v7415_v29  ;;  %v4950_v23 = vpop.f32.mrb[1].mxu1  ;;  %v4926_v21 = vpop.f32.mrb[65].mxu0  ;;  %v5969_v29 = vpack.c.bf16 %v1662_v47, %v1661_v7 }
 0x2a8   : > { %5659 = vmatprep.mubr.msk.f32.mxu1 %vm1644_vm1, %v7435_v1  ;;  %v7724_v31 = vadd.f32 %v4950_v23, %v4949_v44  ;;  %v7726_v19 = vadd.f32 %v4926_v21, %v4925_v4  ;;  %v1664_v44 = vld [vmem:[%s9305_s6 + $0x18] sm:$0xff]  ;;  %v1665_v1 = vld [vmem:[%s9305_s6 + $0x20] sm:$0xff] }
 0x2a9   : > { %v5973_v21 = vpack.c.bf16 %v1664_v44, %v1663_v53  ;;  %5970 = vmatprep.subr.bf16.mxu0 %v5969_v29  ;;  %v5977_v44 = vpack.c.bf16 %v1666_v32, %v1665_v1 }
 0x2aa   : > { %v4952_v23 = vpop.f32.mrb[2].mxu1  ;;  %v4928_v4 = vpop.f32.mrb[66].mxu0  ;;  %5972 = vmatpush3.bf16.msra.mxu0 %v5969_v29 }
 0x2ab   : > { %5660 = vmatmul.mubr.msk.f32.gmra.mrb[92].mxu1 %vm1644_vm1, %v7433_v62  ;;  %v4953_v13 = vpop.f32.mrb[3].mxu1  ;;  %v4929_v7 = vpop.f32.mrb[67].mxu0  ;;  %5974 = vmatprep.subr.bf16.mxu0 %v5973_v21 }
 0x2ac   : > { %5662 = vmatprep.mubr.msk.f32.mxu1 %vm1644_vm1, %v7453_v35  ;;  %v7750_v47 = vadd.f32 %v4953_v13, %v4952_v23  ;;  %v7752_v53 = vadd.f32 %v4929_v7, %v4928_v4  ;;  %v9403_v7 = vld [vmem:[#allocation25_spill] sm:$0xff] }
 0x2ae   : > { %v4955_v16 = vpop.f32.mrb[4].mxu1  ;;  %v4931_v56 = vpop.f32.mrb[68].mxu0  ;;  %5976 = vmatpush3.bf16.msra.mxu0 %v5973_v21 }
 0x2af   : > { %5663 = vmatmul.mubr.msk.f32.gmra.mrb[94].mxu1 %vm1644_vm1, %v7451_v28  ;;  %v4956_v59 = vpop.f32.mrb[5].mxu1  ;;  %v4932_v62 = vpop.f32.mrb[69].mxu0  ;;  %5978 = vmatprep.subr.bf16.mxu0 %v5977_v44 }
 0x2b0   : > { %5665 = vmatprep.mubr.msk.f32.mxu1 %vm1644_vm1, %v7468_v20  ;;  %v7758_v36 = vadd.f32 %v4956_v59, %v4955_v16  ;;  %v7760_v35 = vadd.f32 %v4932_v62, %v4931_v56  ;;  %v9402_v16 = vld [vmem:[#allocation22_spill] sm:$0xff] }
 0x2b2   : > { %v4958_v13 = vpop.f32.mrb[6].mxu1  ;;  %v4934_v29 = vpop.f32.mrb[70].mxu0  ;;  %5980 = vmatpush3.bf16.msra.mxu0 %v5977_v44 }
 0x2b3   : > { %5666 = vmatmul.mubr.msk.f32.gmra.mrb[96].mxu1 %vm1644_vm1, %v7466_v10  ;;  %v4959_v32 = vpop.f32.mrb[7].mxu1  ;;  %v4935_v1 = vpop.f32.mrb[71].mxu0  ;;  %v9406_v10 = vld [vmem:[#allocation26_spill] sm:$0xff] }
 0x2b4   : > { %5668 = vmatprep.mubr.msk.f32.mxu1 %vm1644_vm1, %v7474_v24  ;;  %v7766_v23 = vadd.f32 %v4959_v32, %v4958_v13  ;;  %v7768_v4 = vadd.f32 %v4935_v1, %v4934_v29  ;;  %v9404_v13 = vld [vmem:[#allocation24_spill] sm:$0xff]  ;;  %v9405_v32 = vld [vmem:[#allocation27_spill] sm:$0xff] }
 0x2b6   : > { %v4961_v59 = vpop.f32.mrb[8].mxu1  ;;  %v4937_v56 = vpop.f32.mrb[72].mxu0 }
 0x2b7   : > { %5669 = vmatmul.mubr.msk.f32.gmra.mrb[98].mxu1 %vm1644_vm1, %v9402_v16  ;;  %v4962_v62 = vpop.f32.mrb[9].mxu1  ;;  %v4938_v21 = vpop.f32.mrb[73].mxu0 }
 0x2b8   : > { %5671 = vmatprep.mubr.msk.f32.mxu1 %vm1644_vm1, %v9403_v7  ;;  %v7774_v28 = vadd.f32 %v4962_v62, %v4961_v59  ;;  %v4939_v38 = vadd.f32 %v4938_v21, %v4937_v56 }
 0x2ba   : > { %v4964_v25 = vpop.f32.mrb[10].mxu1  ;;  %v4940_v26 = vpop.f32.mrb[74].mxu0 }
 0x2bb   : > { %5672 = vmatmul.mubr.msk.f32.gmra.mrb[100].mxu1 %vm1644_vm1, %v9404_v13  ;;  %v4965_v29 = vpop.f32.mrb[11].mxu1  ;;  %v4941_v44 = vpop.f32.mrb[75].mxu0 }
 0x2bc   : > { %5674 = vmatprep.mubr.msk.f32.mxu1 %vm1644_vm1, %v9405_v32  ;;  %v7780_v1 = vadd.f32 %v4965_v29, %v4964_v25  ;;  %v4942_v16 = vadd.f32 %v4941_v44, %v4940_v26 }
 0x2be   : > { %v4967_v17 = vpop.f32.mrb[12].mxu1  ;;  %v4943_v24 = vpop.f32.mrb[76].mxu0 }
 0x2bf   : > { %5675 = vmatmul.mubr.msk.f32.gmra.mrb[102].mxu1 %vm1644_vm1, %v9406_v10  ;;  %v4968_v59 = vpop.f32.mrb[13].mxu1  ;;  %v4944_v56 = vpop.f32.mrb[77].mxu0  ;;  %v9408_v10 = vld [vmem:[#allocation30_spill] sm:$0xff] }
 0x2c0   : > { %5677 = vmatprep.mubr.msk.f32.mxu1 %vm1644_vm1, %v7501_v30  ;;  %v7786_v62 = vadd.f32 %v4968_v59, %v4967_v17  ;;  %v4945_v21 = vadd.f32 %v4944_v56, %v4943_v24  ;;  %v9409_v30 = vld [vmem:[#allocation33_spill] sm:$0xff]  ;;  %v9410_v24 = vld [vmem:[#allocation32_spill] sm:$0xff]  ;;  %v1667_v17 = vld [vmem:[%s9305_s6 + $0x30] sm:$0xff] }
 0x2c2   : > { %v4970_v13 = vpop.f32.mrb[14].mxu1  ;;  %v4946_v7 = vpop.f32.mrb[78].mxu0 }
 0x2c3   : > { %5678 = vmatmul.mubr.msk.f32.gmra.mrb[104].mxu1 %vm1644_vm1, %v9407_v18  ;;  %v4971_v25 = vpop.f32.mrb[15].mxu1  ;;  %v4947_v26 = vpop.f32.mrb[79].mxu0 }
 0x2c4   : > { %5680 = vmatprep.mubr.msk.f32.mxu1 %vm1644_vm1, %v7510_v50  ;;  %v7792_v29 = vadd.f32 %v4971_v25, %v4970_v13  ;;  %v4948_v44 = vadd.f32 %v4947_v26, %v4946_v7  ;;  %v1668_v7 = vld [vmem:[%s9305_s6 + $0x38] sm:$0xff] }
 0x2c5   : > { %v5981_v13 = vpack.c.bf16 %v1668_v7, %v1667_v17 }
 0x2c7   : > { %5681 = vmatmul.mubr.msk.f32.gmra.mrb[106].mxu1 %vm1644_vm1, %v9408_v10  ;;  %5982 = vmatprep.subr.bf16.mxu0 %v5981_v13 }
 0x2c8   : > { %5683 = vmatprep.mubr.msk.f32.mxu1 %vm1644_vm1, %v9409_v30  ;;  %5984 = vmatpush3.bf16.msra.mxu0 %v5981_v13 }
 0x2cb   : > { %5684 = vmatmul.mubr.msk.f32.gmra.mrb[108].mxu1 %vm1644_vm1, %v9410_v24 }
 0x2cc   : > { %5686 = vmatprep.mubr.msk.f32.mxu1 %vm1644_vm1, %v7531_v41 }
 0x2cf   : > { %5687 = vmatmul.mubr.msk.f32.gmra.mrb[110].mxu1 %vm1644_vm1, %v7529_v22 }
 0x2e6   : > { %v5005_v59 = vpop.f32.mrb[16].mxu1 }
 0x2e7   : > { %v5006_v56 = vpop.f32.mrb[17].mxu1 }
 0x2e8   : > { %v5007_v25 = vadd.f32 %v5006_v56, %v5005_v59 }
 0x2ea   : > { %v1502_v26 = vadd.f32 %v5007_v25, %v7726_v19  ;;  %v5008_v41 = vpop.f32.mrb[18].mxu1 }
 0x2eb   : > { %v5009_v24 = vpop.f32.mrb[19].mxu1 }
 0x2ec   : > { %v5010_v30 = vadd.f32 %v5009_v24, %v5008_v41  ;;  %1596 = vrot.lane.b32.xlu0 %v1502_v26, %s6828_s11 }
 0x2ee   : > { %v1507_v22 = vadd.f32 %v5010_v30, %v7752_v53  ;;  %v5011_v10 = vpop.f32.mrb[20].mxu1 }
 0x2ef   : > { %v5012_v50 = vpop.f32.mrb[21].mxu1 }
 0x2f0   : > { %1598 = vrot.lane.b32.xlu1 %v1507_v22, %s6828_s11  ;;  %v5013_v17 = vadd.f32 %v5012_v50, %v5011_v10 }
 0x2f2   : > { %v1512_v7 = vadd.f32 %v5013_v17, %v7760_v35  ;;  %v5014_v13 = vpop.f32.mrb[22].mxu1 }
 0x2f3   : > { %v5015_v18 = vpop.f32.mrb[23].mxu1 }
 0x2f4   : > { %v5016_v59 = vadd.f32 %v5015_v18, %v5014_v13  ;;  %1600 = vrot.lane.b32.xlu0 %v1512_v7, %s6828_s11 }
 0x2f6   : > { %v1517_v19 = vadd.f32 %v5016_v59, %v7768_v4  ;;  %v5017_v41 = vpop.f32.mrb[24].mxu1 }
 0x2f7   : > { %v5018_v24 = vpop.f32.mrb[25].mxu1 }
 0x2f8   : > { %1602 = vrot.lane.b32.xlu1 %v1517_v19, %s6828_s11  ;;  %v5019_v56 = vadd.f32 %v5018_v24, %v5017_v41 }
 0x2fa   : > { %v1522_v30 = vadd.f32 %v5019_v56, %v4939_v38  ;;  %v5020_v53 = vpop.f32.mrb[26].mxu1 }
 0x2fb   : > { %v5021_v25 = vpop.f32.mrb[27].mxu1 }
 0x2fc   : > { %v5022_v26 = vadd.f32 %v5021_v25, %v5020_v53  ;;  %1604 = vrot.lane.b32.xlu0 %v1522_v30, %s6828_s11 }
 0x2fe   : > { %v1527_v10 = vadd.f32 %v5022_v26, %v4942_v16  ;;  %v5023_v35 = vpop.f32.mrb[28].mxu1 }
 0x2ff   : > { %v5024_v50 = vpop.f32.mrb[29].mxu1 }
 0x300   : > { %v5025_v22 = vadd.f32 %v5024_v50, %v5023_v35  ;;  %1606 = vrot.lane.b32.xlu1 %v1527_v10, %s6828_s11 }
 0x302   : > { %v1532_v18 = vadd.f32 %v5025_v22, %v4945_v21  ;;  %v5026_v17 = vpop.f32.mrb[30].mxu1 }
 0x303   : > { %v5027_v4 = vpop.f32.mrb[31].mxu1 }
 0x304   : > { %v5028_v7 = vadd.f32 %v5027_v4, %v5026_v17  ;;  %1608 = vrot.lane.b32.xlu0 %v1532_v18, %s6828_s11 }
 0x306   : > { %v1537_v13 = vadd.f32 %v5028_v7, %v4948_v44  ;;  %v5029_v59 = vpop.f32.mrb[32].mxu1 }
 0x307   : > { %v5030_v38 = vpop.f32.mrb[33].mxu1 }
 0x308   : > { %v5031_v19 = vadd.f32 %v5030_v38, %v5029_v59  ;;  %1610 = vrot.lane.b32.xlu1 %v1537_v13, %s6828_s11 }
 0x30a   : > { %v1542_v41 = vadd.f32 %v5031_v19, %v7724_v31  ;;  %v5032_v16 = vpop.f32.mrb[34].mxu1 }
 0x30b   : > { %v5033_v24 = vpop.f32.mrb[35].mxu1 }
 0x30c   : > { %v5034_v56 = vadd.f32 %v5033_v24, %v5032_v16  ;;  %1612 = vrot.lane.b32.xlu0 %v1542_v41, %s6828_s11 }
 0x30e   : > { %v1547_v21 = vadd.f32 %v5034_v56, %v7750_v47  ;;  %v5035_v30 = vpop.f32.mrb[36].mxu1 }
 0x30f   : > { %v5036_v53 = vpop.f32.mrb[37].mxu1 }
 0x310   : > { %v5037_v25 = vadd.f32 %v5036_v53, %v5035_v30  ;;  %1614 = vrot.lane.b32.xlu1 %v1547_v21, %s6828_s11  ;;  %v360_v53 = vld [vmem:[%s6903_s20 + $0x10] sm:$0xff] }
 0x312   : > { %v1552_v44 = vadd.f32 %v5037_v25, %v7758_v36  ;;  %v5038_v26 = vpop.f32.mrb[38].mxu1 }
 0x313   : > { %v5039_v10 = vpop.f32.mrb[39].mxu1 }
 0x314   : > { %v5040_v35 = vadd.f32 %v5039_v10, %v5038_v26  ;;  %1616 = vrot.lane.b32.xlu0 %v1552_v44, %s6828_s11  ;;  %v361_v44 = vld [vmem:[%s6903_s20 + $0x18] sm:$0xff] }
 0x316   : > { %v1557_v31 = vadd.f32 %v5040_v35, %v7766_v23  ;;  %v5041_v50 = vpop.f32.mrb[40].mxu1  ;;  %v362_v35 = vld [vmem:[%s6903_s20 + $0x20] sm:$0xff] }
 0x317   : > { %v5042_v22 = vpop.f32.mrb[41].mxu1 }
 0x318   : > { %v5043_v18 = vadd.f32 %v5042_v22, %v5041_v50  ;;  %1618 = vrot.lane.b32.xlu1 %v1557_v31, %s6828_s11  ;;  %v363_v22 = vld [vmem:[%s6903_s20 + $0x28] sm:$0xff] }
 0x31a   : > { %v1562_v47 = vadd.f32 %v5043_v18, %v7774_v28  ;;  %v5044_v17 = vpop.f32.mrb[42].mxu1 }
 0x31b   : > { %v5045_v4 = vpop.f32.mrb[43].mxu1 }
 0x31c   : > { %v5046_v7 = vadd.f32 %v5045_v4, %v5044_v17  ;;  %1620 = vrot.lane.b32.xlu0 %v1562_v47, %s6828_s11  ;;  %v364_v17 = vld [vmem:[%s6903_s20 + $0x30] sm:$0xff] }
 0x31e   : > { %v1567_v36 = vadd.f32 %v5046_v7, %v7780_v1  ;;  %v5047_v13 = vpop.f32.mrb[44].mxu1  ;;  %v358_v1 = vld [vmem:[%s6903_s20] sm:$0xff] }
 0x31f   : > { %v5048_v59 = vpop.f32.mrb[45].mxu1 }
 0x320   : > { %v5049_v38 = vadd.f32 %v5048_v59, %v5047_v13  ;;  %1622 = vrot.lane.b32.xlu1 %v1567_v36, %s6828_s11  ;;  %v365_v36 = vld [vmem:[%s6903_s20 + $0x38] sm:$0xff] }
 0x322   : > { %v1572_v23 = vadd.f32 %v5049_v38, %v7786_v62  ;;  %v5050_v19 = vpop.f32.mrb[46].mxu1  ;;  %v359_v62 = vld [vmem:[%s6903_s20 + $0x8] sm:$0xff]  ;;  %v366_v38 = vld [vmem:[%s6903_s20 + $0x40] sm:$0xff] }
 0x323   : > { %v5051_v41 = vpop.f32.mrb[47].mxu1 }
 0x324   : > { %v5052_v28 = vadd.f32 %v5051_v41, %v5050_v19  ;;  %1624 = vrot.lane.b32.xlu0 %v1572_v23, %s6828_s11  ;;  %v367_v41 = vld [vmem:[%s6903_s20 + $0x48] sm:$0xff] }
 0x326   : > { %v1577_v16 = vadd.f32 %v5052_v28, %v7792_v29 }
 0x328   : > { %1626 = vrot.lane.b32.xlu1 %v1577_v16, %s6828_s11 }
 0x35e   : > { %v1597_v24 = vpop.permute.xlu0 %1596 }
 0x35f   : > { %v1645_v56 = vsel %vm1644_vm1, %v358_v1, %v1597_v24  ;;  %v368_v1 = vld [vmem:[%s6903_s20 + $0x50] sm:$0xff] }
 0x360   : > { %5561 = vmatprep.mubr.msk.f32.mxu0 %vm9368_vm2, %v1645_v56 }
 0x362   : > { %v1599_v21 = vpop.permute.xlu1 %1598 }
 0x363   : > { %v1646_v30 = vsel %vm1644_vm1, %v359_v62, %v1599_v21  ;;  %v369_v62 = vld [vmem:[%s6903_s20 + $0x58] sm:$0xff] }
 0x364   : > { %5562 = vmatmul.mubr.msk.f32.vlgmr.msra.gmra.mrb[80].mxu0 %vm9368_vm2, %v1646_v30 }
 0x366   : > { %v1601_v29 = vpop.permute.xlu0 %1600 }
 0x367   : > { %v1647_v25 = vsel %vm1644_vm1, %v360_v53, %v1601_v29  ;;  %v370_v53 = vld [vmem:[%s6903_s20 + $0x60] sm:$0xff] }
 0x368   : > { %5564 = vmatprep.mubr.msk.f32.mxu0 %vm9368_vm2, %v1647_v25 }
 0x36a   : > { %v1603_v26 = vpop.permute.xlu1 %1602 }
 0x36b   : > { %v1648_v10 = vsel %vm1644_vm1, %v361_v44, %v1603_v26  ;;  %v371_v44 = vld [vmem:[%s6903_s20 + $0x68] sm:$0xff] }
 0x36c   : > { %5565 = vmatmul.mubr.msk.f32.gmra.mrb[82].mxu0 %vm9368_vm2, %v1648_v10 }
 0x36e   : > { %v1605_v31 = vpop.permute.xlu0 %1604 }
 0x36f   : > { %v1649_v50 = vsel %vm1644_vm1, %v362_v35, %v1605_v31  ;;  %v372_v35 = vld [vmem:[%s6903_s20 + $0x70] sm:$0xff] }
 0x370   : > { %5567 = vmatprep.mubr.msk.f32.mxu0 %vm9368_vm2, %v1649_v50 }
 0x372   : > { %v1607_v18 = vpop.permute.xlu1 %1606 }
 0x373   : > { %v1650_v47 = vsel %vm1644_vm1, %v363_v22, %v1607_v18  ;;  %v373_v22 = vld [vmem:[%s6903_s20 + $0x78] sm:$0xff]  ;;  %s6829_s20 = smov 96  }
 0x374   : > { %5568 = vmatmul.mubr.msk.f32.gmra.mrb[84].mxu0 %vm9368_vm2, %v1650_v47 }
 0x376   : > { %v1609_v4 = vpop.permute.xlu0 %1608 }
 0x377   : > { %v1651_v7 = vsel %vm1644_vm1, %v364_v17, %v1609_v4  ;;  %v6722_v17 = vld [vmem:[%s9304_s5 + $0x8] sm:$0xff]  ;;  %v4695_v4 = vld [vmem:[%s9306_s7] ss:$0 sm:$0xff] }
 0x378   : > { %5570 = vmatprep.mubr.msk.f32.mxu0 %vm9368_vm2, %v1651_v7 }
 0x37a   : > { %v1611_v13 = vpop.permute.xlu1 %1610 }
 0x37b   : > { %v1652_v59 = vsel %vm1644_vm1, %v365_v36, %v1611_v13 }
 0x37c   : > { %5571 = vmatmul.mubr.msk.f32.gmra.mrb[86].mxu0 %vm9368_vm2, %v1652_v59 }
 0x37e   : > { %v1613_v23 = vpop.permute.xlu0 %1612 }
 0x37f   : > { %v1653_v19 = vsel %vm1644_vm1, %v366_v38, %v1613_v23 }
 0x380   : > { %5573 = vmatprep.mubr.msk.f32.mxu0 %vm9368_vm2, %v1653_v19 }
 0x382   : > { %v1615_v28 = vpop.permute.xlu1 %1614 }
 0x383   : > { %v1654_v16 = vsel %vm1644_vm1, %v367_v41, %v1615_v28 }
 0x384   : > { %5574 = vmatmul.mubr.msk.f32.gmra.mrb[88].mxu0 %vm9368_vm2, %v1654_v16 }
 0x386   : > { %v1617_v24 = vpop.permute.xlu0 %1616 }
 0x387   : > { %v1655_v56 = vsel %vm1644_vm1, %v368_v1, %v1617_v24 }
 0x388   : > { %5576 = vmatprep.mubr.msk.f32.mxu0 %vm9368_vm2, %v1655_v56 }
 0x38a   : > { %v1619_v21 = vpop.permute.xlu1 %1618 }
 0x38b   : > { %v1656_v30 = vsel %vm1644_vm1, %v369_v62, %v1619_v21 }
 0x38c   : > { %5577 = vmatmul.mubr.msk.f32.gmra.mrb[90].mxu0 %vm9368_vm2, %v1656_v30 }
 0x38e   : > { %v1621_v29 = vpop.permute.xlu0 %1620 }
 0x38f   : > { %v1657_v25 = vsel %vm1644_vm1, %v370_v53, %v1621_v29 }
 0x390   : > { %5579 = vmatprep.mubr.msk.f32.mxu0 %vm9368_vm2, %v1657_v25 }
 0x392   : > { %v1623_v26 = vpop.permute.xlu1 %1622 }
 0x393   : > { %v1658_v10 = vsel %vm1644_vm1, %v371_v44, %v1623_v26 }
 0x394   : > { %5580 = vmatmul.mubr.msk.f32.gmra.mrb[92].mxu0 %vm9368_vm2, %v1658_v10 }
 0x396   : > { %v1625_v31 = vpop.permute.xlu0 %1624 }
 0x397   : > { %v1659_v50 = vsel %vm1644_vm1, %v372_v35, %v1625_v31 }
 0x398   : > { %5582 = vmatprep.mubr.msk.f32.mxu0 %vm9368_vm2, %v1659_v50 }
 0x39a   : > { %v1627_v18 = vpop.permute.xlu1 %1626 }
 0x39b   : > { %v1660_v47 = vsel %vm1644_vm1, %v373_v22, %v1627_v18 }
 0x39c   : > { %5583 = vmatmul.mubr.msk.f32.gmra.mrb[94].mxu0 %vm9368_vm2, %v1660_v47 }
 0x39d   : > { %3700 = vmatprep.mubr.f32.mxu0 %v6722_v17 }
 0x437   : > { %v5563_v7 = vpop.f32.mrb[80].mxu0 }
 0x438   : > { %v7892_v36 = vadd.f32 %v5563_v7, %v4695_v4  ;;  %v1791_v13 = vpop.f32.mrb[81].mxu0 }
 0x439   : > { %v7894_v59 = vadd.f32 %v4695_v4, %v1791_v13 }
 0x43a   : > { %9411 = vst [vmem:[#allocation27_spill] sm:$0xff] %v7892_v36 }
 0x43b   : > { %9412 = vst [vmem:[#allocation36_spill] sm:$0xff] %v7894_v59  ;;  %v6218_v38 = vpack.i.bf16 %v7892_v36, %v7894_v59  ;;  %6338 = vtanh.f32 %v7894_v59 }
 0x43d   : > { %6219 = vrot.lane.b32.xlu0 %v6218_v38, %s6829_s20 }
 0x43f   : > { %v5566_v23 = vpop.f32.mrb[82].mxu0 }
 0x440   : > { %v7899_v19 = vadd.f32 %v5566_v23, %v4695_v4  ;;  %v1801_v41 = vpop.f32.mrb[83].mxu0 }
 0x441   : > { %v7901_v28 = vadd.f32 %v4695_v4, %v1801_v41 }
 0x442   : > { %9413 = vst [vmem:[#allocation37_spill] sm:$0xff] %v7899_v19 }
 0x443   : > { %9414 = vst [vmem:[#allocation38_spill] sm:$0xff] %v7901_v28  ;;  %v6223_v16 = vpack.i.bf16 %v7899_v19, %v7901_v28  ;;  %6340 = vtanh.f32 %v7901_v28 }
 0x444   : > { %6342 = vtanh.f32 %v7892_v36 }
 0x445   : > { %6224 = vrot.lane.b32.xlu1 %v6223_v16, %s6829_s20 }
 0x447   : > { %v5569_v1 = vpop.f32.mrb[84].mxu0 }
 0x448   : > { %v7906_v24 = vadd.f32 %v5569_v1, %v4695_v4  ;;  %v1811_v56 = vpop.f32.mrb[85].mxu0  ;;  %v2547_v1 = vld [vmem:[%s9303_s4] sm:$0xff] }
 0x449   : > { %v7908_v62 = vadd.f32 %v4695_v4, %v1811_v56  ;;  %5721 = vmatprep.mubr.f32.mxu1 %v2547_v1 }
 0x44a   : > { %9415 = vst [vmem:[#allocation39_spill] sm:$0xff] %v7906_v24 }
 0x44b   : > { %9416 = vst [vmem:[#allocation40_spill] sm:$0xff] %v7908_v62  ;;  %v6228_v21 = vpack.i.bf16 %v7906_v24, %v7908_v62  ;;  %6344 = vtanh.f32 %v7908_v62 }
 0x44c   : > { %6346 = vtanh.f32 %v7899_v19 }
 0x44d   : > { %6229 = vrot.lane.b32.xlu0 %v6228_v21, %s6829_s20 }
 0x44f   : > { %v5572_v30 = vpop.f32.mrb[86].mxu0 }
 0x450   : > { %v7913_v53 = vadd.f32 %v5572_v30, %v4695_v4  ;;  %v1821_v29 = vpop.f32.mrb[87].mxu0 }
 0x451   : > { %v7915_v25 = vadd.f32 %v4695_v4, %v1821_v29 }
 0x452   : > { %9417 = vst [vmem:[#allocation41_spill] sm:$0xff] %v7913_v53 }
 0x453   : > { %9418 = vst [vmem:[#allocation42_spill] sm:$0xff] %v7915_v25  ;;  %v6233_v44 = vpack.i.bf16 %v7913_v53, %v7915_v25  ;;  %6348 = vtanh.f32 %v7915_v25 }
 0x454   : > { %6350 = vtanh.f32 %v7906_v24 }
 0x455   : > { %6234 = vrot.lane.b32.xlu1 %v6233_v44, %s6829_s20 }
 0x457   : > { %v5575_v26 = vpop.f32.mrb[88].mxu0 }
 0x458   : > { %v7920_v10 = vadd.f32 %v5575_v26, %v4695_v4  ;;  %v1831_v35 = vpop.f32.mrb[89].mxu0  ;;  %v9442_v26 = vld [vmem:[#allocation14_spill] sm:$0xff] }
 0x459   : > { %v7922_v31 = vadd.f32 %v4695_v4, %v1831_v35 }
 0x45a   : > { %9419 = vst [vmem:[#allocation43_spill] sm:$0xff] %v7920_v10 }
 0x45b   : > { %9420 = vst [vmem:[#allocation44_spill] sm:$0xff] %v7922_v31  ;;  %v6238_v50 = vpack.i.bf16 %v7920_v10, %v7922_v31  ;;  %6352 = vtanh.f32 %v7922_v31 }
 0x45c   : > { %6354 = vtanh.f32 %v7913_v53 }
 0x45d   : > { %6239 = vrot.lane.b32.xlu0 %v6238_v50, %s6829_s20 }
 0x45f   : > { %v5578_v22 = vpop.f32.mrb[90].mxu0 }
 0x460   : > { %v7927_v18 = vadd.f32 %v5578_v22, %v4695_v4  ;;  %v1841_v47 = vpop.f32.mrb[91].mxu0 }
 0x461   : > { %v7929_v17 = vadd.f32 %v4695_v4, %v1841_v47  ;;  %v9443_v47 = vld [vmem:[#allocation28_spill] sm:$0xff] }
 0x462   : > { %9421 = vst [vmem:[#allocation45_spill] sm:$0xff] %v7927_v18 }
 0x463   : > { %9422 = vst [vmem:[#allocation46_spill] sm:$0xff] %v7929_v17  ;;  %v6243_v7 = vpack.i.bf16 %v7927_v18, %v7929_v17  ;;  %6356 = vtanh.f32 %v7929_v17 }
 0x464   : > { %6358 = vtanh.f32 %v7920_v10 }
 0x465   : > { %6244 = vrot.lane.b32.xlu1 %v6243_v7, %s6829_s20  ;;  %v9444_v7 = vld [vmem:[#allocation31_spill] sm:$0xff] }
 0x467   : > { %v5581_v13 = vpop.f32.mrb[92].mxu0 }
 0x468   : > { %v7934_v38 = vadd.f32 %v5581_v13, %v4695_v4  ;;  %v1851_v23 = vpop.f32.mrb[93].mxu0 }
 0x469   : > { %v7936_v41 = vadd.f32 %v4695_v4, %v1851_v23  ;;  %v9445_v23 = vld [vmem:[#allocation13_spill] sm:$0xff] }
 0x46a   : > { %9423 = vst [vmem:[#allocation47_spill] sm:$0xff] %v7934_v38 }
 0x46b   : > { %9424 = vst [vmem:[#allocation48_spill] sm:$0xff] %v7936_v41  ;;  %v6248_v16 = vpack.i.bf16 %v7934_v38, %v7936_v41  ;;  %6360 = vtanh.f32 %v7936_v41 }
 0x46c   : > { %6362 = vtanh.f32 %v7927_v18 }
 0x46d   : > { %6249 = vrot.lane.b32.xlu0 %v6248_v16, %s6829_s20  ;;  %v9446_v16 = vld [vmem:[#allocation16_spill] sm:$0xff] }
 0x46f   : > { %v5584_v56 = vpop.f32.mrb[94].mxu0 }
 0x470   : > { %v7944_v21 = vadd.f32 %v5584_v56, %v4695_v4  ;;  %v1861_v30 = vpop.f32.mrb[95].mxu0 }
 0x471   : > { %v7946_v29 = vadd.f32 %v4695_v4, %v1861_v30  ;;  %3412 = vrot.lane.b32.xlu0 %v7279_v58, %s6829_s20  ;;  %v9433_v58 = vld [vmem:[#allocation25_spill] sm:$0xff] }
 0x472   : > { %9425 = vst [vmem:[#allocation49_spill] sm:$0xff] %v7944_v21 }
 0x473   : > { %9426 = vst [vmem:[#allocation50_spill] sm:$0xff] %v7946_v29  ;;  %v6253_v44 = vpack.i.bf16 %v7944_v21, %v7946_v29  ;;  %6364 = vtanh.f32 %v7946_v29 }
 0x474   : > { %6366 = vtanh.f32 %v7934_v38 }
 0x475   : > { %6254 = vrot.lane.b32.xlu1 %v6253_v44, %s6829_s20  ;;  %3380 = vrot.lane.b32.xlu0 %v7228_v34, %s6829_s20  ;;  %v9447_v44 = vld [vmem:[#allocation30_spill] sm:$0xff]  ;;  %6368 = vtanh.f32 %v7944_v21 }
 0x479   : > { %3414 = vrot.lane.b32.xlu1 %v7277_v57, %s6829_s20  ;;  %3416 = vrot.lane.b32.xlu0 %v7285_v61, %s6829_s20  ;;  %v9432_v57 = vld [vmem:[#allocation22_spill] sm:$0xff]  ;;  %v9434_v61 = vld [vmem:[#allocation7_spill] sm:$0xff] }
 0x47d   : > { %3382 = vrot.lane.b32.xlu1 %v7226_v33, %s6829_s20  ;;  %3384 = vrot.lane.b32.xlu0 %v7237_v37, %s6829_s20 }
 0x481   : > { %3418 = vrot.lane.b32.xlu1 %v7283_v60, %s6829_s20  ;;  %3420 = vrot.lane.b32.xlu0 %v7291_v0, %s6829_s20 }
 0x485   : > { %3386 = vrot.lane.b32.xlu1 %v7235_v27, %s6829_s20  ;;  %3388 = vrot.lane.b32.xlu0 %v7243_v40, %s6829_s20 }
 0x489   : > { %3422 = vrot.lane.b32.xlu1 %v7289_v63, %s6829_s20  ;;  %3424 = vrot.lane.b32.xlu0 %v7297_v3, %s6829_s20  ;;  %v9435_v63 = vld [vmem:[#allocation10_spill] sm:$0xff] }
 0x48d   : > { %3390 = vrot.lane.b32.xlu1 %v7241_v39, %s6829_s20  ;;  %3392 = vrot.lane.b32.xlu0 %v7249_v43, %s6829_s20  ;;  %v9427_v39 = vld [vmem:[#allocation6_spill] sm:$0xff] }
 0x491   : > { %3426 = vrot.lane.b32.xlu1 %v7295_v2, %s6829_s20  ;;  %3428 = vrot.lane.b32.xlu0 %v7303_v6, %s6829_s20 }
 0x495   : > { %3394 = vrot.lane.b32.xlu1 %v7247_v42, %s6829_s20  ;;  %3396 = vrot.lane.b32.xlu0 %v7255_v46, %s6829_s20  ;;  %v9429_v46 = vld [vmem:[#allocation23_spill] sm:$0xff] }
 0x499   : > { %3430 = vrot.lane.b32.xlu1 %v7301_v5, %s6829_s20  ;;  %3432 = vrot.lane.b32.xlu0 %v7309_v9, %s6829_s20  ;;  %v9436_v5 = vld [vmem:[#allocation24_spill] sm:$0xff] }
 0x49a   : > { %v9438_v9 = vld [vmem:[#allocation12_spill] sm:$0xff] }
 0x49d   : > { %3398 = vrot.lane.b32.xlu1 %v7253_v45, %s6829_s20  ;;  %3400 = vrot.lane.b32.xlu0 %v7261_v49, %s6829_s20  ;;  %v9428_v45 = vld [vmem:[#allocation21_spill] sm:$0xff] }
 0x49e   : > { %v9430_v49 = vld [vmem:[#allocation5_spill] sm:$0xff] }
 0x4a1   : > { %3434 = vrot.lane.b32.xlu1 %v7307_v8, %s6829_s20  ;;  %3436 = vrot.lane.b32.xlu0 %v7315_v12, %s6829_s20  ;;  %v9437_v8 = vld [vmem:[#allocation9_spill] sm:$0xff] }
 0x4a5   : > { %3402 = vrot.lane.b32.xlu1 %v7259_v48, %s6829_s20  ;;  %3404 = vrot.lane.b32.xlu0 %v7267_v52, %s6829_s20 }
 0x4a9   : > { %3438 = vrot.lane.b32.xlu1 %v7313_v11, %s6829_s20  ;;  %3440 = vrot.lane.b32.xlu0 %v7321_v15, %s6829_s20  ;;  %v9439_v15 = vld [vmem:[#allocation26_spill] sm:$0xff] }
 0x4ad   : > { %3406 = vrot.lane.b32.xlu1 %v7265_v51, %s6829_s20  ;;  %3408 = vrot.lane.b32.xlu0 %v7273_v55, %s6829_s20  ;;  %v9431_v51 = vld [vmem:[#allocation8_spill] sm:$0xff] }
 0x4af   : > { %v6220_v33 = vpop.permute.xlu0 %6219 }
 0x4b0   : > { %v6222_v34 = vunpack.i.h.bf16 %v6220_v33  ;;  %v6221_v27 = vunpack.i.l.bf16 %v6220_v33  ;;  %v9448_v33 = vld [vmem:[#allocation33_spill] sm:$0xff] }
 0x4b1   : > { %3442 = vrot.lane.b32.xlu1 %v7319_v14, %s6829_s20  ;;  %3476 = vrot.lane.b32.xlu0 %v7468_v20, %s6829_s20  ;;  %v9440_v20 = vld [vmem:[#allocation29_spill] sm:$0xff] }
 0x4b2   : > { %v5993_v37 = vpack.c.bf16 %v6222_v34, %v6221_v27  ;;  %v9449_v27 = vld [vmem:[#allocation15_spill] sm:$0xff] }
 0x4b4   : > { %5994 = vmatprep.subr.bf16.mxu1 %v5993_v37 }
 0x4b5   : > { %3410 = vrot.lane.b32.xlu1 %v7271_v54, %s6829_s20  ;;  %3444 = vrot.lane.b32.xlu0 %v9427_v39, %s6829_s20 }
 0x4b6   : > { %5996 = vmatpush3.bf16.msra.mxu1 %v5993_v37  ;;  %v9450_v37 = vld [vmem:[#allocation18_spill] sm:$0xff] }
 0x4b7   : > { %v6225_v40 = vpop.permute.xlu1 %6224 }
 0x4b8   : > { %v6227_v42 = vunpack.i.h.bf16 %v6225_v40  ;;  %v6226_v43 = vunpack.i.l.bf16 %v6225_v40 }
 0x4b9   : > { %3478 = vrot.lane.b32.xlu1 %v9428_v45, %s6829_s20  ;;  %3480 = vrot.lane.b32.xlu0 %v9429_v46, %s6829_s20  ;;  %v9452_v45 = vld [vmem:[#allocation35_spill] sm:$0xff] }
 0x4ba   : > { %v5997_v48 = vpack.c.bf16 %v6227_v42, %v6226_v43  ;;  %v9451_v43 = vld [vmem:[#allocation32_spill] sm:$0xff] }
 0x4bc   : > { %5998 = vmatprep.subr.bf16.mxu1 %v5997_v48 }
 0x4bd   : > { %3446 = vrot.lane.b32.xlu1 %v9430_v49, %s6829_s20  ;;  %3448 = vrot.lane.b32.xlu0 %v9431_v51, %s6829_s20  ;;  %v9454_v49 = vld [vmem:[#allocation20_spill] sm:$0xff]  ;;  %v2548_v51 = vld [vmem:[%s9303_s4 + $0x8] sm:$0xff] }
 0x4be   : > { %6000 = vmatpush3.bf16.msra.mxu1 %v5997_v48  ;;  %v9453_v48 = vld [vmem:[#allocation17_spill] sm:$0xff] }
 0x4bf   : > { %v6230_v52 = vpop.permute.xlu0 %6229 }
 0x4c0   : > { %v6232_v54 = vunpack.i.h.bf16 %v6230_v52  ;;  %v6231_v55 = vunpack.i.l.bf16 %v6230_v52  ;;  %v2549_v52 = vld [vmem:[%s9303_s4 + $0x10] sm:$0xff] }
 0x4c1   : > { %3482 = vrot.lane.b32.xlu1 %v9432_v57, %s6829_s20  ;;  %3484 = vrot.lane.b32.xlu0 %v9433_v58, %s6829_s20  ;;  %v2550_v57 = vld [vmem:[%s9303_s4 + $0x18] sm:$0xff]  ;;  %v2551_v58 = vld [vmem:[%s9303_s4 + $0x20] sm:$0xff] }
 0x4c2   : > { %v6001_v60 = vpack.c.bf16 %v6232_v54, %v6231_v55  ;;  %v6339_v54 = vpop.eup %6338  ;;  %v9455_v55 = vld [vmem:[#allocation34_spill] sm:$0xff] }
 0x4c4   : > { %6002 = vmatprep.subr.bf16.mxu1 %v6001_v60 }
 0x4c5   : > { %3450 = vrot.lane.b32.xlu1 %v9434_v61, %s6829_s20  ;;  %3452 = vrot.lane.b32.xlu0 %v9435_v63, %s6829_s20  ;;  %v9456_v61 = vld [vmem:[#allocation19_spill] sm:$0xff]  ;;  %v2552_v63 = vld [vmem:[%s9303_s4 + $0x28] sm:$0xff] }
 0x4c6   : > { %6004 = vmatpush3.bf16.msra.mxu1 %v6001_v60  ;;  %v6341_v60 = vpop.eup %6340 }
 0x4c7   : > { %v6235_v0 = vpop.permute.xlu1 %6234 }
 0x4c8   : > { %v6237_v2 = vunpack.i.h.bf16 %v6235_v0  ;;  %v6236_v3 = vunpack.i.l.bf16 %v6235_v0  ;;  %v2553_v0 = vld [vmem:[%s9303_s4 + $0x30] sm:$0xff] }
 0x4c9   : > { %3486 = vrot.lane.b32.xlu1 %v9436_v5, %s6829_s20  ;;  %3488 = vrot.lane.b32.xlu0 %v9405_v32, %s6829_s20  ;;  %v9441_v32 = vld [vmem:[#allocation11_spill] sm:$0xff]  ;;  %v2554_v5 = vld [vmem:[%s9303_s4 + $0x38] sm:$0xff] }
 0x4ca   : > { %v6005_v6 = vpack.c.bf16 %v6237_v2, %v6236_v3  ;;  %v6343_v2 = vpop.eup %6342 }
 0x4cb   : > { %v6345_v3 = vpop.eup %6344 }
 0x4cc   : > { %6006 = vmatprep.subr.bf16.mxu1 %v6005_v6 }
 0x4cd   : > { %3454 = vrot.lane.b32.xlu1 %v9437_v8, %s6829_s20  ;;  %3456 = vrot.lane.b32.xlu0 %v9438_v9, %s6829_s20  ;;  %v6347_v8 = vpop.eup %6346 }
 0x4ce   : > { %6008 = vmatpush3.bf16.msra.mxu1 %v6005_v6  ;;  %v2555_v6 = vld [vmem:[%s9303_s4 + $0x40] sm:$0xff]  ;;  %v6349_v9 = vpop.eup %6348 }
 0x4cf   : > { %v6240_v11 = vpop.permute.xlu0 %6239 }
 0x4d0   : > { %v6242_v12 = vunpack.i.h.bf16 %v6240_v11  ;;  %v6241_v14 = vunpack.i.l.bf16 %v6240_v11  ;;  %v2556_v11 = vld [vmem:[%s9303_s4 + $0x48] sm:$0xff] }
 0x4d1   : > { %3490 = vrot.lane.b32.xlu1 %v9439_v15, %s6829_s20  ;;  %3492 = vrot.lane.b32.xlu0 %v9440_v20, %s6829_s20  ;;  %v2558_v20 = vld [vmem:[%s9303_s4 + $0x58] sm:$0xff] }
 0x4d2   : > { %v6009_v4 = vpack.c.bf16 %v6242_v12, %v6241_v14  ;;  %v2557_v12 = vld [vmem:[%s9303_s4 + $0x50] sm:$0xff]  ;;  %v6351_v14 = vpop.eup %6350 }
 0x4d3   : > { %v6353_v15 = vpop.eup %6352 }
 0x4d4   : > { %6010 = vmatprep.subr.bf16.mxu1 %v6009_v4 }
 0x4d5   : > { %3458 = vrot.lane.b32.xlu1 %v9441_v32, %s6829_s20  ;;  %3460 = vrot.lane.b32.xlu0 %v9442_v26, %s6829_s20  ;;  %v6355_v32 = vpop.eup %6354 }
 0x4d6   : > { %6012 = vmatpush3.bf16.msra.mxu1 %v6009_v4  ;;  %v2559_v4 = vld [vmem:[%s9303_s4 + $0x60] sm:$0xff]  ;;  %v6357_v26 = vpop.eup %6356 }
 0x4d7   : > { %v6245_v35 = vpop.permute.xlu1 %6244 }
 0x4d8   : > { %v6247_v50 = vunpack.i.h.bf16 %v6245_v35  ;;  %v6246_v22 = vunpack.i.l.bf16 %v6245_v35  ;;  %v2560_v35 = vld [vmem:[%s9303_s4 + $0x68] sm:$0xff] }
 0x4d9   : > { %3494 = vrot.lane.b32.xlu1 %v9443_v47, %s6829_s20  ;;  %3496 = vrot.lane.b32.xlu0 %v9444_v7, %s6829_s20  ;;  %v2562_v7 = vld [vmem:[%s9303_s4 + $0x78] sm:$0xff] }
 0x4da   : > { %v6013_v13 = vpack.c.bf16 %v6247_v50, %v6246_v22  ;;  %v2561_v50 = vld [vmem:[%s9303_s4 + $0x70] sm:$0xff]  ;;  %v6359_v22 = vpop.eup %6358 }
 0x4db   : > { %v6361_v47 = vpop.eup %6360 }
 0x4dc   : > { %6014 = vmatprep.subr.bf16.mxu1 %v6013_v13 }
 0x4dd   : > { %3462 = vrot.lane.b32.xlu1 %v9445_v23, %s6829_s20  ;;  %3464 = vrot.lane.b32.xlu0 %v9446_v16, %s6829_s20  ;;  %v6363_v23 = vpop.eup %6362 }
 0x4de   : > { %6016 = vmatpush3.bf16.msra.mxu1 %v6013_v13  ;;  %v2563_v13 = vld [vmem:[%s9303_s4 + $0x80] sm:$0xff]  ;;  %v6365_v16 = vpop.eup %6364 }
 0x4df   : > { %v6250_v1 = vpop.permute.xlu0 %6249 }
 0x4e0   : > { %v6252_v56 = vunpack.i.h.bf16 %v6250_v1  ;;  %v6251_v30 = vunpack.i.l.bf16 %v6250_v1  ;;  %v2564_v1 = vld [vmem:[%s9303_s4 + $0x88] sm:$0xff] }
 0x4e1   : > { %3498 = vrot.lane.b32.xlu1 %v9447_v44, %s6829_s20  ;;  %3500 = vrot.lane.b32.xlu0 %v9448_v33, %s6829_s20  ;;  %v2566_v44 = vld [vmem:[%s9303_s4 + $0x98] sm:$0xff]  ;;  %v2567_v33 = vld [vmem:[%s9303_s4 + $0xa0] sm:$0xff] }
 0x4e2   : > { %v6017_v34 = vpack.c.bf16 %v6252_v56, %v6251_v30  ;;  %v2565_v56 = vld [vmem:[%s9303_s4 + $0x90] sm:$0xff]  ;;  %v6367_v30 = vpop.eup %6366 }
 0x4e4   : > { %6018 = vmatprep.subr.bf16.mxu1 %v6017_v34 }
 0x4e5   : > { %3466 = vrot.lane.b32.xlu1 %v9449_v27, %s6829_s20  ;;  %3468 = vrot.lane.b32.xlu0 %v9450_v37, %s6829_s20  ;;  %v2568_v27 = vld [vmem:[%s9303_s4 + $0xa8] sm:$0xff]  ;;  %v2569_v37 = vld [vmem:[%s9303_s4 + $0xb0] sm:$0xff] }
 0x4e6   : > { %6020 = vmatpush3.bf16.msra.mxu1 %v6017_v34  ;;  %v6369_v34 = vpop.eup %6368 }
 0x4e7   : > { %v6255_v39 = vpop.permute.xlu1 %6254 }
 0x4e8   : > { %v6257_v40 = vunpack.i.h.bf16 %v6255_v39  ;;  %v6256_v42 = vunpack.i.l.bf16 %v6255_v39  ;;  %v2570_v39 = vld [vmem:[%s9303_s4 + $0xb8] sm:$0xff] }
 0x4e9   : > { %3502 = vrot.lane.b32.xlu1 %v9451_v43, %s6829_s20  ;;  %3504 = vrot.lane.b32.xlu0 %v9452_v45, %s6829_s20  ;;  %v2573_v43 = vld [vmem:[%s9303_s4 + $0xd0] sm:$0xff]  ;;  %v2574_v45 = vld [vmem:[%s9303_s4 + $0xd8] sm:$0xff] }
 0x4ea   : > { %v6021_v46 = vpack.c.bf16 %v6257_v40, %v6256_v42  ;;  %v2571_v40 = vld [vmem:[%s9303_s4 + $0xc0] sm:$0xff]  ;;  %v2572_v42 = vld [vmem:[%s9303_s4 + $0xc8] sm:$0xff] }
 0x4ec   : > { %6022 = vmatprep.subr.bf16.mxu1 %v6021_v46 }
 0x4ed   : > { %3470 = vrot.lane.b32.xlu1 %v9453_v48, %s6829_s20  ;;  %3472 = vrot.lane.b32.xlu0 %v9454_v49, %s6829_s20  ;;  %v2576_v48 = vld [vmem:[%s9303_s4 + $0xe8] sm:$0xff]  ;;  %v2577_v49 = vld [vmem:[%s9303_s4 + $0xf0] sm:$0xff] }
 0x4ee   : > { %6024 = vmatpush3.bf16.msra.mxu1 %v6021_v46  ;;  %v2575_v46 = vld [vmem:[%s9303_s4 + $0xe0] sm:$0xff] }
 0x4f1   : > { %5722 = vmatmul.mubr.f32.vlgmr.msra.gmra.mrb[48].mxu1 %v2548_v51  ;;  %3506 = vrot.lane.b32.xlu1 %v9455_v55, %s6829_s20  ;;  %v2578_v51 = vld [vmem:[%s9303_s4 + $0xf8] sm:$0xff]  ;;  %v2581_v55 = vld [vmem:[%s9303_s4 + $0x110] sm:$0xff] }
 0x4f2   : > { %3942 = vrot.lane.b32.xlu0 %v6339_v54, %s6828_s11  ;;  %5724 = vmatprep.mubr.f32.mxu1 %v2549_v52  ;;  %v2579_v52 = vld [vmem:[%s9303_s4 + $0x100] sm:$0xff]  ;;  %v2580_v54 = vld [vmem:[%s9303_s4 + $0x108] sm:$0xff] }
 0x4f5   : > { %5725 = vmatmul.mubr.f32.gmra.mrb[50].mxu1 %v2550_v57  ;;  %3474 = vrot.lane.b32.xlu1 %v9456_v61, %s6829_s20  ;;  %v2582_v57 = vld [vmem:[%s9303_s4 + $0x118] sm:$0xff]  ;;  %v2585_v61 = vld [vmem:[%s9303_s4 + $0x130] sm:$0xff] }
 0x4f6   : > { %3946 = vrot.lane.b32.xlu0 %v6341_v60, %s6828_s11  ;;  %5727 = vmatprep.mubr.f32.mxu1 %v2551_v58  ;;  %v2583_v58 = vld [vmem:[%s9303_s4 + $0x120] sm:$0xff]  ;;  %v2584_v60 = vld [vmem:[%s9303_s4 + $0x128] sm:$0xff] }
 0x4f9   : > { %5728 = vmatmul.mubr.f32.gmra.mrb[52].mxu1 %v2552_v63  ;;  %3944 = vrot.lane.b32.xlu1 %v6343_v2, %s6828_s11  ;;  %v2586_v63 = vld [vmem:[%s9303_s4 + $0x138] sm:$0xff]  ;;  %v2588_v2 = vld [vmem:[%s9303_s4 + $0x148] sm:$0xff] }
 0x4fa   : > { %3950 = vrot.lane.b32.xlu0 %v6345_v3, %s6828_s11  ;;  %5730 = vmatprep.mubr.f32.mxu1 %v2553_v0  ;;  %v2587_v0 = vld [vmem:[%s9303_s4 + $0x140] sm:$0xff]  ;;  %v2589_v3 = vld [vmem:[%s9303_s4 + $0x150] sm:$0xff] }
 0x4fd   : > { %5731 = vmatmul.mubr.f32.gmra.mrb[54].mxu1 %v2554_v5  ;;  %3948 = vrot.lane.b32.xlu1 %v6347_v8, %s6828_s11  ;;  %v2590_v5 = vld [vmem:[%s9303_s4 + $0x158] sm:$0xff]  ;;  %v2592_v8 = vld [vmem:[%s9303_s4 + $0x168] sm:$0xff] }
 0x4fe   : > { %3954 = vrot.lane.b32.xlu0 %v6349_v9, %s6828_s11  ;;  %5733 = vmatprep.mubr.f32.mxu1 %v2555_v6  ;;  %v2591_v6 = vld [vmem:[%s9303_s4 + $0x160] sm:$0xff]  ;;  %v2593_v9 = vld [vmem:[%s9303_s4 + $0x170] sm:$0xff] }
 0x501   : > { %5734 = vmatmul.mubr.f32.gmra.mrb[56].mxu1 %v2556_v11  ;;  %3952 = vrot.lane.b32.xlu1 %v6351_v14, %s6828_s11  ;;  %v2594_v11 = vld [vmem:[%s9303_s4 + $0x178] sm:$0xff]  ;;  %v2596_v14 = vld [vmem:[%s9303_s4 + $0x188] sm:$0xff] }
 0x502   : > { %3958 = vrot.lane.b32.xlu0 %v6353_v15, %s6828_s11  ;;  %5736 = vmatprep.mubr.f32.mxu1 %v2557_v12  ;;  %v2595_v12 = vld [vmem:[%s9303_s4 + $0x180] sm:$0xff]  ;;  %v2597_v15 = vld [vmem:[%s9303_s4 + $0x190] sm:$0xff] }
 0x505   : > { %5737 = vmatmul.mubr.f32.gmra.mrb[58].mxu1 %v2558_v20  ;;  %3956 = vrot.lane.b32.xlu1 %v6355_v32, %s6828_s11  ;;  %v2598_v20 = vld [vmem:[%s9303_s4 + $0x198] sm:$0xff]  ;;  %v2600_v32 = vld [vmem:[%s9303_s4 + $0x1a8] sm:$0xff] }
 0x506   : > { %3962 = vrot.lane.b32.xlu0 %v6357_v26, %s6828_s11  ;;  %5739 = vmatprep.mubr.f32.mxu1 %v2559_v4  ;;  %v2599_v4 = vld [vmem:[%s9303_s4 + $0x1a0] sm:$0xff]  ;;  %v2601_v26 = vld [vmem:[%s9303_s4 + $0x1b0] sm:$0xff] }
 0x509   : > { %5740 = vmatmul.mubr.f32.gmra.mrb[60].mxu1 %v2560_v35  ;;  %3960 = vrot.lane.b32.xlu1 %v6359_v22, %s6828_s11  ;;  %v2602_v35 = vld [vmem:[%s9303_s4 + $0x1b8] sm:$0xff]  ;;  %v2604_v22 = vld [vmem:[%s9303_s4 + $0x1c8] sm:$0xff] }
 0x50a   : > { %3966 = vrot.lane.b32.xlu0 %v6361_v47, %s6828_s11  ;;  %5742 = vmatprep.mubr.f32.mxu1 %v2561_v50  ;;  %v2603_v50 = vld [vmem:[%s9303_s4 + $0x1c0] sm:$0xff]  ;;  %v2605_v47 = vld [vmem:[%s9303_s4 + $0x1d0] sm:$0xff] }
 0x50d   : > { %5743 = vmatmul.mubr.f32.gmra.mrb[62].mxu1 %v2562_v7  ;;  %3964 = vrot.lane.b32.xlu1 %v6363_v23, %s6828_s11  ;;  %v2606_v7 = vld [vmem:[%s9303_s4 + $0x1d8] sm:$0xff]  ;;  %v2608_v23 = vld [vmem:[%s9303_s4 + $0x1e8] sm:$0xff] }
 0x50e   : > { %3970 = vrot.lane.b32.xlu0 %v6365_v16, %s6828_s11  ;;  %5745 = vmatprep.mubr.f32.mxu1 %v2563_v13  ;;  %v2607_v13 = vld [vmem:[%s9303_s4 + $0x1e0] sm:$0xff]  ;;  %v2609_v16 = vld [vmem:[%s9303_s4 + $0x1f0] sm:$0xff] }
 0x511   : > { %5746 = vmatmul.mubr.f32.gmra.mrb[64].mxu1 %v2564_v1  ;;  %3968 = vrot.lane.b32.xlu1 %v6367_v30, %s6828_s11  ;;  %v2610_v1 = vld [vmem:[%s9303_s4 + $0x1f8] sm:$0xff]  ;;  %v8302_v30 = vpop.permute.xlu0 %3412 }
 0x512   : > { %5748 = vmatprep.mubr.f32.mxu1 %v2565_v56  ;;  %v8300_v56 = vpop.permute.xlu1 %3414 }
 0x515   : > { %5749 = vmatmul.mubr.f32.gmra.mrb[66].mxu1 %v2566_v44  ;;  %3972 = vrot.lane.b32.xlu1 %v6369_v34, %s6828_s11 }
 0x516   : > { %5751 = vmatprep.mubr.f32.mxu1 %v2567_v33  ;;  %v8304_v44 = vpop.permute.xlu1 %3382  ;;  %v8306_v33 = vpop.permute.xlu0 %3380 }
 0x519   : > { %5752 = vmatmul.mubr.f32.gmra.mrb[68].mxu1 %v2568_v27 }
 0x51a   : > { %5754 = vmatprep.mubr.f32.mxu1 %v2569_v37  ;;  %v8308_v34 = vpop.permute.xlu1 %3418  ;;  %v8310_v27 = vpop.permute.xlu0 %3416 }
 0x51d   : > { %5755 = vmatmul.mubr.f32.gmra.mrb[70].mxu1 %v2570_v39 }
 0x51e   : > { %5757 = vmatprep.mubr.f32.mxu1 %v2571_v40  ;;  %v8312_v37 = vpop.permute.xlu1 %3386  ;;  %v8314_v39 = vpop.permute.xlu0 %3384 }
 0x521   : > { %5758 = vmatmul.mubr.f32.gmra.mrb[72].mxu1 %v2572_v42 }
 0x522   : > { %5760 = vmatprep.mubr.f32.mxu1 %v2573_v43  ;;  %v8316_v40 = vpop.permute.xlu1 %3422  ;;  %v8318_v42 = vpop.permute.xlu0 %3420 }
 0x525   : > { %5761 = vmatmul.mubr.f32.gmra.mrb[74].mxu1 %v2574_v45 }
 0x526   : > { %5763 = vmatprep.mubr.f32.mxu1 %v2575_v46  ;;  %v8320_v43 = vpop.permute.xlu1 %3390  ;;  %v8322_v45 = vpop.permute.xlu0 %3388 }
 0x529   : > { %5764 = vmatmul.mubr.f32.gmra.mrb[76].mxu1 %v2576_v48 }
 0x52a   : > { %5766 = vmatprep.mubr.f32.mxu1 %v2577_v49  ;;  %v8324_v46 = vpop.permute.xlu1 %3426  ;;  %v8326_v48 = vpop.permute.xlu0 %3424 }
 0x52d   : > { %5767 = vmatmul.mubr.f32.gmra.mrb[78].mxu1 %v2578_v51 }
 0x52e   : > { %5769 = vmatprep.mubr.f32.mxu1 %v2579_v52  ;;  %v8328_v49 = vpop.permute.xlu1 %3394  ;;  %v8330_v51 = vpop.permute.xlu0 %3392 }
 0x531   : > { %5770 = vmatmul.mubr.f32.gmra.mrb[80].mxu1 %v2580_v54 }
 0x532   : > { %5772 = vmatprep.mubr.f32.mxu1 %v2581_v55  ;;  %v8332_v52 = vpop.permute.xlu1 %3430  ;;  %v8334_v54 = vpop.permute.xlu0 %3428 }
 0x535   : > { %5773 = vmatmul.mubr.f32.gmra.mrb[82].mxu1 %v2582_v57 }
 0x536   : > { %5775 = vmatprep.mubr.f32.mxu1 %v2583_v58  ;;  %v8336_v55 = vpop.permute.xlu1 %3398  ;;  %v8338_v57 = vpop.permute.xlu0 %3396 }
 0x539   : > { %5776 = vmatmul.mubr.f32.gmra.mrb[84].mxu1 %v2584_v60 }
 0x53a   : > { %5778 = vmatprep.mubr.f32.mxu1 %v2585_v61  ;;  %v8340_v58 = vpop.permute.xlu1 %3434  ;;  %v8342_v60 = vpop.permute.xlu0 %3432 }
 0x53d   : > { %5779 = vmatmul.mubr.f32.gmra.mrb[86].mxu1 %v2586_v63 }
 0x53e   : > { %5781 = vmatprep.mubr.f32.mxu1 %v2587_v0  ;;  %v8344_v63 = vpop.permute.xlu1 %3402 }
 0x541   : > { %5782 = vmatmul.mubr.f32.gmra.mrb[88].mxu1 %v2588_v2 }
 0x542   : > { %5784 = vmatprep.mubr.f32.mxu1 %v2589_v3  ;;  %v8346_v3 = vpop.permute.xlu0 %3400 }
 0x545   : > { %5785 = vmatmul.mubr.f32.gmra.mrb[90].mxu1 %v2590_v5 }
 0x546   : > { %5787 = vmatprep.mubr.f32.mxu1 %v2591_v6 }
 0x549   : > { %5788 = vmatmul.mubr.f32.gmra.mrb[92].mxu1 %v2592_v8 }
 0x54a   : > { %5790 = vmatprep.mubr.f32.mxu1 %v2593_v9 }
 0x54d   : > { %5791 = vmatmul.mubr.f32.gmra.mrb[94].mxu1 %v2594_v11 }
 0x54e   : > { %5793 = vmatprep.mubr.f32.mxu1 %v2595_v12 }
 0x551   : > { %5794 = vmatmul.mubr.f32.gmra.mrb[96].mxu1 %v2596_v14 }
 0x552   : > { %5796 = vmatprep.mubr.f32.mxu1 %v2597_v15  ;;  %v8348_v15 = vpop.permute.xlu1 %3438 }
 0x555   : > { %5797 = vmatmul.mubr.f32.gmra.mrb[98].mxu1 %v2598_v20 }
 0x556   : > { %5799 = vmatprep.mubr.f32.mxu1 %v2599_v4  ;;  %v8350_v4 = vpop.permute.xlu0 %3436 }
 0x559   : > { %5800 = vmatmul.mubr.f32.gmra.mrb[100].mxu1 %v2600_v32 }
 0x55a   : > { %5802 = vmatprep.mubr.f32.mxu1 %v2601_v26 }
 0x55d   : > { %5803 = vmatmul.mubr.f32.gmra.mrb[102].mxu1 %v2602_v35 }
 0x55e   : > { %5805 = vmatprep.mubr.f32.mxu1 %v2603_v50 }
 0x561   : > { %5806 = vmatmul.mubr.f32.gmra.mrb[104].mxu1 %v2604_v22 }
 0x562   : > { %5808 = vmatprep.mubr.f32.mxu1 %v2605_v47 }
 0x565   : > { %5809 = vmatmul.mubr.f32.gmra.mrb[106].mxu1 %v2606_v7 }
 0x566   : > { %5811 = vmatprep.mubr.f32.mxu1 %v2607_v13 }
 0x569   : > { %5812 = vmatmul.mubr.f32.gmra.mrb[108].mxu1 %v2608_v23  ;;  %v8352_v23 = vpop.permute.xlu1 %3406 }
 0x56a   : > { %5814 = vmatprep.mubr.f32.mxu1 %v2609_v16 }
 0x56d   : > { %5815 = vmatmul.mubr.f32.gmra.mrb[110].mxu1 %v2610_v1 }
 0x5c4   : > { %v5723_v61 = vpop.f32.mrb[48].mxu1 }
 0x5c5   : > { %v3061_v0 = vsub.f32 0.0, %v5723_v61  ;;  %v2741_v2 = vpop.f32.mrb[49].mxu1  ;;  %v8354_v61 = vpop.permute.xlu0 %3404 }
 0x5c6   : > { %v3060_v5 = vsub.f32 0.0, %v2741_v2 }
 0x5c7   : > { %v3126_v6 = vmul.f32 1.442695, %v3061_v0 }
 0x5c8   : > { %v3124_v8 = vmul.f32 1.442695, %v3060_v5  ;;  %v5726_v9 = vpop.f32.mrb[50].mxu1 }
 0x5c9   : > { %6370 = vpow2.f32 %v3126_v6  ;;  %v3063_v11 = vsub.f32 0.0, %v5726_v9  ;;  %v2751_v12 = vpop.f32.mrb[51].mxu1 }
 0x5ca   : > { %6372 = vpow2.f32 %v3124_v8  ;;  %v3062_v14 = vsub.f32 0.0, %v2751_v12 }
 0x5cb   : > { %v3130_v20 = vmul.f32 1.442695, %v3063_v11 }
 0x5cc   : > { %v3128_v32 = vmul.f32 1.442695, %v3062_v14  ;;  %v5729_v26 = vpop.f32.mrb[52].mxu1 }
 0x5cd   : > { %6374 = vpow2.f32 %v3130_v20  ;;  %v3065_v35 = vsub.f32 0.0, %v5729_v26  ;;  %v2761_v50 = vpop.f32.mrb[53].mxu1 }
 0x5ce   : > { %6376 = vpow2.f32 %v3128_v32  ;;  %v3064_v22 = vsub.f32 0.0, %v2761_v50 }
 0x5cf   : > { %v3134_v47 = vmul.f32 1.442695, %v3065_v35  ;;  %v8356_v35 = vpop.permute.xlu1 %3442 }
 0x5d0   : > { %v3132_v7 = vmul.f32 1.442695, %v3064_v22  ;;  %v5732_v13 = vpop.f32.mrb[54].mxu1 }
 0x5d1   : > { %6378 = vpow2.f32 %v3134_v47  ;;  %v3067_v16 = vsub.f32 0.0, %v5732_v13  ;;  %v2771_v1 = vpop.f32.mrb[55].mxu1  ;;  %v8358_v47 = vpop.permute.xlu0 %3440 }
 0x5d2   : > { %6380 = vpow2.f32 %v3132_v7  ;;  %v3066_v0 = vsub.f32 0.0, %v2771_v1 }
 0x5d3   : > { %v6371_v2 = vpop.eup %6370  ;;  %v3138_v5 = vmul.f32 1.442695, %v3067_v16  ;;  %v8360_v21 = vpop.permute.xlu1 %3410 }
 0x5d4   : > { %v6373_v6 = vpop.eup %6372  ;;  %v3253_v8 = vadd.f32 1.0, %v6371_v2  ;;  %v3136_v9 = vmul.f32 1.442695, %v3066_v0  ;;  %v5735_v11 = vpop.f32.mrb[56].mxu1 }
 0x5d5   : > { %v3252_v12 = vadd.f32 1.0, %v6373_v6  ;;  %6382 = vpow2.f32 %v3138_v5  ;;  %v3069_v14 = vsub.f32 0.0, %v5735_v11  ;;  %v2781_v20 = vpop.f32.mrb[57].mxu1 }
 0x5d6   : > { %6384 = vrcp.f32 %v3253_v8  ;;  %v3068_v32 = vsub.f32 0.0, %v2781_v20 }
 0x5d7   : > { %v6375_v26 = vpop.eup %6374  ;;  %6386 = vrcp.f32 %v3252_v12  ;;  %v3142_v50 = vmul.f32 1.442695, %v3069_v14 }
 0x5d8   : > { %v6377_v22 = vpop.eup %6376  ;;  %v3255_v7 = vadd.f32 1.0, %v6375_v26  ;;  %6388 = vpow2.f32 %v3136_v9  ;;  %v3140_v13 = vmul.f32 1.442695, %v3068_v32  ;;  %v5738_v16 = vpop.f32.mrb[58].mxu1 }
 0x5d9   : > { %v3254_v1 = vadd.f32 1.0, %v6377_v22  ;;  %6390 = vpow2.f32 %v3142_v50  ;;  %v3071_v0 = vsub.f32 0.0, %v5738_v16  ;;  %v2791_v2 = vpop.f32.mrb[59].mxu1  ;;  %v8362_v22 = vpop.permute.xlu0 %3408 }
 0x5da   : > { %6392 = vrcp.f32 %v3255_v7  ;;  %v3070_v5 = vsub.f32 0.0, %v2791_v2 }
 0x5db   : > { %v6379_v6 = vpop.eup %6378  ;;  %6394 = vrcp.f32 %v3254_v1  ;;  %v3146_v8 = vmul.f32 1.442695, %v3071_v0 }
 0x5dc   : > { %v6381_v11 = vpop.eup %6380  ;;  %v3257_v20 = vadd.f32 1.0, %v6379_v6  ;;  %6396 = vpow2.f32 %v3140_v13  ;;  %v3144_v12 = vmul.f32 1.442695, %v3070_v5  ;;  %v5741_v14 = vpop.f32.mrb[60].mxu1 }
 0x5dd   : > { %v3256_v26 = vadd.f32 1.0, %v6381_v11  ;;  %6398 = vpow2.f32 %v3146_v8  ;;  %v3073_v9 = vsub.f32 0.0, %v5741_v14  ;;  %v2801_v32 = vpop.f32.mrb[61].mxu1 }
 0x5de   : > { %6400 = vrcp.f32 %v3257_v20  ;;  %v3072_v50 = vsub.f32 0.0, %v2801_v32 }
 0x5df   : > { %v6383_v7 = vpop.eup %6382  ;;  %6402 = vrcp.f32 %v3256_v26  ;;  %v3150_v16 = vmul.f32 1.442695, %v3073_v9  ;;  %v8370_v9 = vpop.permute.xlu1 %3478 }
 0x5e0   : > { %v6385_v1 = vpop.eup %6384  ;;  %v3259_v0 = vadd.f32 1.0, %v6383_v7  ;;  %6404 = vpow2.f32 %v3144_v12  ;;  %v3148_v2 = vmul.f32 1.442695, %v3072_v50  ;;  %v5744_v13 = vpop.f32.mrb[62].mxu1 }
 0x5e1   : > { %v6387_v5 = vpop.eup %6386  ;;  %6406 = vpow2.f32 %v3150_v16  ;;  %v3075_v6 = vsub.f32 0.0, %v5744_v13  ;;  %v2811_v29 = vpop.f32.mrb[63].mxu1  ;;  %v8365_v8 = vmul.f32 %v6385_v1, %v8304_v44 }
 0x5e2   : > { %v6389_v11 = vpop.eup %6388  ;;  %6408 = vrcp.f32 %v3259_v0  ;;  %v3074_v14 = vsub.f32 0.0, %v2811_v29  ;;  %v8368_v20 = vmul.f32 %v6387_v5, %v8306_v33  ;;  %v8372_v7 = vpop.permute.xlu0 %3476 }
 0x5e3   : > { %v6391_v26 = vpop.eup %6390  ;;  %v3258_v32 = vadd.f32 1.0, %v6389_v11  ;;  %6410 = vpow2.f32 %v3148_v2  ;;  %v3154_v12 = vmul.f32 1.442695, %v3075_v6 }
 0x5e4   : > { %v6393_v50 = vpop.eup %6392  ;;  %v3261_v16 = vadd.f32 1.0, %v6391_v26  ;;  %v3152_v13 = vmul.f32 1.442695, %v3074_v14  ;;  %v5747_v38 = vpop.f32.mrb[64].mxu1 }
 0x5e5   : > { %v6395_v1 = vpop.eup %6394  ;;  %6412 = vrcp.f32 %v3258_v32  ;;  %v3077_v29 = vsub.f32 0.0, %v5747_v38  ;;  %v2821_v33 = vpop.f32.mrb[65].mxu1  ;;  %v8377_v0 = vmul.f32 %v6393_v50, %v8312_v37 }
 0x5e6   : > { %v6397_v5 = vpop.eup %6396  ;;  %6414 = vrcp.f32 %v3261_v16  ;;  %v3076_v2 = vsub.f32 0.0, %v2821_v33  ;;  %v8380_v6 = vmul.f32 %v6395_v1, %v8314_v39  ;;  %v8384_v50 = vpop.permute.xlu1 %3446 }
 0x5e7   : > { %v6399_v11 = vpop.eup %6398  ;;  %v3260_v26 = vadd.f32 1.0, %v6397_v5  ;;  %6416 = vpow2.f32 %v3154_v12  ;;  %v3158_v14 = vmul.f32 1.442695, %v3077_v29  ;;  %v8389_v12 = vpop.permute.xlu0 %3444 }
 0x5e8   : > { %v6401_v41 = vpop.eup %6400  ;;  %v3263_v18 = vadd.f32 1.0, %v6399_v11  ;;  %6418 = vpow2.f32 %v3152_v13  ;;  %v3156_v44 = vmul.f32 1.442695, %v3076_v2  ;;  %v5750_v32 = vpop.f32.mrb[66].mxu1 }
 0x5e9   : > { %v6403_v37 = vpop.eup %6402  ;;  %6420 = vrcp.f32 %v3260_v26  ;;  %v3079_v16 = vsub.f32 0.0, %v5750_v32  ;;  %v2831_v33 = vpop.f32.mrb[67].mxu1  ;;  %v8387_v39 = vmul.f32 %v6401_v41, %v8320_v43 }
 0x5ea   : > { %v6405_v1 = vpop.eup %6404  ;;  %6422 = vrcp.f32 %v3263_v18  ;;  %v3078_v29 = vsub.f32 0.0, %v2831_v33  ;;  %v8392_v13 = vmul.f32 %v6403_v37, %v8322_v45 }
 0x5eb   : > { %v6407_v5 = vpop.eup %6406  ;;  %v3262_v2 = vadd.f32 1.0, %v6405_v1  ;;  %6424 = vpow2.f32 %v3158_v14  ;;  %v3162_v11 = vmul.f32 1.442695, %v3079_v16  ;;  %v8399_v16 = vpop.permute.xlu1 %3482 }
 0x5ec   : > { %v6409_v38 = vpop.eup %6408  ;;  %v3265_v17 = vadd.f32 1.0, %v6407_v5  ;;  %6426 = vpow2.f32 %v3156_v44  ;;  %v5753_v26 = vpop.f32.mrb[68].mxu1  ;;  %v3160_v32 = vmul.f32 1.442695, %v3078_v29 }
 0x5ed   : > { %v6411_v43 = vpop.eup %6410  ;;  %6428 = vrcp.f32 %v3262_v2  ;;  %v3081_v10 = vsub.f32 0.0, %v5753_v26  ;;  %v2841_v18 = vpop.f32.mrb[69].mxu1  ;;  %v8397_v37 = vmul.f32 %v6409_v38, %v8328_v49 }
 0x5ee   : > { %6430 = vrcp.f32 %v3265_v17  ;;  %v3264_v33 = vadd.f32 1.0, %v6411_v43  ;;  %v3080_v45 = vsub.f32 0.0, %v2841_v18  ;;  %v8401_v5 = vpop.permute.xlu0 %3480 }
 0x5ef   : > { %v6413_v14 = vpop.eup %6412  ;;  %6432 = vpow2.f32 %v3162_v11  ;;  %v3166_v44 = vmul.f32 1.442695, %v3081_v10 }
 0x5f0   : > { %v6415_v1 = vpop.eup %6414  ;;  %6434 = vrcp.f32 %v3264_v33  ;;  %v3164_v41 = vmul.f32 1.442695, %v3080_v45  ;;  %v5756_v2 = vpop.f32.mrb[70].mxu1  ;;  %v8404_v29 = vmul.f32 %v6413_v14, %v8330_v51 }
 0x5f1   : > { %v6417_v17 = vpop.eup %6416  ;;  %6436 = vpow2.f32 %v3160_v32  ;;  %v3083_v26 = vsub.f32 0.0, %v5756_v2  ;;  %v2851_v43 = vpop.f32.mrb[71].mxu1  ;;  %v8407_v49 = vmul.f32 %v6415_v1, %v8336_v55 }
 0x5f2   : > { %v6419_v38 = vpop.eup %6418  ;;  %v3267_v18 = vadd.f32 1.0, %v6417_v17  ;;  %6438 = vpow2.f32 %v3166_v44  ;;  %v3082_v10 = vsub.f32 0.0, %v2851_v43  ;;  %v8414_v1 = vpop.permute.xlu1 %3450 }
 0x5f3   : > { %v6421_v33 = vpop.eup %6420  ;;  %v3266_v45 = vadd.f32 1.0, %v6419_v38  ;;  %6440 = vpow2.f32 %v3164_v41  ;;  %v3170_v31 = vmul.f32 1.442695, %v3083_v26  ;;  %v8419_v38 = vpop.permute.xlu0 %3448 }
 0x5f4   : > { %v6423_v51 = vpop.eup %6422  ;;  %6442 = vrcp.f32 %v3267_v18  ;;  %v3168_v14 = vmul.f32 1.442695, %v3082_v10  ;;  %v5759_v32 = vpop.f32.mrb[72].mxu1  ;;  %v8412_v2 = vmul.f32 %v6421_v33, %v8338_v57 }
 0x5f5   : > { %v6425_v55 = vpop.eup %6424  ;;  %6444 = vrcp.f32 %v3266_v45  ;;  %v3085_v44 = vsub.f32 0.0, %v5759_v32  ;;  %v2861_v17 = vpop.f32.mrb[73].mxu1  ;;  %v8417_v43 = vmul.f32 %v6423_v51, %v8344_v63 }
 0x5f6   : > { %v6427_v11 = vpop.eup %6426  ;;  %v3269_v41 = vadd.f32 1.0, %v6425_v55  ;;  %6446 = vpow2.f32 %v3170_v31  ;;  %v3084_v26 = vsub.f32 0.0, %v2861_v17 }
 0x5f7   : > { %v6429_v57 = vpop.eup %6428  ;;  %v3268_v10 = vadd.f32 1.0, %v6427_v11  ;;  %6448 = vpow2.f32 %v3168_v14  ;;  %v3174_v33 = vmul.f32 1.442695, %v3085_v44 }
 0x5f8   : > { %v6431_v53 = vpop.eup %6430  ;;  %6450 = vrcp.f32 %v3269_v41  ;;  %v3172_v45 = vmul.f32 1.442695, %v3084_v26  ;;  %v5762_v32 = vpop.f32.mrb[74].mxu1  ;;  %v8424_v63 = vmul.f32 %v6429_v57, %v8346_v3 }
 0x5f9   : > { %v6433_v51 = vpop.eup %6432  ;;  %6452 = vrcp.f32 %v3268_v10  ;;  %v3087_v25 = vsub.f32 0.0, %v5762_v32  ;;  %v2871_v55 = vpop.f32.mrb[75].mxu1  ;;  %v8427_v31 = vmul.f32 %v6431_v53, %v8352_v23 }
 0x5fa   : > { %v6435_v17 = vpop.eup %6434  ;;  %v3271_v18 = vadd.f32 1.0, %v6433_v51  ;;  %6454 = vpow2.f32 %v3174_v33  ;;  %v3086_v11 = vsub.f32 0.0, %v2871_v55  ;;  %v8431_v41 = vpop.permute.xlu1 %3486 }
 0x5fb   : > { %v6437_v44 = vpop.eup %6436  ;;  %6456 = vpow2.f32 %v3172_v45  ;;  %v3178_v3 = vmul.f32 1.442695, %v3087_v25  ;;  %v8434_v26 = vmul.f32 %v6435_v17, %v8354_v61  ;;  %v8436_v10 = vpop.permute.xlu0 %3484 }
 0x5fc   : > { %v6439_v57 = vpop.eup %6438  ;;  %9457 = vst [vmem:[#allocation6_spill] sm:$0xff] %v8436_v10  ;;  %6458 = vrcp.f32 %v3271_v18  ;;  %v3270_v53 = vadd.f32 1.0, %v6437_v44  ;;  %v3176_v23 = vmul.f32 1.442695, %v3086_v11  ;;  %v5765_v32 = vpop.f32.mrb[76].mxu1 }
 0x5fd   : > { %v6441_v33 = vpop.eup %6440  ;;  %v3273_v51 = vadd.f32 1.0, %v6439_v57  ;;  %6460 = vpow2.f32 %v3178_v3  ;;  %v3089_v55 = vsub.f32 0.0, %v5765_v32  ;;  %v2881_v14 = vpop.f32.mrb[77].mxu1 }
 0x5fe   : > { %v6443_v45 = vpop.eup %6442  ;;  %6462 = vrcp.f32 %v3270_v53  ;;  %v3272_v25 = vadd.f32 1.0, %v6441_v33  ;;  %v3088_v61 = vsub.f32 0.0, %v2881_v14  ;;  %v8446_v32 = vpop.permute.xlu1 %3454 }
 0x5ff   : > { %v6445_v17 = vpop.eup %6444  ;;  %6464 = vrcp.f32 %v3273_v51  ;;  %v3182_v62 = vmul.f32 1.442695, %v3089_v55  ;;  %v8441_v18 = vmul.f32 %v6443_v45, %v8360_v21  ;;  %v8448_v51 = vpop.permute.xlu0 %3452 }
 0x600   : > { %v6447_v11 = vpop.eup %6446  ;;  %6466 = vrcp.f32 %v3272_v25  ;;  %v5768_v44 = vpop.f32.mrb[78].mxu1  ;;  %v8444_v3 = vmul.f32 %v6445_v17, %v8362_v22  ;;  %v3180_v53 = vmul.f32 1.442695, %v3088_v61 }
 0x601   : > { %v6449_v57 = vpop.eup %6448  ;;  %v3275_v24 = vadd.f32 1.0, %v6447_v11  ;;  %6468 = vpow2.f32 %v3176_v23  ;;  %v3091_v33 = vsub.f32 0.0, %v5768_v44  ;;  %v2891_v14 = vpop.f32.mrb[79].mxu1 }
 0x602   : > { %v6451_v19 = vpop.eup %6450  ;;  %v3274_v55 = vadd.f32 1.0, %v6449_v57  ;;  %6470 = vpow2.f32 %v3182_v62  ;;  %v3090_v21 = vsub.f32 0.0, %v2891_v14 }
 0x603   : > { %v6453_v25 = vpop.eup %6452  ;;  %6472 = vrcp.f32 %v3275_v24  ;;  %v3186_v22 = vmul.f32 1.442695, %v3091_v33  ;;  %v3589_v17 = vmul.f32 %v6451_v19, %v8300_v56  ;;  %v8454_v33 = vpop.permute.xlu1 %3490 }
 0x604   : > { %v6455_v28 = vpop.eup %6454  ;;  %6474 = vrcp.f32 %v3274_v55  ;;  %v5771_v23 = vpop.f32.mrb[80].mxu1  ;;  %v3588_v61 = vmul.f32 %v6453_v25, %v8302_v30  ;;  %v3184_v36 = vmul.f32 1.442695, %v3090_v21 }
 0x605   : > { %v6457_v11 = vpop.eup %6456  ;;  %v3277_v44 = vadd.f32 1.0, %v6455_v28  ;;  %6476 = vpow2.f32 %v3180_v53  ;;  %v3093_v57 = vsub.f32 0.0, %v5771_v23  ;;  %v2901_v62 = vpop.f32.mrb[81].mxu1 }
 0x606   : > { %v6459_v14 = vpop.eup %6458  ;;  %v3276_v59 = vadd.f32 1.0, %v6457_v11  ;;  %6478 = vpow2.f32 %v3186_v22  ;;  %v3092_v45 = vsub.f32 0.0, %v2901_v62  ;;  %v6025_v10 = vpack.c.bf16 %v3589_v17, %v3588_v61  ;;  %v8457_v30 = vpop.permute.xlu0 %3488 }
 0x607   : > { %v6461_v24 = vpop.eup %6460  ;;  %6480 = vrcp.f32 %v3277_v44  ;;  %v3190_v19 = vmul.f32 1.442695, %v3093_v57  ;;  %v3591_v56 = vmul.f32 %v6459_v14, %v8308_v34  ;;  %v9458_v22 = vpack.c.bf16 %v8365_v8, %v8368_v20 }
 0x608   : > { %v6463_v55 = vpop.eup %6462  ;;  %6482 = vrcp.f32 %v3276_v59  ;;  %v3279_v28 = vadd.f32 1.0, %v6461_v24  ;;  %v3188_v53 = vmul.f32 1.442695, %v3092_v45  ;;  %6026 = vmatprep.subr.bf16.mxu0 %v6025_v10  ;;  %v5774_v21 = vpop.f32.mrb[82].mxu1 }
 0x609   : > { %v6465_v25 = vpop.eup %6464  ;;  %6484 = vpow2.f32 %v3184_v36  ;;  %6028 = vmatpush3.bf16.msra.mxu0 %v9458_v22  ;;  %v3095_v17 = vsub.f32 0.0, %v5774_v21  ;;  %v2911_v23 = vpop.f32.mrb[83].mxu1  ;;  %v3590_v61 = vmul.f32 %v6463_v55, %v8310_v27 }
 0x60a   : > { %v6467_v11 = vpop.eup %6466  ;;  %6486 = vrcp.f32 %v3279_v28  ;;  %v3094_v34 = vsub.f32 0.0, %v2911_v23  ;;  %v3593_v44 = vmul.f32 %v6465_v25, %v8316_v40  ;;  %v8465_v24 = vpop.permute.xlu1 %3458 }
 0x60b   : > { %v6469_v59 = vpop.eup %6468  ;;  %6488 = vpow2.f32 %v3190_v19  ;;  %v3194_v45 = vmul.f32 1.442695, %v3095_v17  ;;  %v6029_v10 = vpack.c.bf16 %v3591_v56, %v3590_v61  ;;  %v3592_v57 = vmul.f32 %v6467_v11, %v8318_v42  ;;  %v8467_v19 = vpop.permute.xlu0 %3456 }
 0x60c   : > { %v6471_v36 = vpop.eup %6470  ;;  %v3278_v62 = vadd.f32 1.0, %v6469_v59  ;;  %6490 = vpow2.f32 %v3188_v53  ;;  %v3192_v8 = vmul.f32 1.442695, %v3094_v34  ;;  %v5777_v20 = vpop.f32.mrb[84].mxu1  ;;  %v9459_v42 = vpack.c.bf16 %v8377_v0, %v8380_v6 }
 0x60d   : > { %v6473_v14 = vpop.eup %6472  ;;  %v3281_v27 = vadd.f32 1.0, %v6471_v36  ;;  %6492 = vpow2.f32 %v3194_v45  ;;  %6030 = vmatprep.subr.bf16.mxu0 %v6029_v10  ;;  %v3097_v55 = vsub.f32 0.0, %v5777_v20  ;;  %v2921_v28 = vpop.f32.mrb[85].mxu1  ;;  %v6033_v40 = vpack.c.bf16 %v3593_v44, %v3592_v57 }
 0x60e   : > { %v6475_v21 = vpop.eup %6474  ;;  %6494 = vrcp.f32 %v3278_v62  ;;  %6032 = vmatpush3.bf16.msra.mxu0 %v9459_v42  ;;  %v3096_v56 = vsub.f32 0.0, %v2921_v28  ;;  %v3595_v53 = vmul.f32 %v6473_v14, %v8324_v46  ;;  %v9460_v46 = vpack.c.bf16 %v8387_v39, %v8392_v13  ;;  %v8478_v62 = vpop.permute.xlu1 %3494 }
 0x60f   : > { %v6477_v25 = vpop.eup %6476  ;;  %6496 = vrcp.f32 %v3281_v27  ;;  %v3198_v22 = vmul.f32 1.442695, %v3097_v55  ;;  %6034 = vmatprep.subr.bf16.mxu0 %v6033_v40  ;;  %v3594_v17 = vmul.f32 %v6475_v21, %v8326_v48  ;;  %v8481_v27 = vpop.permute.xlu0 %3492 }
 0x610   : > { %v6479_v23 = vpop.eup %6478  ;;  %v3280_v61 = vadd.f32 1.0, %v6477_v25  ;;  %6498 = vpow2.f32 %v3192_v8  ;;  %v3196_v11 = vmul.f32 1.442695, %v3096_v56  ;;  %v5780_v34 = vpop.f32.mrb[86].mxu1 }
 0x611   : > { %v6481_v44 = vpop.eup %6480  ;;  %v3283_v59 = vadd.f32 1.0, %v6479_v23  ;;  %6500 = vpow2.f32 %v3198_v22  ;;  %v3099_v45 = vsub.f32 0.0, %v5780_v34  ;;  %v2931_v0 = vpop.f32.mrb[87].mxu1  ;;  %v6037_v6 = vpack.c.bf16 %v3595_v53, %v3594_v17 }
 0x612   : > { %v6483_v10 = vpop.eup %6482  ;;  %6502 = vrcp.f32 %v3280_v61  ;;  %6036 = vmatpush3.bf16.msra.mxu0 %v9460_v46  ;;  %v3098_v57 = vsub.f32 0.0, %v2931_v0  ;;  %v3597_v48 = vmul.f32 %v6481_v44, %v8332_v52  ;;  %v9461_v53 = vpack.c.bf16 %v8397_v37, %v8404_v29 }
 0x613   : > { %v6485_v36 = vpop.eup %6484  ;;  %6504 = vrcp.f32 %v3283_v59  ;;  %v3202_v8 = vmul.f32 1.442695, %v3099_v45  ;;  %6038 = vmatprep.subr.bf16.mxu0 %v6037_v6  ;;  %v3596_v20 = vmul.f32 %v6483_v10, %v8334_v54  ;;  %v8487_v45 = vpop.permute.xlu1 %3462 }
 0x614   : > { %v6487_v14 = vpop.eup %6486  ;;  %v3282_v55 = vadd.f32 1.0, %v6485_v36  ;;  %6506 = vpow2.f32 %v3196_v11  ;;  %v3200_v28 = vmul.f32 1.442695, %v3098_v57  ;;  %v5783_v40 = vpop.f32.mrb[88].mxu1 }
 0x615   : > { %v6489_v39 = vpop.eup %6488  ;;  %6508 = vpow2.f32 %v3202_v8  ;;  %v3101_v13 = vsub.f32 0.0, %v5783_v40  ;;  %v2941_v21 = vpop.f32.mrb[89].mxu1  ;;  %v6041_v52 = vpack.c.bf16 %v3597_v48, %v3596_v20  ;;  %v3599_v23 = vmul.f32 %v6487_v14, %v8340_v58 }
 0x616   : > { %v6491_v42 = vpop.eup %6490  ;;  %6510 = vrcp.f32 %v3282_v55  ;;  %v3285_v56 = vadd.f32 1.0, %v6489_v39  ;;  %6040 = vmatpush3.bf16.msra.mxu0 %v9461_v53  ;;  %v3100_v54 = vsub.f32 0.0, %v2941_v21  ;;  %v8490_v10 = vpop.permute.xlu0 %3460  ;;  %v9462_v58 = vpack.c.bf16 %v8407_v49, %v8412_v2 }
 0x617   : > { %v6493_v25 = vpop.eup %6492  ;;  %v3284_v22 = vadd.f32 1.0, %v6491_v42  ;;  %6512 = vpow2.f32 %v3200_v28  ;;  %v3206_v17 = vmul.f32 1.442695, %v3101_v13  ;;  %6042 = vmatprep.subr.bf16.mxu0 %v6041_v52 }
 0x618   : > { %v6495_v61 = vpop.eup %6494  ;;  %6514 = vrcp.f32 %v3285_v56  ;;  %v3287_v11 = vadd.f32 1.0, %v6493_v25  ;;  %v3204_v34 = vmul.f32 1.442695, %v3100_v54  ;;  %v5786_v44 = vpop.f32.mrb[90].mxu1 }
 0x619   : > { %v6497_v59 = vpop.eup %6496  ;;  %6516 = vrcp.f32 %v3284_v22  ;;  %v3103_v0 = vsub.f32 0.0, %v5786_v44  ;;  %v2951_v37 = vpop.f32.mrb[91].mxu1  ;;  %v3598_v29 = vmul.f32 %v6495_v61, %v8342_v60 }
 0x61a   : > { %v6499_v6 = vpop.eup %6498  ;;  %6518 = vrcp.f32 %v3287_v11  ;;  %6044 = vmatpush3.bf16.msra.mxu0 %v9462_v58  ;;  %v3102_v46 = vsub.f32 0.0, %v2951_v37  ;;  %v3601_v57 = vmul.f32 %v6497_v59, %v8348_v15  ;;  %v9463_v15 = vpack.c.bf16 %v8417_v43, %v8424_v63  ;;  %v8501_v56 = vpop.permute.xlu1 %3498 }
 0x61b   : > { %v6501_v48 = vpop.eup %6500  ;;  %v3286_v36 = vadd.f32 1.0, %v6499_v6  ;;  %6520 = vpow2.f32 %v3206_v17  ;;  %v3210_v8 = vmul.f32 1.442695, %v3103_v0  ;;  %v6045_v20 = vpack.c.bf16 %v3599_v23, %v3598_v29  ;;  %v8503_v17 = vpop.permute.xlu0 %3496 }
 0x61c   : > { %v6503_v14 = vpop.eup %6502  ;;  %v3289_v55 = vadd.f32 1.0, %v6501_v48  ;;  %6522 = vpow2.f32 %v3204_v34  ;;  %v3208_v60 = vmul.f32 1.442695, %v3102_v46  ;;  %v5789_v28 = vpop.f32.mrb[92].mxu1  ;;  %v9464_v59 = vpack.c.bf16 %v8427_v31, %v8434_v26 }
 0x61d   : > { %v6505_v40 = vpop.eup %6504  ;;  %6524 = vrcp.f32 %v3286_v36  ;;  %6046 = vmatprep.subr.bf16.mxu0 %v6045_v20  ;;  %v3105_v39 = vsub.f32 0.0, %v5789_v28  ;;  %v2961_v13 = vpop.f32.mrb[93].mxu1  ;;  %v3600_v49 = vmul.f32 %v6503_v14, %v8350_v4 }
 0x61e   : > { %v6507_v2 = vpop.eup %6506  ;;  %6526 = vrcp.f32 %v3289_v55  ;;  %6048 = vmatpush3.bf16.msra.mxu0 %v9463_v15  ;;  %v3104_v21 = vsub.f32 0.0, %v2961_v13  ;;  %v3603_v52 = vmul.f32 %v6505_v40, %v8356_v35 }
 0x61f   : > { %v6509_v42 = vpop.eup %6508  ;;  %v3288_v53 = vadd.f32 1.0, %v6507_v2  ;;  %6528 = vpow2.f32 %v3210_v8  ;;  %v3214_v54 = vmul.f32 1.442695, %v3105_v39  ;;  %v6049_v25 = vpack.c.bf16 %v3601_v57, %v3600_v49  ;;  %v8515_v8 = vpop.permute.xlu1 %3466 }
 0x620   : > { %v6511_v22 = vpop.eup %6510  ;;  %v3291_v4 = vadd.f32 1.0, %v6509_v42  ;;  %6530 = vpow2.f32 %v3208_v60  ;;  %v5792_v23 = vpop.f32.mrb[94].mxu1  ;;  %v3212_v43 = vmul.f32 1.442695, %v3104_v21  ;;  %v9465_v60 = vpack.c.bf16 %v8441_v18, %v8444_v3  ;;  %v6723_v18 = vld [vmem:[%s9304_s5] sm:$0xff] }
 0x621   : > { %v6513_v61 = vpop.eup %6512  ;;  %6532 = vrcp.f32 %v3288_v53  ;;  %6050 = vmatprep.subr.bf16.mxu0 %v6049_v25  ;;  %v3107_v63 = vsub.f32 0.0, %v5792_v23  ;;  %v2971_v11 = vpop.f32.mrb[95].mxu1  ;;  %v3602_v35 = vmul.f32 %v6511_v22, %v8358_v47 }
 0x622   : > { %v6515_v34 = vpop.eup %6514  ;;  %6534 = vrcp.f32 %v3291_v4  ;;  %v3290_v44 = vadd.f32 1.0, %v6513_v61  ;;  %6052 = vmatpush3.bf16.msra.mxu0 %v9464_v59  ;;  %v3106_v0 = vsub.f32 0.0, %v2971_v11  ;;  %v6725_v59 = vld [vmem:[%s9304_s5 + $0x20] sm:$0xff] }
 0x623   : > { %v6517_v37 = vpop.eup %6516  ;;  %6536 = vpow2.f32 %v3214_v54  ;;  %v3218_v29 = vmul.f32 1.442695, %v3107_v63  ;;  %v6053_v6 = vpack.c.bf16 %v3603_v52, %v3602_v35  ;;  %v8510_v58 = vmul.f32 %v6515_v34, %v8384_v50  ;;  %v8520_v50 = vpop.permute.xlu0 %3464 }
 0x624   : > { %v6519_v46 = vpop.eup %6518  ;;  %6538 = vrcp.f32 %v3290_v44  ;;  %v3216_v57 = vmul.f32 1.442695, %v3106_v0  ;;  %v5795_v48 = vpop.f32.mrb[96].mxu1  ;;  %v8513_v47 = vmul.f32 %v6517_v37, %v8389_v12 }
 0x625   : > { %v6521_v36 = vpop.eup %6520  ;;  %6540 = vpow2.f32 %v3212_v43  ;;  %6054 = vmatprep.subr.bf16.mxu0 %v6053_v6  ;;  %v3109_v31 = vsub.f32 0.0, %v5795_v48  ;;  %v2981_v26 = vpop.f32.mrb[97].mxu1  ;;  %v8518_v20 = vmul.f32 %v6519_v46, %v8414_v1 }
 0x626   : > { %v6523_v14 = vpop.eup %6522  ;;  %v3293_v55 = vadd.f32 1.0, %v6521_v36  ;;  %6542 = vpow2.f32 %v3218_v29  ;;  %6056 = vmatpush3.bf16.msra.mxu0 %v9465_v60  ;;  %v3108_v12 = vsub.f32 0.0, %v2981_v26  ;;  %v6059_v28 = vpack.c.bf16 %v8510_v58, %v8513_v47  ;;  %v8541_v23 = vpop.permute.xlu1 %3502 }
 0x627   : > { %v6525_v40 = vpop.eup %6524  ;;  %v3292_v39 = vadd.f32 1.0, %v6523_v14  ;;  %6544 = vpow2.f32 %v3216_v57  ;;  %v3222_v13 = vmul.f32 1.442695, %v3109_v31  ;;  %v8543_v63 = vpop.permute.xlu0 %3500 }
 0x628   : > { %v6527_v49 = vpop.eup %6526  ;;  %6546 = vrcp.f32 %v3293_v55  ;;  %v3220_v1 = vmul.f32 1.442695, %v3108_v12  ;;  %v5798_v2 = vpop.f32.mrb[98].mxu1  ;;  %v8528_v15 = vmul.f32 %v6525_v40, %v8419_v38  ;;  %v6724_v38 = vld [vmem:[%s9304_s5 + $0x28] sm:$0xff] }
 0x629   : > { %v6529_v21 = vpop.eup %6528  ;;  %6548 = vrcp.f32 %v3292_v39  ;;  %3701 = vmatmul.mubr.f32.vlgmr.msra.gmra.mrb[96].mxu0 %v6723_v18  ;;  %v3111_v3 = vsub.f32 0.0, %v5798_v2  ;;  %v2991_v52 = vpop.f32.mrb[99].mxu1  ;;  %v8534_v42 = vmul.f32 %v6527_v49, %v8446_v32 }
 0x62a   : > { %v6531_v53 = vpop.eup %6530  ;;  %v3295_v54 = vadd.f32 1.0, %v6529_v21  ;;  %6550 = vpow2.f32 %v3222_v13  ;;  %v3110_v25 = vsub.f32 0.0, %v2991_v52  ;;  %3705 = vmatprep.mubr.f32.mxu0 %v6724_v38  ;;  %v6063_v22 = vpack.c.bf16 %v8518_v20, %v8528_v15  ;;  %v8562_v40 = vpop.permute.xlu1 %3470  ;;  %v6727_v13 = vld [vmem:[%s9304_s5 + $0x40] sm:$0xff]  ;;  %v6728_v52 = vld [vmem:[%s9304_s5 + $0x68] sm:$0xff] }
 0x62b   : > { %v6533_v4 = vpop.eup %6532  ;;  %v3294_v61 = vadd.f32 1.0, %v6531_v53  ;;  %6552 = vpow2.f32 %v3220_v1  ;;  %v3226_v43 = vmul.f32 1.442695, %v3111_v3  ;;  %v8569_v21 = vpop.permute.xlu0 %3468 }
 0x62c   : > { %v6535_v32 = vpop.eup %6534  ;;  %6554 = vrcp.f32 %v3295_v54  ;;  %v3224_v11 = vmul.f32 1.442695, %v3110_v25  ;;  %v5801_v35 = vpop.f32.mrb[100].mxu1  ;;  %v8546_v34 = vmul.f32 %v6533_v4, %v8448_v51  ;;  %v6726_v51 = vld [vmem:[%s9304_s5 + $0x48] sm:$0xff] }
 0x62d   : > { %v6537_v44 = vpop.eup %6536  ;;  %6556 = vrcp.f32 %v3294_v61  ;;  %3706 = vmatmul.mubr.f32.gmra.mrb[98].mxu0 %v6725_v59  ;;  %v3113_v0 = vsub.f32 0.0, %v5801_v35  ;;  %v3001_v37 = vpop.f32.mrb[101].mxu1  ;;  %v8552_v29 = vmul.f32 %v6535_v32, %v8465_v24  ;;  %v6729_v35 = vld [vmem:[%s9304_s5 + $0x60] sm:$0xff] }
 0x62e   : > { %v6539_v6 = vpop.eup %6538  ;;  %v3297_v46 = vadd.f32 1.0, %v6537_v44  ;;  %6558 = vpow2.f32 %v3226_v43  ;;  %v3112_v57 = vsub.f32 0.0, %v3001_v37  ;;  %3710 = vmatprep.mubr.f32.mxu0 %v6726_v51  ;;  %v6067_v48 = vpack.c.bf16 %v8534_v42, %v8546_v34 }
 0x62f   : > { %v6541_v36 = vpop.eup %6540  ;;  %6560 = vpow2.f32 %v3224_v11  ;;  %v3230_v31 = vmul.f32 1.442695, %v3113_v0  ;;  %v8560_v26 = vmul.f32 %v6539_v6, %v8467_v19 }
 0x630   : > { %v6543_v24 = vpop.eup %6542  ;;  %6562 = vrcp.f32 %v3297_v46  ;;  %v3296_v14 = vadd.f32 1.0, %v6541_v36  ;;  %v3228_v55 = vmul.f32 1.442695, %v3112_v57  ;;  %v5804_v60 = vpop.f32.mrb[102].mxu1 }
 0x631   : > { %v6545_v12 = vpop.eup %6544  ;;  %v3299_v39 = vadd.f32 1.0, %v6543_v24  ;;  %6564 = vpow2.f32 %v3230_v31  ;;  %3711 = vmatmul.mubr.f32.gmra.mrb[100].mxu0 %v6727_v13  ;;  %v3115_v49 = vsub.f32 0.0, %v5804_v60  ;;  %v3011_v1 = vpop.f32.mrb[103].mxu1  ;;  %v6071_v19 = vpack.c.bf16 %v8552_v29, %v8560_v26  ;;  %v6731_v13 = vld [vmem:[%s9304_s5 + $0x80] sm:$0xff]  ;;  %v6748_v29 = vld [vmem:[%s9304_s5 + $0x1a8] sm:$0xff] }
 0x632   : > { %v6547_v2 = vpop.eup %6546  ;;  %6566 = vrcp.f32 %v3296_v14  ;;  %v3298_v18 = vadd.f32 1.0, %v6545_v12  ;;  %v3114_v3 = vsub.f32 0.0, %v3011_v1  ;;  %3715 = vmatprep.mubr.f32.mxu0 %v6728_v52  ;;  %v8588_v57 = vpop.permute.xlu1 %3506 }
 0x633   : > { %v6549_v53 = vpop.eup %6548  ;;  %6568 = vrcp.f32 %v3299_v39  ;;  %v3234_v54 = vmul.f32 1.442695, %v3115_v49  ;;  %v8575_v25 = vmul.f32 %v6547_v2, %v8487_v45  ;;  %v8593_v24 = vpop.permute.xlu0 %3504 }
 0x634   : > { %v6551_v38 = vpop.eup %6550  ;;  %6570 = vrcp.f32 %v3298_v18  ;;  %v5807_v4 = vpop.f32.mrb[104].mxu1  ;;  %v8578_v61 = vmul.f32 %v6549_v53, %v8490_v10  ;;  %v3232_v11 = vmul.f32 1.442695, %v3114_v3  ;;  %v6730_v10 = vld [vmem:[%s9304_s5 + $0x88] sm:$0xff] }
 0x635   : > { %v6553_v43 = vpop.eup %6552  ;;  %v3301_v32 = vadd.f32 1.0, %v6551_v38  ;;  %6572 = vpow2.f32 %v3228_v55  ;;  %3716 = vmatmul.mubr.f32.gmra.mrb[102].mxu0 %v6729_v35  ;;  %v3117_v44 = vsub.f32 0.0, %v5807_v4  ;;  %v3021_v59 = vpop.f32.mrb[105].mxu1 }
 0x636   : > { %v6555_v0 = vpop.eup %6554  ;;  %v3300_v45 = vadd.f32 1.0, %v6553_v43  ;;  %6574 = vpow2.f32 %v3234_v54  ;;  %v3116_v37 = vsub.f32 0.0, %v3021_v59  ;;  %3720 = vmatprep.mubr.f32.mxu0 %v6730_v10  ;;  %v6075_v6 = vpack.c.bf16 %v8575_v25, %v8578_v61  ;;  %v3475_v35 = vpop.permute.xlu1 %3474  ;;  %v6750_v25 = vld [vmem:[%s9304_s5 + $0x1c8] sm:$0xff] }
 0x637   : > { %v6557_v46 = vpop.eup %6556  ;;  %6576 = vrcp.f32 %v3301_v32  ;;  %v3238_v51 = vmul.f32 1.442695, %v3117_v44  ;;  %v8591_v36 = vmul.f32 %v6555_v0, %v8515_v8  ;;  %v6733_v44 = vld [vmem:[%s9304_s5 + $0xa0] sm:$0xff] }
 0x638   : > { %v6559_v31 = vpop.eup %6558  ;;  %6578 = vrcp.f32 %v3300_v45  ;;  %v5810_v14 = vpop.f32.mrb[106].mxu1  ;;  %v8596_v55 = vmul.f32 %v6557_v46, %v8520_v50  ;;  %v3236_v39 = vmul.f32 1.442695, %v3116_v37  ;;  %v6732_v50 = vld [vmem:[%s9304_s5 + $0xa8] sm:$0xff] }
 0x639   : > { %v6561_v60 = vpop.eup %6560  ;;  %v3303_v12 = vadd.f32 1.0, %v6559_v31  ;;  %6580 = vpow2.f32 %v3232_v11  ;;  %3721 = vmatmul.mubr.f32.gmra.mrb[104].mxu0 %v6731_v13  ;;  %v3119_v49 = vsub.f32 0.0, %v5810_v14  ;;  %v3031_v8 = vpop.f32.mrb[107].mxu1  ;;  %v6734_v46 = vld [vmem:[%s9304_s5 + $0xc8] sm:$0xff] }
 0x63a   : > { %v6563_v1 = vpop.eup %6562  ;;  %v3302_v2 = vadd.f32 1.0, %v6561_v60  ;;  %6582 = vpow2.f32 %v3238_v51  ;;  %v3118_v18 = vsub.f32 0.0, %v3031_v8  ;;  %3725 = vmatprep.mubr.f32.mxu0 %v6732_v50  ;;  %v6079_v3 = vpack.c.bf16 %v8591_v36, %v8596_v55  ;;  %v3473_v37 = vpop.permute.xlu0 %3472  ;;  %v6752_v36 = vld [vmem:[%s9304_s5 + $0x1e8] sm:$0xff] }
 0x63b   : > { %v6565_v52 = vpop.eup %6564  ;;  %6584 = vrcp.f32 %v3303_v12  ;;  %v3242_v53 = vmul.f32 1.442695, %v3119_v49  ;;  %v8607_v54 = vmul.f32 %v6563_v1, %v8562_v40 }
 0x63c   : > { %v6567_v38 = vpop.eup %6566  ;;  %6586 = vrcp.f32 %v3302_v2  ;;  %v3305_v4 = vadd.f32 1.0, %v6565_v52  ;;  %v3240_v43 = vmul.f32 1.442695, %v3118_v18  ;;  %v5813_v32 = vpop.f32.mrb[108].mxu1  ;;  %v6735_v2 = vld [vmem:[%s9304_s5 + $0xc0] sm:$0xff] }
 0x63d   : > { %v6569_v11 = vpop.eup %6568  ;;  %6588 = vpow2.f32 %v3236_v39  ;;  %3726 = vmatmul.mubr.f32.gmra.mrb[106].mxu0 %v6733_v44  ;;  %v3121_v59 = vsub.f32 0.0, %v5813_v32  ;;  %v3041_v0 = vpop.f32.mrb[109].mxu1  ;;  %v8613_v45 = vmul.f32 %v6567_v38, %v8569_v21 }
 0x63e   : > { %v6571_v40 = vpop.eup %6570  ;;  %6590 = vrcp.f32 %v3305_v4  ;;  %v3120_v10 = vsub.f32 0.0, %v3041_v0  ;;  %3730 = vmatprep.mubr.f32.mxu0 %v6734_v46  ;;  %v8618_v51 = vmul.f32 %v6569_v11, %v3475_v35  ;;  %v6736_v4 = vld [vmem:[%s9304_s5 + $0xe8] sm:$0xff] }
 0x63f   : > { %v6573_v31 = vpop.eup %6572  ;;  %6592 = vpow2.f32 %v3242_v53  ;;  %v3246_v14 = vmul.f32 1.442695, %v3121_v59  ;;  %v6083_v60 = vpack.c.bf16 %v8607_v54, %v8613_v45  ;;  %v8622_v12 = vmul.f32 %v6571_v40, %v3473_v37  ;;  %v6756_v54 = vld [vmem:[%s9304_s5 + $0x38] sm:$0xff]  ;;  %v6757_v45 = vld [vmem:[%s9304_s5 + $0x30] sm:$0xff] }
 0x640   : > { %v6575_v21 = vpop.eup %6574  ;;  %v3304_v39 = vadd.f32 1.0, %v6573_v31  ;;  %6594 = vpow2.f32 %v3240_v43  ;;  %v3244_v13 = vmul.f32 1.442695, %v3120_v10  ;;  %v5816_v49 = vpop.f32.mrb[110].mxu1  ;;  %v6737_v10 = vld [vmem:[%s9304_s5 + $0xe0] sm:$0xff] }
 0x641   : > { %v6577_v8 = vpop.eup %6576  ;;  %v3307_v1 = vadd.f32 1.0, %v6575_v21  ;;  %6596 = vpow2.f32 %v3246_v14  ;;  %3731 = vmatmul.mubr.f32.gmra.mrb[108].mxu0 %v6735_v2  ;;  %v3123_v18 = vsub.f32 0.0, %v5816_v49  ;;  %v3051_v50 = vpop.f32.mrb[111].mxu1  ;;  %v6087_v52 = vpack.c.bf16 %v8618_v51, %v8622_v12  ;;  %v6758_v51 = vld [vmem:[%s9304_s5 + $0x58] sm:$0xff] }
 0x642   : > { %v6579_v53 = vpop.eup %6578  ;;  %6598 = vrcp.f32 %v3304_v39  ;;  %v3122_v38 = vsub.f32 0.0, %v3051_v50  ;;  %3735 = vmatprep.mubr.f32.mxu0 %v6736_v4  ;;  %v3621_v43 = vmul.f32 %v6577_v8, %v8370_v9  ;;  %v6738_v9 = vld [vmem:[%s9304_s5 + $0x108] sm:$0xff]  ;;  %v6739_v8 = vld [vmem:[%s9304_s5 + $0x100] sm:$0xff]  ;;  %v6760_v12 = vld [vmem:[%s9304_s5 + $0x78] sm:$0xff] }
 0x643   : > { %v6581_v32 = vpop.eup %6580  ;;  %6600 = vrcp.f32 %v3307_v1  ;;  %v3250_v11 = vmul.f32 1.442695, %v3123_v18  ;;  %v3620_v35 = vmul.f32 %v6579_v53, %v8372_v7  ;;  %v9466_v4 = vld [vmem:[#allocation6_spill] sm:$0xff] }
 0x644   : > { %v6583_v44 = vpop.eup %6582  ;;  %v3306_v59 = vadd.f32 1.0, %v6581_v32  ;;  %6602 = vpow2.f32 %v3244_v13  ;;  %v3248_v0 = vmul.f32 1.442695, %v3122_v38  ;;  %v6741_v38 = vld [vmem:[%s9304_s5 + $0x120] sm:$0xff] }
 0x645   : > { %v6585_v40 = vpop.eup %6584  ;;  %v3309_v37 = vadd.f32 1.0, %v6583_v44  ;;  %6604 = vpow2.f32 %v3250_v11  ;;  %3736 = vmatmul.mubr.f32.gmra.mrb[110].mxu0 %v6737_v10  ;;  %v6057_v46 = vpack.c.bf16 %v3621_v43, %v3620_v35 }
 0x646   : > { %v6587_v31 = vpop.eup %6586  ;;  %6606 = vrcp.f32 %v3306_v59  ;;  %3740 = vmatprep.mubr.f32.mxu0 %v6738_v9  ;;  %v3623_v7 = vmul.f32 %v6585_v40, %v8399_v16 }
 0x647   : > { %v6589_v14 = vpop.eup %6588  ;;  %6608 = vrcp.f32 %v3309_v37  ;;  %6058 = vmatprep.subr.bf16.mxu0 %v6057_v46  ;;  %v3622_v21 = vmul.f32 %v6587_v31, %v8401_v5  ;;  %v6740_v5 = vld [vmem:[%s9304_s5 + $0x128] sm:$0xff] }
 0x648   : > { %v6591_v39 = vpop.eup %6590  ;;  %v3308_v13 = vadd.f32 1.0, %v6589_v14  ;;  %6610 = vpow2.f32 %v3248_v0  ;;  %6060 = vmatpush3.bf16.msra.mxu0 %v6059_v28  ;;  %v6743_v0 = vld [vmem:[%s9304_s5 + $0x140] sm:$0xff] }
 0x649   : > { %v6593_v49 = vpop.eup %6592  ;;  %3741 = vmatmul.mubr.f32.gmra.mrb[112].mxu0 %v6739_v8  ;;  %v6061_v1 = vpack.c.bf16 %v3623_v7, %v3622_v21  ;;  %v3625_v58 = vmul.f32 %v6591_v39, %v8431_v41  ;;  %v6742_v41 = vld [vmem:[%s9304_s5 + $0x148] sm:$0xff]  ;;  %v6751_v8 = vld [vmem:[%s9304_s5 + $0x1c0] sm:$0xff] }
 0x64a   : > { %v6595_v16 = vpop.eup %6594  ;;  %6612 = vrcp.f32 %v3308_v13  ;;  %v3311_v2 = vadd.f32 1.0, %v6593_v49  ;;  %3745 = vmatprep.mubr.f32.mxu0 %v6740_v5  ;;  %v6749_v49 = vld [vmem:[%s9304_s5 + $0x1a0] sm:$0xff]  ;;  %v6765_v5 = vld [vmem:[%s9304_s5 + $0xb0] sm:$0xff] }
 0x64b   : > { %v6597_v18 = vpop.eup %6596  ;;  %v3310_v50 = vadd.f32 1.0, %v6595_v16  ;;  %6062 = vmatprep.subr.bf16.mxu0 %v6061_v1  ;;  %v6762_v1 = vld [vmem:[%s9304_s5 + $0x98] sm:$0xff]  ;;  %v6763_v16 = vld [vmem:[%s9304_s5 + $0x90] sm:$0xff] }
 0x64c   : > { %v6599_v47 = vpop.eup %6598  ;;  %6614 = vrcp.f32 %v3311_v2  ;;  %v3313_v28 = vadd.f32 1.0, %v6597_v18  ;;  %6064 = vmatpush3.bf16.msra.mxu0 %v6063_v22  ;;  %v6764_v2 = vld [vmem:[%s9304_s5 + $0xb8] sm:$0xff] }
 0x64d   : > { %v6601_v53 = vpop.eup %6600  ;;  %6616 = vrcp.f32 %v3310_v50  ;;  %3746 = vmatmul.mubr.f32.gmra.mrb[114].mxu0 %v6741_v38  ;;  %v3624_v43 = vmul.f32 %v6599_v47, %v9466_v4  ;;  %v6766_v18 = vld [vmem:[%s9304_s5 + $0xd8] sm:$0xff]  ;;  %v6767_v50 = vld [vmem:[%s9304_s5 + $0xd0] sm:$0xff] }
 0x64e   : > { %v6603_v32 = vpop.eup %6602  ;;  %6618 = vrcp.f32 %v3313_v28  ;;  %3750 = vmatprep.mubr.f32.mxu0 %v6742_v41  ;;  %v3627_v15 = vmul.f32 %v6601_v53, %v8454_v33  ;;  %v6744_v33 = vld [vmem:[%s9304_s5 + $0x168] sm:$0xff]  ;;  %v6769_v47 = vld [vmem:[%s9304_s5 + $0xf0] sm:$0xff]  ;;  %v6770_v28 = vld [vmem:[%s9304_s5 + $0x118] sm:$0xff] }
 0x64f   : > { %v6605_v11 = vpop.eup %6604  ;;  %v3312_v35 = vadd.f32 1.0, %v6603_v32  ;;  %v6065_v20 = vpack.c.bf16 %v3625_v58, %v3624_v43  ;;  %v6768_v58 = vld [vmem:[%s9304_s5 + $0xf8] sm:$0xff]  ;;  %v6771_v53 = vld [vmem:[%s9304_s5 + $0x110] sm:$0xff] }
 0x650   : > { %v6607_v22 = vpop.eup %6606  ;;  %v3315_v44 = vadd.f32 1.0, %v6605_v11  ;;  %v6772_v38 = vld [vmem:[%s9304_s5 + $0x138] sm:$0xff]  ;;  %v6773_v4 = vld [vmem:[%s9304_s5 + $0x130] sm:$0xff] }
 0x651   : > { %v6609_v59 = vpop.eup %6608  ;;  %6620 = vrcp.f32 %v3312_v35  ;;  %3751 = vmatmul.mubr.f32.gmra.mrb[116].mxu0 %v6743_v0  ;;  %6066 = vmatprep.subr.bf16.mxu0 %v6065_v20  ;;  %v3626_v40 = vmul.f32 %v6607_v22, %v8457_v30  ;;  %v6745_v30 = vld [vmem:[%s9304_s5 + $0x160] sm:$0xff]  ;;  %v6774_v43 = vld [vmem:[%s9304_s5 + $0x158] sm:$0xff]  ;;  %v6775_v32 = vld [vmem:[%s9304_s5 + $0x150] sm:$0xff] }
 0x652   : > { %v6611_v37 = vpop.eup %6610  ;;  %6622 = vrcp.f32 %v3315_v44  ;;  %6068 = vmatpush3.bf16.msra.mxu0 %v6067_v48  ;;  %3755 = vmatprep.mubr.f32.mxu0 %v6744_v33  ;;  %v3629_v31 = vmul.f32 %v6609_v59, %v8478_v62  ;;  %v6746_v48 = vld [vmem:[%s9304_s5 + $0x188] sm:$0xff]  ;;  %v6776_v41 = vld [vmem:[%s9304_s5 + $0x178] sm:$0xff]  ;;  %v6777_v11 = vld [vmem:[%s9304_s5 + $0x170] sm:$0xff] }
 0x653   : > { %v3314_v10 = vadd.f32 1.0, %v6611_v37  ;;  %v6069_v46 = vpack.c.bf16 %v3627_v15, %v3626_v40  ;;  %v6778_v35 = vld [vmem:[%s9304_s5 + $0x198] sm:$0xff]  ;;  %v6779_v20 = vld [vmem:[%s9304_s5 + $0x190] sm:$0xff] }
 0x654   : > { %v6613_v9 = vpop.eup %6612  ;;  %v6780_v15 = vld [vmem:[%s9304_s5 + $0x1b8] sm:$0xff]  ;;  %v6781_v22 = vld [vmem:[%s9304_s5 + $0x1b0] sm:$0xff] }
 0x655   : > { %6624 = vrcp.f32 %v3314_v10  ;;  %3756 = vmatmul.mubr.f32.gmra.mrb[118].mxu0 %v6745_v30  ;;  %6070 = vmatprep.subr.bf16.mxu0 %v6069_v46  ;;  %v3628_v42 = vmul.f32 %v6613_v9, %v8481_v27  ;;  %v6747_v27 = vld [vmem:[%s9304_s5 + $0x180] sm:$0xff]  ;;  %v6782_v44 = vld [vmem:[%s9304_s5 + $0x1d8] sm:$0xff]  ;;  %v6783_v59 = vld [vmem:[%s9304_s5 + $0x1d0] sm:$0xff] }
 0x656   : > { %v6615_v34 = vpop.eup %6614  ;;  %6072 = vmatpush3.bf16.msra.mxu0 %v6071_v19  ;;  %3760 = vmatprep.mubr.f32.mxu0 %v6746_v48  ;;  %v6784_v0 = vld [vmem:[%s9304_s5 + $0x1f8] sm:$0xff]  ;;  %v6785_v40 = vld [vmem:[%s9304_s5 + $0x1f0] sm:$0xff] }
 0x657   : > { %v6617_v62 = vpop.eup %6616  ;;  %v6073_v7 = vpack.c.bf16 %v3629_v31, %v3628_v42  ;;  %v3631_v14 = vmul.f32 %v6615_v34, %v8501_v56 }
 0x658   : > { %v6619_v21 = vpop.eup %6618  ;;  %v3630_v39 = vmul.f32 %v6617_v62, %v8503_v17 }
 0x659   : > { %3761 = vmatmul.mubr.f32.gmra.mrb[120].mxu0 %v6747_v27  ;;  %6074 = vmatprep.subr.bf16.mxu0 %v6073_v7  ;;  %v3633_v56 = vmul.f32 %v6619_v21, %v8541_v23 }
 0x65a   : > { %6076 = vmatpush3.bf16.msra.mxu0 %v6075_v6  ;;  %3765 = vmatprep.mubr.f32.mxu0 %v6748_v29  ;;  %v6077_v26 = vpack.c.bf16 %v3631_v14, %v3630_v39 }
 0x65b   : > { %v6621_v19 = vpop.eup %6620 }
 0x65c   : > { %v6623_v17 = vpop.eup %6622  ;;  %6078 = vmatprep.subr.bf16.mxu0 %v6077_v26  ;;  %v3632_v13 = vmul.f32 %v6621_v19, %v8543_v63 }
 0x65d   : > { %3766 = vmatmul.mubr.f32.gmra.mrb[122].mxu0 %v6749_v49  ;;  %v3635_v61 = vmul.f32 %v6623_v17, %v8588_v57  ;;  %v6753_v57 = vld [vmem:[%s9304_s5 + $0x1e0] sm:$0xff] }
 0x65e   : > { %6080 = vmatpush3.bf16.msra.mxu0 %v6079_v3  ;;  %3770 = vmatprep.mubr.f32.mxu0 %v6750_v25  ;;  %v6081_v23 = vpack.c.bf16 %v3633_v56, %v3632_v13  ;;  %v6755_v3 = vld [vmem:[%s9304_s5 + $0x10] sm:$0xff] }
 0x65f   : > { %v6625_v6 = vpop.eup %6624 }
 0x660   : > { %6082 = vmatprep.subr.bf16.mxu0 %v6081_v23  ;;  %v3634_v63 = vmul.f32 %v6625_v6, %v8593_v24  ;;  %v6754_v24 = vld [vmem:[%s9304_s5 + $0x18] sm:$0xff] }
 0x661   : > { %3771 = vmatmul.mubr.f32.gmra.mrb[124].mxu0 %v6751_v8  ;;  %v9467_v23 = vld [vmem:[#allocation36_spill] sm:$0xff] }
 0x662   : > { %6084 = vmatpush3.bf16.msra.mxu0 %v6083_v60  ;;  %3775 = vmatprep.mubr.f32.mxu0 %v6752_v36  ;;  %v6085_v55 = vpack.c.bf16 %v3635_v61, %v3634_v63  ;;  %v6759_v60 = vld [vmem:[%s9304_s5 + $0x50] sm:$0xff]  ;;  %v1870_v61 = vsub.f32 0.0, %v9467_v23 }
 0x663   : > { %v9468_v36 = vld [vmem:[#allocation27_spill] sm:$0xff] }
 0x664   : > { %6086 = vmatprep.subr.bf16.mxu0 %v6085_v55  ;;  %v1871_v55 = vsub.f32 0.0, %v9468_v36 }
 0x665   : > { %3776 = vmatmul.mubr.f32.gmra.mrb[126].mxu0 %v6753_v57  ;;  %v1886_v57 = vmul.f32 1.442695, %v1870_v61 }
 0x666   : > { %6088 = vmatpush3.bf16.msra.mxu0 %v6087_v52  ;;  %3845 = vmatprep.mubr.f32.mxu0 %v6754_v24  ;;  %v6761_v52 = vld [vmem:[%s9304_s5 + $0x70] sm:$0xff] }
 0x667   : > { %6626 = vpow2.f32 %v1886_v57 }
 0x669   : > { %3846 = vmatmul.mubr.f32.vlgmr.msra.gmra.mrb[128].mxu0 %v6755_v3 }
 0x66a   : > { %3850 = vmatprep.mubr.f32.mxu0 %v6756_v54 }
 0x66d   : > { %3851 = vmatmul.mubr.f32.gmra.mrb[130].mxu0 %v6757_v45  ;;  %v1888_v45 = vmul.f32 1.442695, %v1871_v55 }
 0x66e   : > { %3855 = vmatprep.mubr.f32.mxu0 %v6758_v51  ;;  %v9469_v51 = vld [vmem:[#allocation38_spill] sm:$0xff] }
 0x66f   : > { %6628 = vpow2.f32 %v1888_v45 }
 0x671   : > { %3856 = vmatmul.mubr.f32.gmra.mrb[132].mxu0 %v6759_v60  ;;  %v1872_v60 = vsub.f32 0.0, %v9469_v51 }
 0x672   : > { %3860 = vmatprep.mubr.f32.mxu0 %v6760_v12 }
 0x675   : > { %3861 = vmatmul.mubr.f32.gmra.mrb[134].mxu0 %v6761_v52 }
 0x676   : > { %3865 = vmatprep.mubr.f32.mxu0 %v6762_v1 }
 0x679   : > { %3866 = vmatmul.mubr.f32.gmra.mrb[136].mxu0 %v6763_v16  ;;  %v9470_v16 = vld [vmem:[#allocation37_spill] sm:$0xff] }
 0x67a   : > { %3870 = vmatprep.mubr.f32.mxu0 %v6764_v2  ;;  %v1873_v2 = vsub.f32 0.0, %v9470_v16 }
 0x67d   : > { %3871 = vmatmul.mubr.f32.gmra.mrb[138].mxu0 %v6765_v5  ;;  %v1890_v5 = vmul.f32 1.442695, %v1872_v60 }
 0x67e   : > { %3875 = vmatprep.mubr.f32.mxu0 %v6766_v18 }
 0x67f   : > { %6630 = vpow2.f32 %v1890_v5 }
 0x681   : > { %3876 = vmatmul.mubr.f32.gmra.mrb[140].mxu0 %v6767_v50 }
 0x682   : > { %3880 = vmatprep.mubr.f32.mxu0 %v6768_v58 }
 0x685   : > { %3881 = vmatmul.mubr.f32.gmra.mrb[142].mxu0 %v6769_v47  ;;  %v1892_v47 = vmul.f32 1.442695, %v1873_v2  ;;  %v3945_v2 = vpop.permute.xlu1 %3944 }
 0x686   : > { %3885 = vmatprep.mubr.f32.mxu0 %v6770_v28  ;;  %v9471_v28 = vld [vmem:[#allocation40_spill] sm:$0xff] }
 0x687   : > { %6632 = vpow2.f32 %v1892_v47 }
 0x689   : > { %3886 = vmatmul.mubr.f32.gmra.mrb[144].mxu0 %v6771_v53  ;;  %v1874_v53 = vsub.f32 0.0, %v9471_v28 }
 0x68a   : > { %3890 = vmatprep.mubr.f32.mxu0 %v6772_v38 }
 0x68d   : > { %3891 = vmatmul.mubr.f32.gmra.mrb[146].mxu0 %v6773_v4 }
 0x68e   : > { %3895 = vmatprep.mubr.f32.mxu0 %v6774_v43  ;;  %v6627_v43 = vpop.eup %6626 }
 0x691   : > { %3896 = vmatmul.mubr.f32.gmra.mrb[148].mxu0 %v6775_v32 }
 0x692   : > { %3900 = vmatprep.mubr.f32.mxu0 %v6776_v41  ;;  %v9472_v41 = vld [vmem:[#allocation39_spill] sm:$0xff] }
 0x695   : > { %3901 = vmatmul.mubr.f32.gmra.mrb[150].mxu0 %v6777_v11  ;;  %v1875_v11 = vsub.f32 0.0, %v9472_v41 }
 0x696   : > { %3905 = vmatprep.mubr.f32.mxu0 %v6778_v35  ;;  %v1894_v35 = vmul.f32 1.442695, %v1874_v53 }
 0x698   : > { %6634 = vpow2.f32 %v1894_v35 }
 0x699   : > { %3906 = vmatmul.mubr.f32.gmra.mrb[152].mxu0 %v6779_v20 }
 0x69a   : > { %3910 = vmatprep.mubr.f32.mxu0 %v6780_v15  ;;  %v1918_v15 = vadd.f32 1.0, %v6627_v43 }
 0x69c   : > { %6636 = vrcp.f32 %v1918_v15 }
 0x69d   : > { %3911 = vmatmul.mubr.f32.gmra.mrb[154].mxu0 %v6781_v22 }
 0x69e   : > { %3915 = vmatprep.mubr.f32.mxu0 %v6782_v44  ;;  %v6629_v44 = vpop.eup %6628 }
 0x6a1   : > { %3916 = vmatmul.mubr.f32.gmra.mrb[156].mxu0 %v6783_v59 }
 0x6a2   : > { %3920 = vmatprep.mubr.f32.mxu0 %v6784_v0  ;;  %v1896_v0 = vmul.f32 1.442695, %v1875_v11 }
 0x6a4   : > { %6638 = vpow2.f32 %v1896_v0 }
 0x6a5   : > { %3921 = vmatmul.mubr.f32.gmra.mrb[158].mxu0 %v6785_v40  ;;  %v9473_v40 = vld [vmem:[#allocation42_spill] sm:$0xff] }
 0x6fc   : > { %v5257_v37 = vpop.f32.mrb[96].mxu0 }
 0x6fd   : > { %v5258_v33 = vpop.f32.mrb[97].mxu0 }
 0x6fe   : > { %v8819_v10 = vadd.f32 %v5258_v33, %v5257_v37  ;;  %v1876_v37 = vsub.f32 0.0, %v9473_v40  ;;  %v9478_v40 = vld [vmem:[#allocation45_spill] sm:$0xff] }
 0x700   : > { %v5260_v46 = vpop.f32.mrb[98].mxu0 }
 0x701   : > { %v5261_v31 = vpop.f32.mrb[99].mxu0 }
 0x702   : > { %v8821_v9 = vadd.f32 %v5261_v31, %v5260_v46  ;;  %v1919_v46 = vadd.f32 1.0, %v6629_v44 }
 0x704   : > { %v5263_v30 = vpop.f32.mrb[100].mxu0  ;;  %6640 = vrcp.f32 %v1919_v46 }
 0x705   : > { %v5264_v42 = vpop.f32.mrb[101].mxu0 }
 0x706   : > { %v8823_v34 = vadd.f32 %v5264_v42, %v5263_v30  ;;  %v6631_v30 = vpop.eup %6630 }
 0x708   : > { %v5266_v48 = vpop.f32.mrb[102].mxu0 }
 0x709   : > { %v5267_v62 = vpop.f32.mrb[103].mxu0 }
 0x70a   : > { %v8825_v7 = vadd.f32 %v5267_v62, %v5266_v48  ;;  %v9474_v48 = vld [vmem:[#allocation41_spill] sm:$0xff] }
 0x70b   : > { %v1877_v62 = vsub.f32 0.0, %v9474_v48 }
 0x70c   : > { %v5269_v14 = vpop.f32.mrb[104].mxu0 }
 0x70d   : > { %v5270_v21 = vpop.f32.mrb[105].mxu0  ;;  %v1900_v23 = vmul.f32 1.442695, %v1877_v62  ;;  %v3949_v62 = vpop.permute.xlu1 %3948 }
 0x70e   : > { %v8827_v39 = vadd.f32 %v5270_v21, %v5269_v14  ;;  %v1898_v14 = vmul.f32 1.442695, %v1876_v37  ;;  %v1881_v37 = vsub.f32 0.0, %v9478_v40 }
 0x710   : > { %v5272_v27 = vpop.f32.mrb[106].mxu0  ;;  %6642 = vpow2.f32 %v1898_v14 }
 0x711   : > { %v5273_v29 = vpop.f32.mrb[107].mxu0 }
 0x712   : > { %v8829_v26 = vadd.f32 %v5273_v29, %v5272_v27  ;;  %v1920_v27 = vadd.f32 1.0, %v6631_v30 }
 0x714   : > { %v5275_v56 = vpop.f32.mrb[108].mxu0  ;;  %6644 = vrcp.f32 %v1920_v27 }
 0x715   : > { %v5276_v19 = vpop.f32.mrb[109].mxu0  ;;  %6646 = vpow2.f32 %v1900_v23 }
 0x716   : > { %v8831_v17 = vadd.f32 %v5276_v19, %v5275_v56  ;;  %v6633_v56 = vpop.eup %6632 }
 0x717   : > { %v6635_v55 = vpop.eup %6634 }
 0x718   : > { %v5278_v13 = vpop.f32.mrb[110].mxu0  ;;  %v1922_v16 = vadd.f32 1.0, %v6635_v55 }
 0x719   : > { %v5279_v49 = vpop.f32.mrb[111].mxu0 }
 0x71a   : > { %v8833_v25 = vadd.f32 %v5279_v49, %v5278_v13  ;;  %v9475_v13 = vld [vmem:[#allocation44_spill] sm:$0xff] }
 0x71b   : > { %v1878_v49 = vsub.f32 0.0, %v9475_v13  ;;  %v1908_v13 = vmul.f32 1.442695, %v1881_v37 }
 0x71c   : > { %v5281_v6 = vpop.f32.mrb[112].mxu0 }
 0x71d   : > { %v5282_v63 = vpop.f32.mrb[113].mxu0  ;;  %v1902_v51 = vmul.f32 1.442695, %v1878_v49  ;;  %v9479_v49 = vld [vmem:[#allocation48_spill] sm:$0xff] }
 0x71e   : > { %v8836_v8 = vadd.f32 %v5282_v63, %v5281_v6  ;;  %v1921_v6 = vadd.f32 1.0, %v6633_v56  ;;  %v3943_v63 = vpop.permute.xlu0 %3942  ;;  %v1882_v23 = vsub.f32 0.0, %v9479_v49 }
 0x720   : > { %v5284_v24 = vpop.f32.mrb[114].mxu0  ;;  %6648 = vrcp.f32 %v1921_v6 }
 0x721   : > { %v5285_v3 = vpop.f32.mrb[115].mxu0  ;;  %6650 = vpow2.f32 %v1902_v51 }
 0x722   : > { %v8839_v54 = vadd.f32 %v5285_v3, %v5284_v24  ;;  %v8860_v24 = vpop.eup %6636  ;;  %v9476_v3 = vld [vmem:[#allocation43_spill] sm:$0xff]  ;;  %v3947_v35 = vpop.permute.xlu0 %3946 }
 0x723   : > { %v1879_v45 = vsub.f32 0.0, %v9476_v3  ;;  %v3990_v60 = vmul.f32 %v8860_v24, %v3943_v63 }
 0x724   : > { %v5287_v12 = vpop.f32.mrb[116].mxu0 }
 0x725   : > { %v5288_v52 = vpop.f32.mrb[117].mxu0  ;;  %v1904_v53 = vmul.f32 1.442695, %v1879_v45 }
 0x726   : > { %v8842_v1 = vadd.f32 %v5288_v52, %v5287_v12  ;;  %v3951_v55 = vpop.permute.xlu0 %3950 }
 0x728   : > { %v5290_v18 = vpop.f32.mrb[118].mxu0 }
 0x729   : > { %v5291_v50 = vpop.f32.mrb[119].mxu0 }
 0x72a   : > { %v8845_v58 = vadd.f32 %v5291_v50, %v5290_v18  ;;  %v6639_v18 = vpop.eup %6638 }
 0x72b   : > { %v8867_v28 = vpop.eup %6640  ;;  %v1923_v11 = vadd.f32 1.0, %v6639_v18 }
 0x72c   : > { %v5293_v38 = vpop.f32.mrb[120].mxu0  ;;  %v3991_v43 = vmul.f32 %v8867_v28, %v3945_v2  ;;  %v6643_v15 = vpop.eup %6642 }
 0x72d   : > { %v5294_v4 = vpop.f32.mrb[121].mxu0  ;;  %v8875_v0 = vpop.eup %6644  ;;  %v1924_v48 = vadd.f32 1.0, %v6643_v15 }
 0x72e   : > { %v8848_v32 = vadd.f32 %v5294_v4, %v5293_v38  ;;  %v9477_v38 = vld [vmem:[#allocation46_spill] sm:$0xff]  ;;  %v3992_v46 = vmul.f32 %v8875_v0, %v3947_v35 }
 0x72f   : > { %v1880_v4 = vsub.f32 0.0, %v9477_v38  ;;  %v3953_v38 = vpop.permute.xlu1 %3952 }
 0x730   : > { %v5296_v20 = vpop.f32.mrb[122].mxu0 }
 0x731   : > { %v5297_v22 = vpop.f32.mrb[123].mxu0 }
 0x732   : > { %v8851_v59 = vadd.f32 %v5297_v22, %v5296_v20 }
 0x734   : > { %v5299_v33 = vpop.f32.mrb[124].mxu0 }
 0x735   : > { %v5300_v31 = vpop.f32.mrb[125].mxu0 }
 0x736   : > { %v8854_v42 = vadd.f32 %v5300_v31, %v5299_v33  ;;  %v1906_v33 = vmul.f32 1.442695, %v1880_v4 }
 0x738   : > { %v5302_v21 = vpop.f32.mrb[126].mxu0 }
 0x739   : > { %v5303_v29 = vpop.f32.mrb[127].mxu0 }
 0x73a   : > { %v8857_v19 = vadd.f32 %v5303_v29, %v5302_v21  ;;  %v6647_v21 = vpop.eup %6646 }
 0x73b   : > { %v8885_v56 = vpop.eup %6648 }
 0x73c   : > { %v5337_v61 = vpop.f32.mrb[128].mxu0  ;;  %v6651_v63 = vpop.eup %6650 }
 0x73d   : > { %v5338_v36 = vpop.f32.mrb[129].mxu0 }
 0x73e   : > { %v5339_v57 = vadd.f32 %v5338_v36, %v5337_v61  ;;  %v3993_v61 = vmul.f32 %v8885_v56, %v3949_v62  ;;  %v1925_v36 = vadd.f32 1.0, %v6647_v21  ;;  %v9482_v21 = vld [vmem:[#allocation49_spill] sm:$0xff] }
 0x740   : > { %v3848_v12 = vadd.f32 %v5339_v57, %v8819_v10  ;;  %v5340_v52 = vpop.f32.mrb[130].mxu0 }
 0x741   : > { %v5341_v5 = vpop.f32.mrb[131].mxu0 }
 0x742   : > { %v8865_v50 = vadd.f32 %v3990_v60, %v3848_v12  ;;  %v5342_v47 = vadd.f32 %v5341_v5, %v5340_v52  ;;  %v9480_v12 = vld [vmem:[#allocation47_spill] sm:$0xff] }
 0x743   : > { %v1883_v52 = vsub.f32 0.0, %v9480_v12 }
 0x744   : > { %6652 = vtanh.f32 %v8865_v50  ;;  %v3853_v10 = vadd.f32 %v5342_v47, %v8821_v9  ;;  %v5343_v41 = vpop.f32.mrb[132].mxu0 }
 0x745   : > { %6654 = vrcp.f32 %v1922_v16  ;;  %v5344_v20 = vpop.f32.mrb[133].mxu0  ;;  %v1910_v16 = vmul.f32 1.442695, %v1882_v23  ;;  %v1912_v35 = vmul.f32 1.442695, %v1883_v52 }
 0x746   : > { %v8873_v22 = vadd.f32 %v3991_v43, %v3853_v10  ;;  %v5345_v44 = vadd.f32 %v5344_v20, %v5343_v41  ;;  %6656 = vpow2.f32 %v1904_v53  ;;  %v1926_v53 = vadd.f32 1.0, %v6651_v63  ;;  %v9481_v20 = vld [vmem:[#allocation50_spill] sm:$0xff]  ;;  %v3957_v63 = vpop.permute.xlu1 %3956 }
 0x747   : > { %v1884_v15 = vsub.f32 0.0, %v9481_v20 }
 0x748   : > { %6658 = vtanh.f32 %v8873_v22  ;;  %v6258_v9 = vpack.i.bf16 %v8873_v22, %v8865_v50  ;;  %v3858_v31 = vadd.f32 %v5345_v44, %v8823_v34  ;;  %v5346_v30 = vpop.f32.mrb[134].mxu0 }
 0x749   : > { %6660 = vrcp.f32 %v1923_v11  ;;  %v5347_v14 = vpop.f32.mrb[135].mxu0 }
 0x74a   : > { %v8883_v27 = vadd.f32 %v3992_v46, %v3858_v31  ;;  %v5348_v29 = vadd.f32 %v5347_v14, %v5346_v30  ;;  %6662 = vpow2.f32 %v1906_v33  ;;  %v3955_v46 = vpop.permute.xlu0 %3954 }
 0x74c   : > { %6664 = vtanh.f32 %v8883_v27  ;;  %v3863_v34 = vadd.f32 %v5348_v29, %v8825_v7  ;;  %v5349_v6 = vpop.f32.mrb[136].mxu0  ;;  %v1885_v29 = vsub.f32 0.0, %v9482_v21 }
 0x74d   : > { %6666 = vrcp.f32 %v1924_v48  ;;  %v5350_v57 = vpop.f32.mrb[137].mxu0 }
 0x74e   : > { %v6653_v3 = vpop.eup %6652  ;;  %v8891_v45 = vadd.f32 %v3993_v61, %v3863_v34  ;;  %v5351_v51 = vadd.f32 %v5350_v57, %v5349_v6  ;;  %6668 = vpow2.f32 %v1908_v13  ;;  %v1914_v13 = vmul.f32 1.442695, %v1884_v15 }
 0x74f   : > { %v8893_v60 = vpop.eup %6654  ;;  %4054 = vrot.lane.b32.xlu0 %v6653_v3, %s6830_s21  ;;  %v1916_v12 = vmul.f32 1.442695, %v1885_v29 }
 0x750   : > { %v3994_v7 = vmul.f32 %v8893_v60, %v3951_v55  ;;  %6670 = vtanh.f32 %v8891_v45  ;;  %v6263_v2 = vpack.i.bf16 %v8891_v45, %v8883_v27  ;;  %v3868_v5 = vadd.f32 %v5351_v51, %v8827_v39  ;;  %v5352_v18 = vpop.f32.mrb[138].mxu0  ;;  %v6657_v47 = vpop.eup %6656 }
 0x751   : > { %6672 = vrcp.f32 %v1925_v36  ;;  %v5353_v4 = vpop.f32.mrb[139].mxu0  ;;  %v1927_v33 = vadd.f32 1.0, %v6657_v47 }
 0x752   : > { %v6659_v43 = vpop.eup %6658  ;;  %v8902_v10 = vadd.f32 %v3994_v7, %v3868_v5  ;;  %v5354_v41 = vadd.f32 %v5353_v4, %v5352_v18  ;;  %6674 = vpow2.f32 %v1910_v16  ;;  %v3959_v18 = vpop.permute.xlu0 %3958 }
 0x753   : > { %v8904_v11 = vpop.eup %6660  ;;  %4056 = vrot.lane.b32.xlu1 %v6659_v43, %s6830_s21 }
 0x754   : > { %v3995_v39 = vmul.f32 %v8904_v11, %v3953_v38  ;;  %6676 = vtanh.f32 %v8902_v10  ;;  %v3873_v44 = vadd.f32 %v5354_v41, %v8829_v26  ;;  %v5355_v40 = vpop.f32.mrb[140].mxu0  ;;  %v6663_v37 = vpop.eup %6662 }
 0x755   : > { %6678 = vrcp.f32 %v1926_v53  ;;  %v5356_v31 = vpop.f32.mrb[141].mxu0  ;;  %v1928_v6 = vadd.f32 1.0, %v6663_v37 }
 0x756   : > { %v6665_v30 = vpop.eup %6664  ;;  %v8911_v48 = vadd.f32 %v3995_v39, %v3873_v44  ;;  %v5357_v62 = vadd.f32 %v5356_v31, %v5355_v40  ;;  %6680 = vpow2.f32 %v1912_v35  ;;  %v3961_v44 = vpop.permute.xlu1 %3960 }
 0x757   : > { %v8913_v14 = vpop.eup %6666  ;;  %4058 = vrot.lane.b32.xlu0 %v6665_v30, %s6830_s21 }
 0x758   : > { %v3996_v26 = vmul.f32 %v8913_v14, %v3955_v46  ;;  %6682 = vtanh.f32 %v8911_v48  ;;  %v6268_v49 = vpack.i.bf16 %v8911_v48, %v8902_v10  ;;  %v3878_v23 = vadd.f32 %v5357_v62, %v8831_v17  ;;  %v5358_v61 = vpop.f32.mrb[142].mxu0  ;;  %v6669_v34 = vpop.eup %6668 }
 0x759   : > { %6684 = vrcp.f32 %v1927_v33  ;;  %v5359_v36 = vpop.f32.mrb[143].mxu0  ;;  %v1929_v5 = vadd.f32 1.0, %v6669_v34 }
 0x75a   : > { %v6671_v55 = vpop.eup %6670  ;;  %v8922_v57 = vadd.f32 %v3996_v26, %v3878_v23  ;;  %v5360_v3 = vadd.f32 %v5359_v36, %v5358_v61  ;;  %6686 = vpow2.f32 %v1914_v13  ;;  %v3963_v13 = vpop.permute.xlu0 %3962 }
 0x75b   : > { %v8924_v51 = vpop.eup %6672  ;;  %4060 = vrot.lane.b32.xlu1 %v6671_v55, %s6830_s21 }
 0x75c   : > { %v3997_v52 = vmul.f32 %v8924_v51, %v3957_v63  ;;  %6688 = vtanh.f32 %v8922_v57  ;;  %v3883_v17 = vadd.f32 %v5360_v3, %v8833_v25  ;;  %v5361_v16 = vpop.f32.mrb[144].mxu0  ;;  %v6675_v7 = vpop.eup %6674 }
 0x75d   : > { %6690 = vrcp.f32 %v1928_v6  ;;  %v5362_v47 = vpop.f32.mrb[145].mxu0  ;;  %v1930_v39 = vadd.f32 1.0, %v6675_v7 }
 0x75e   : > { %v6677_v53 = vpop.eup %6676  ;;  %v8930_v38 = vadd.f32 %v3997_v52, %v3883_v17  ;;  %v5363_v4 = vadd.f32 %v5362_v47, %v5361_v16  ;;  %6692 = vpow2.f32 %v1916_v12  ;;  %v3965_v52 = vpop.permute.xlu1 %3964 }
 0x75f   : > { %v8932_v43 = vpop.eup %6678  ;;  %4062 = vrot.lane.b32.xlu0 %v6677_v53, %s6830_s21 }
 0x760   : > { %v3998_v41 = vmul.f32 %v8932_v43, %v3959_v18  ;;  %6694 = vtanh.f32 %v8930_v38  ;;  %v6273_v25 = vpack.i.bf16 %v8930_v38, %v8922_v57  ;;  %v3888_v35 = vadd.f32 %v5363_v4, %v8836_v8  ;;  %v5364_v20 = vpop.f32.mrb[146].mxu0  ;;  %v6681_v15 = vpop.eup %6680 }
 0x761   : > { %6696 = vrcp.f32 %v1929_v5  ;;  %v5365_v40 = vpop.f32.mrb[147].mxu0  ;;  %v1931_v29 = vadd.f32 1.0, %v6681_v15 }
 0x762   : > { %v6683_v37 = vpop.eup %6682  ;;  %v8940_v33 = vadd.f32 %v3998_v41, %v3888_v35  ;;  %v5366_v46 = vadd.f32 %v5365_v40, %v5364_v20  ;;  %v3967_v41 = vpop.permute.xlu0 %3966 }
 0x763   : > { %v8942_v31 = vpop.eup %6684  ;;  %4064 = vrot.lane.b32.xlu1 %v6683_v37, %s6830_s21 }
 0x764   : > { %v3999_v30 = vmul.f32 %v8942_v31, %v3961_v44  ;;  %6698 = vtanh.f32 %v8940_v33  ;;  %v3893_v8 = vadd.f32 %v5366_v46, %v8839_v54  ;;  %v5367_v62 = vpop.f32.mrb[148].mxu0  ;;  %v6687_v21 = vpop.eup %6686 }
 0x765   : > { %6700 = vrcp.f32 %v1930_v39  ;;  %v5368_v26 = vpop.f32.mrb[149].mxu0  ;;  %v1932_v12 = vadd.f32 1.0, %v6687_v21 }
 0x766   : > { %v6689_v23 = vpop.eup %6688  ;;  %v8948_v61 = vadd.f32 %v3999_v30, %v3893_v8  ;;  %v5369_v34 = vadd.f32 %v5368_v26, %v5367_v62  ;;  %v3969_v30 = vpop.permute.xlu1 %3968 }
 0x767   : > { %v8950_v6 = vpop.eup %6690  ;;  %4066 = vrot.lane.b32.xlu0 %v6689_v23, %s6830_s21 }
 0x768   : > { %v4000_v63 = vmul.f32 %v8950_v6, %v3963_v13  ;;  %6702 = vtanh.f32 %v8948_v61  ;;  %v6278_v54 = vpack.i.bf16 %v8948_v61, %v8940_v33  ;;  %v3898_v36 = vadd.f32 %v5369_v34, %v8842_v1  ;;  %v5370_v55 = vpop.f32.mrb[150].mxu0  ;;  %v6693_v3 = vpop.eup %6692 }
 0x769   : > { %6704 = vrcp.f32 %v1931_v29  ;;  %v5371_v17 = vpop.f32.mrb[151].mxu0  ;;  %v1933_v4 = vadd.f32 1.0, %v6693_v3 }
 0x76a   : > { %v6695_v16 = vpop.eup %6694  ;;  %v8958_v7 = vadd.f32 %v4000_v63, %v3898_v36  ;;  %v5372_v5 = vadd.f32 %v5371_v17, %v5370_v55  ;;  %v3971_v63 = vpop.permute.xlu0 %3970 }
 0x76b   : > { %v8960_v18 = vpop.eup %6696  ;;  %4068 = vrot.lane.b32.xlu1 %v6695_v16, %s6830_s21 }
 0x76c   : > { %v4001_v47 = vmul.f32 %v8960_v18, %v3965_v52  ;;  %6706 = vtanh.f32 %v8958_v7  ;;  %v3903_v1 = vadd.f32 %v5372_v5, %v8845_v58  ;;  %v5373_v53 = vpop.f32.mrb[152].mxu0  ;;  %v3973_v5 = vpop.permute.xlu1 %3972 }
 0x76d   : > { %6708 = vrcp.f32 %v1932_v12  ;;  %v5374_v35 = vpop.f32.mrb[153].mxu0 }
 0x76e   : > { %v6699_v20 = vpop.eup %6698  ;;  %v4017_v15 = vadd.f32 %v4001_v47, %v3903_v1  ;;  %v5375_v39 = vadd.f32 %v5374_v35, %v5373_v53 }
 0x76f   : > { %v8966_v44 = vpop.eup %6700  ;;  %4070 = vrot.lane.b32.xlu0 %v6699_v20, %s6830_s21 }
 0x770   : > { %v4002_v40 = vmul.f32 %v8966_v44, %v3967_v41  ;;  %6710 = vtanh.f32 %v4017_v15  ;;  %v6283_v37 = vpack.i.bf16 %v4017_v15, %v8958_v7  ;;  %v3908_v46 = vadd.f32 %v5375_v39, %v8848_v32  ;;  %v5376_v58 = vpop.f32.mrb[154].mxu0 }
 0x771   : > { %6712 = vrcp.f32 %v1933_v4  ;;  %v5377_v8 = vpop.f32.mrb[155].mxu0 }
 0x772   : > { %v6703_v62 = vpop.eup %6702  ;;  %v4018_v21 = vadd.f32 %v4002_v40, %v3908_v46  ;;  %v5378_v29 = vadd.f32 %v5377_v8, %v5376_v58 }
 0x773   : > { %v8972_v13 = vpop.eup %6704  ;;  %4072 = vrot.lane.b32.xlu1 %v6703_v62, %s6830_s21 }
 0x774   : > { %v4003_v26 = vmul.f32 %v8972_v13, %v3969_v30  ;;  %6714 = vtanh.f32 %v4018_v21  ;;  %v3913_v23 = vadd.f32 %v5378_v29, %v8851_v59  ;;  %v5379_v34 = vpop.f32.mrb[156].mxu0 }
 0x775   : > { %v5380_v36 = vpop.f32.mrb[157].mxu0 }
 0x776   : > { %v6707_v32 = vpop.eup %6706  ;;  %v4019_v55 = vadd.f32 %v4003_v26, %v3913_v23  ;;  %v5381_v3 = vadd.f32 %v5380_v36, %v5379_v34  ;;  %v9483_v34 = vlaneseq }
 0x777   : > { %v8977_v12 = vpop.eup %6708  ;;  %4074 = vrot.lane.b32.xlu0 %v6707_v32, %s6830_s21 }
 0x778   : > { %v4004_v52 = vmul.f32 %v8977_v12, %v3971_v63  ;;  %6716 = vtanh.f32 %v4019_v55  ;;  %v6288_v17 = vpack.i.bf16 %v4019_v55, %v4018_v21  ;;  %v3918_v16 = vadd.f32 %v5381_v3, %v8854_v42  ;;  %v5382_v7 = vpop.f32.mrb[158].mxu0 }
 0x779   : > { %v5383_v47 = vpop.f32.mrb[159].mxu0  ;;  %v4263_v63 = vshrl.u32 %v9483_v34, 7 }
 0x77a   : > { %v6711_v59 = vpop.eup %6710  ;;  %v4020_v1 = vadd.f32 %v4004_v52, %v3918_v16  ;;  %v5384_v53 = vadd.f32 %v5383_v47, %v5382_v7 }
 0x77b   : > { %v8982_v4 = vpop.eup %6712  ;;  %4076 = vrot.lane.b32.xlu1 %v6711_v59, %s6830_s21  ;;  %v9051_v3 = vadd.s32 16, %v4263_v63  ;;  %v9053_v52 = vadd.s32 24, %v4263_v63  ;;  %v9060_v16 = vadd.s32 32, %v4263_v63  ;;  %v9062_v7 = vadd.s32 40, %v4263_v63 }
 0x77c   : > { %v4005_v41 = vmul.f32 %v8982_v4, %v3973_v5  ;;  %6718 = vtanh.f32 %v4020_v1  ;;  %v3923_v35 = vadd.f32 %v5384_v53, %v8857_v19  ;;  %v9070_v5 = vadd.s32 56, %v4263_v63 }
 0x77d   : > { %v9076_v47 = vadd.s32 64, %v4263_v63  ;;  %v9078_v59 = vadd.s32 72, %v4263_v63  ;;  %v9086_v53 = vadd.s32 88, %v4263_v63 }
 0x77e   : > { %v6715_v20 = vpop.eup %6714  ;;  %v4021_v15 = vadd.f32 %v4005_v41, %v3923_v35  ;;  %v9094_v41 = vadd.s32 104, %v4263_v63  ;;  %v9100_v35 = vadd.s32 112, %v4263_v63 }
 0x77f   : > { %4078 = vrot.lane.b32.xlu0 %v6715_v20, %s6830_s21  ;;  %v9102_v20 = vadd.s32 120, %v4263_v63 }
 0x780   : > { %6720 = vtanh.f32 %v4021_v15  ;;  %v6333_v42 = vpack.i.bf16 %v4021_v15, %v4020_v1  ;;  %v9084_v1 = vadd.s32 80, %v4263_v63 }
 0x782   : > { %v6717_v39 = vpop.eup %6716 }
 0x783   : > { %4080 = vrot.lane.b32.xlu1 %v6717_v39, %s6830_s21 }
 0x786   : > { %v6719_v40 = vpop.eup %6718 }
 0x787   : > { %4082 = vrot.lane.b32.xlu0 %v6719_v40, %s6830_s21 }
 0x78a   : > { %v6721_v46 = vpop.eup %6720 }
 0x78b   : > { %4084 = vrot.lane.b32.xlu1 %v6721_v46, %s6830_s21 }
 0x78f   : > { %6259 = vrot.lane.b32.xlu1 %v6258_v9, %s6828_s11 }
 0x793   : > { %6264 = vrot.lane.b32.xlu1 %v6263_v2, %s6828_s11 }
 0x797   : > { %6269 = vrot.lane.b32.xlu1 %v6268_v49, %s6828_s11 }
 0x79b   : > { %6274 = vrot.lane.b32.xlu1 %v6273_v25, %s6828_s11 }
 0x79f   : > { %6279 = vrot.lane.b32.xlu1 %v6278_v54, %s6828_s11 }
 0x7a3   : > { %6284 = vrot.lane.b32.xlu1 %v6283_v37, %s6828_s11 }
 0x7a7   : > { %6289 = vrot.lane.b32.xlu1 %v6288_v17, %s6828_s11 }
 0x7ab   : > { %6334 = vrot.lane.b32.xlu1 %v6333_v42, %s6828_s11 }
 0x7c1   : > { %v4055_v19 = vpop.permute.xlu0 %4054 }
 0x7c2   : > { %v4102_v22 = vmul.f32 %v8860_v24, %v4055_v19 }
 0x7c5   : > { %v4057_v50 = vpop.permute.xlu1 %4056 }
 0x7c6   : > { %v4103_v9 = vmul.f32 %v8867_v28, %v4057_v50 }
 0x7c8   : > { %v6293_v27 = vpack.i.bf16 %v4103_v9, %v4102_v22 }
 0x7c9   : > { %v4059_v45 = vpop.permute.xlu0 %4058 }
 0x7ca   : > { %6294 = vrot.lane.b32.xlu0 %v6293_v27, %s6830_s21  ;;  %v4104_v10 = vmul.f32 %v8875_v0, %v4059_v45 }
 0x7cd   : > { %v4061_v2 = vpop.permute.xlu1 %4060 }
 0x7ce   : > { %v4105_v48 = vmul.f32 %v8885_v56, %v4061_v2 }
 0x7d0   : > { %v6298_v49 = vpack.i.bf16 %v4105_v48, %v4104_v10 }
 0x7d1   : > { %v4063_v57 = vpop.permute.xlu0 %4062 }
 0x7d2   : > { %6299 = vrot.lane.b32.xlu0 %v6298_v49, %s6830_s21  ;;  %v4106_v25 = vmul.f32 %v8893_v60, %v4063_v57 }
 0x7d5   : > { %v4065_v38 = vpop.permute.xlu1 %4064 }
 0x7d6   : > { %v4107_v24 = vmul.f32 %v8904_v11, %v4065_v38 }
 0x7d8   : > { %v6303_v33 = vpack.i.bf16 %v4107_v24, %v4106_v25 }
 0x7d9   : > { %v4067_v28 = vpop.permute.xlu0 %4066 }
 0x7da   : > { %6304 = vrot.lane.b32.xlu0 %v6303_v33, %s6830_s21  ;;  %v4108_v54 = vmul.f32 %v8913_v14, %v4067_v28 }
 0x7dd   : > { %v4069_v61 = vpop.permute.xlu1 %4068 }
 0x7de   : > { %v4109_v0 = vmul.f32 %v8924_v51, %v4069_v61 }
 0x7e0   : > { %v6308_v37 = vpack.i.bf16 %v4109_v0, %v4108_v54 }
 0x7e1   : > { %v4071_v56 = vpop.permute.xlu0 %4070 }
 0x7e2   : > { %6309 = vrot.lane.b32.xlu0 %v6308_v37, %s6830_s21  ;;  %v4110_v30 = vmul.f32 %v8932_v43, %v4071_v56 }
 0x7e5   : > { %v4073_v58 = vpop.permute.xlu1 %4072 }
 0x7e6   : > { %v4111_v60 = vmul.f32 %v8942_v31, %v4073_v58 }
 0x7e8   : > { %v6313_v8 = vpack.i.bf16 %v4111_v60, %v4110_v30 }
 0x7e9   : > { %v4075_v11 = vpop.permute.xlu0 %4074 }
 0x7ea   : > { %6314 = vrot.lane.b32.xlu0 %v6313_v8, %s6830_s21  ;;  %v4112_v21 = vmul.f32 %v8950_v6, %v4075_v11  ;;  %v9041_v6 = vld [vmem:[%s331_s26] ss:$0 sm:$0xff] }
 0x7eb   : > { %vm4283_vm3 = vcmp.eq.s32.totalorder %v4263_v63, %v9041_v6  ;;  %vm4285_vm5 = vcmp.eq.s32.totalorder %v9051_v3, %v9041_v6  ;;  %vm4286_vm6 = vcmp.eq.s32.totalorder %v9053_v52, %v9041_v6  ;;  %vm4287_vm7 = vcmp.eq.s32.totalorder %v9060_v16, %v9041_v6  ;;  %v6786_v3 = vld [vmem:[%s9308_s9 + $0x8] sm:$0xff] }
 0x7ec   : > { %vm4288_vm8 = vcmp.eq.s32.totalorder %v9062_v7, %v9041_v6  ;;  %vm4290_vm10 = vcmp.eq.s32.totalorder %v9070_v5, %v9041_v6  ;;  %vm4291_vm11 = vcmp.eq.s32.totalorder %v9076_v47, %v9041_v6  ;;  %vm4292_vm12 = vcmp.eq.s32.totalorder %v9078_v59, %v9041_v6  ;;  %v6787_v7 = vld [vmem:[%s9308_s9] sm:$0xff]  ;;  %v6789_v59 = vld [vmem:[%s9308_s9 + $0x10] sm:$0xff] }
 0x7ed   : > { %v4077_v62 = vpop.permute.xlu1 %4076  ;;  %vm4293_vm13 = vcmp.eq.s32.totalorder %v9084_v1, %v9041_v6  ;;  %vm4294_vm14 = vcmp.eq.s32.totalorder %v9086_v53, %v9041_v6  ;;  %vm4296_vm0 = vcmp.eq.s32.totalorder %v9094_v41, %v9041_v6  ;;  %vm4298_vm2 = vcmp.eq.s32.totalorder %v9102_v20, %v9041_v6  ;;  %v6791_v20 = vld [vmem:[%s9308_s9 + $0x20] sm:$0xff] }
 0x7ee   : > { %v4113_v14 = vmul.f32 %v8960_v18, %v4077_v62  ;;  %v9043_v18 = vadd.s32 8, %v4263_v63 }
 0x7f0   : > { %v6318_v51 = vpack.i.bf16 %v4113_v14, %v4112_v21  ;;  %vm4284_vm4 = vcmp.eq.s32.totalorder %v9043_v18, %v9041_v6 }
 0x7f1   : > { %v4079_v29 = vpop.permute.xlu0 %4078 }
 0x7f2   : > { %6319 = vrot.lane.b32.xlu0 %v6318_v51, %s6830_s21  ;;  %v4114_v23 = vmul.f32 %v8966_v44, %v4079_v29  ;;  %v9484_v44 = vmov 1.0  }
 0x7f3   : > { %5849 = vmatprep.mubr.msk.f32.mxu0 %vm4283_vm3, %v9484_v44  ;;  %vm4297_vm3 = vcmp.eq.s32.totalorder %v9100_v35, %v9041_v6 }
 0x7f5   : > { %v4081_v26 = vpop.permute.xlu1 %4080 }
 0x7f6   : > { %v4115_v43 = vmul.f32 %v8972_v13, %v4081_v26 }
 0x7f8   : > { %v6323_v31 = vpack.i.bf16 %v4115_v43, %v4114_v23 }
 0x7f9   : > { %v4083_v36 = vpop.permute.xlu0 %4082 }
 0x7fa   : > { %6324 = vrot.lane.b32.xlu0 %v6323_v31, %s6830_s21  ;;  %v4116_v13 = vmul.f32 %v8977_v12, %v4083_v36  ;;  %v9068_v12 = vadd.s32 48, %v4263_v63 }
 0x7fc   : > { %vm4289_vm9 = vcmp.eq.s32.totalorder %v9068_v12, %v9041_v6 }
 0x7fd   : > { %v4085_v32 = vpop.permute.xlu1 %4084 }
 0x7fe   : > { %v4117_v55 = vmul.f32 %v8982_v4, %v4085_v32  ;;  %v9092_v4 = vadd.s32 96, %v4263_v63 }
 0x800   : > { %v6328_v17 = vpack.i.bf16 %v4117_v55, %v4116_v13  ;;  %vm4295_vm15 = vcmp.eq.s32.totalorder %v9092_v4, %v9041_v6  ;;  %v6790_v4 = vld [vmem:[%s9308_s9 + $0x28] sm:$0xff] }
 0x801   : > { %v6260_v15 = vpop.permute.xlu1 %6259 }
 0x802   : > { %6329 = vrot.lane.b32.xlu0 %v6328_v17, %s6830_s21  ;;  %v6262_v39 = vunpack.i.h.bf16 %v6260_v15  ;;  %v6261_v40 = vunpack.i.l.bf16 %v6260_v15 }
 0x805   : > { %v6265_v27 = vpop.permute.xlu1 %6264 }
 0x806   : > { %v6267_v2 = vunpack.i.h.bf16 %v6265_v27  ;;  %v6266_v10 = vunpack.i.l.bf16 %v6265_v27 }
 0x809   : > { %v6270_v24 = vpop.permute.xlu1 %6269 }
 0x80a   : > { %v6272_v28 = vunpack.i.h.bf16 %v6270_v24  ;;  %v6271_v61 = vunpack.i.l.bf16 %v6270_v24 }
 0x80d   : > { %v6275_v30 = vpop.permute.xlu1 %6274 }
 0x80e   : > { %v6277_v8 = vunpack.i.h.bf16 %v6275_v30  ;;  %v6276_v11 = vunpack.i.l.bf16 %v6275_v30  ;;  %v6792_v30 = vld [vmem:[%s9308_s9 + $0x38] sm:$0xff] }
 0x811   : > { %v6280_v26 = vpop.permute.xlu1 %6279 }
 0x812   : > { %v6282_v43 = vunpack.i.h.bf16 %v6280_v26  ;;  %v6281_v31 = vunpack.i.l.bf16 %v6280_v26  ;;  %v6795_v26 = vld [vmem:[%s9308_s9 + $0x40] sm:$0xff] }
 0x815   : > { %v6285_v55 = vpop.permute.xlu1 %6284 }
 0x816   : > { %v6287_v15 = vunpack.i.h.bf16 %v6285_v55 }
 0x83c   : > { %v6295_v42 = vpop.permute.xlu0 %6294 }
 0x83d   : > { %v6297_v46 = vunpack.i.h.bf16 %v6295_v42  ;;  %v6296_v19 = vunpack.i.l.bf16 %v6295_v42  ;;  %v6286_v42 = vunpack.i.l.bf16 %v6285_v55  ;;  %v6798_v55 = vld [vmem:[%s9308_s9 + $0x68] sm:$0xff] }
 0x83f   : > { %v4246_v50 = vsel %vm1644_vm1, %v6296_v19, %v6261_v40  ;;  %v4247_v22 = vsel %vm1644_vm1, %v6297_v46, %v6262_v39 }
 0x840   : > { %v6089_v9 = vpack.c.bf16 %v4247_v22, %v4246_v50  ;;  %v6290_v22 = vpop.permute.xlu1 %6289 }
 0x841   : > { %v6292_v27 = vunpack.i.h.bf16 %v6290_v22 }
 0x842   : > { %6090 = vmatprep.subr.bf16.mxu0 %v6089_v9 }
 0x843   : > { %6092 = vmatpush3.bf16.msra.mxu0 %v6089_v9 }
 0x844   : > { %v6300_v45 = vpop.permute.xlu0 %6299 }
 0x845   : > { %v6302_v48 = vunpack.i.h.bf16 %v6300_v45  ;;  %v6301_v49 = vunpack.i.l.bf16 %v6300_v45  ;;  %v6291_v45 = vunpack.i.l.bf16 %v6290_v22  ;;  %v6801_v22 = vld [vmem:[%s9308_s9 + $0x70] sm:$0xff] }
 0x847   : > { %v4248_v57 = vsel %vm1644_vm1, %v6301_v49, %v6266_v10  ;;  %v4249_v38 = vsel %vm1644_vm1, %v6302_v48, %v6267_v2 }
 0x848   : > { %v6093_v25 = vpack.c.bf16 %v4249_v38, %v4248_v57  ;;  %v6335_v38 = vpop.permute.xlu1 %6334 }
 0x849   : > { %v6337_v24 = vunpack.i.h.bf16 %v6335_v38 }
 0x84a   : > { %6094 = vmatprep.subr.bf16.mxu0 %v6093_v25 }
 0x84b   : > { %6096 = vmatpush3.bf16.msra.mxu0 %v6093_v25 }
 0x84c   : > { %v6305_v33 = vpop.permute.xlu0 %6304 }
 0x84d   : > { %v6307_v54 = vunpack.i.h.bf16 %v6305_v33  ;;  %v6306_v0 = vunpack.i.l.bf16 %v6305_v33  ;;  %v6336_v33 = vunpack.i.l.bf16 %v6335_v38 }
 0x84f   : > { %v4250_v37 = vsel %vm1644_vm1, %v6306_v0, %v6271_v61  ;;  %v4251_v56 = vsel %vm1644_vm1, %v6307_v54, %v6272_v28 }
 0x850   : > { %v6097_v58 = vpack.c.bf16 %v4251_v56, %v4250_v37 }
 0x852   : > { %6098 = vmatprep.subr.bf16.mxu0 %v6097_v58 }
 0x853   : > { %6100 = vmatpush3.bf16.msra.mxu0 %v6097_v58 }
 0x854   : > { %v6310_v60 = vpop.permute.xlu0 %6309 }
 0x855   : > { %v6312_v62 = vunpack.i.h.bf16 %v6310_v60  ;;  %v6311_v21 = vunpack.i.l.bf16 %v6310_v60 }
 0x857   : > { %v4252_v14 = vsel %vm1644_vm1, %v6311_v21, %v6276_v11  ;;  %v4253_v51 = vsel %vm1644_vm1, %v6312_v62, %v6277_v8  ;;  %v6793_v11 = vld [vmem:[%s9308_s9 + $0x30] sm:$0xff] }
 0x858   : > { %v6101_v29 = vpack.c.bf16 %v4253_v51, %v4252_v14  ;;  %v6794_v14 = vld [vmem:[%s9308_s9 + $0x48] sm:$0xff] }
 0x85a   : > { %6102 = vmatprep.subr.bf16.mxu0 %v6101_v29 }
 0x85b   : > { %6104 = vmatpush3.bf16.msra.mxu0 %v6101_v29 }
 0x85c   : > { %v6315_v23 = vpop.permute.xlu0 %6314 }
 0x85d   : > { %v6317_v34 = vunpack.i.h.bf16 %v6315_v23  ;;  %v6316_v63 = vunpack.i.l.bf16 %v6315_v23 }
 0x85f   : > { %v4254_v36 = vsel %vm1644_vm1, %v6316_v63, %v6281_v31  ;;  %v4255_v32 = vsel %vm1644_vm1, %v6317_v34, %v6282_v43  ;;  %v6796_v31 = vld [vmem:[%s9308_s9 + $0x58] sm:$0xff] }
 0x860   : > { %v6105_v13 = vpack.c.bf16 %v4255_v32, %v4254_v36  ;;  %v6797_v36 = vld [vmem:[%s9308_s9 + $0x50] sm:$0xff] }
 0x862   : > { %6106 = vmatprep.subr.bf16.mxu0 %v6105_v13 }
 0x863   : > { %6108 = vmatpush3.bf16.msra.mxu0 %v6105_v13 }
 0x864   : > { %v6320_v17 = vpop.permute.xlu0 %6319 }
 0x865   : > { %v6322_v39 = vunpack.i.h.bf16 %v6320_v17  ;;  %v6321_v40 = vunpack.i.l.bf16 %v6320_v17 }
 0x867   : > { %v4256_v46 = vsel %vm1644_vm1, %v6321_v40, %v6286_v42  ;;  %v4257_v19 = vsel %vm1644_vm1, %v6322_v39, %v6287_v15  ;;  %v6799_v42 = vld [vmem:[%s9308_s9 + $0x60] sm:$0xff] }
 0x868   : > { %v6109_v50 = vpack.c.bf16 %v4257_v19, %v4256_v46  ;;  %v6800_v46 = vld [vmem:[%s9308_s9 + $0x78] sm:$0xff] }
 0x86a   : > { %6110 = vmatprep.subr.bf16.mxu0 %v6109_v50 }
 0x86b   : > { %6112 = vmatpush3.bf16.msra.mxu0 %v6109_v50 }
 0x86c   : > { %v6325_v9 = vpop.permute.xlu0 %6324 }
 0x86d   : > { %v6327_v2 = vunpack.i.h.bf16 %v6325_v9  ;;  %v6326_v10 = vunpack.i.l.bf16 %v6325_v9 }
 0x86f   : > { %v4258_v48 = vsel %vm1644_vm1, %v6326_v10, %v6291_v45  ;;  %v4259_v49 = vsel %vm1644_vm1, %v6327_v2, %v6292_v27 }
 0x870   : > { %v6113_v57 = vpack.c.bf16 %v4259_v49, %v4258_v48 }
 0x872   : > { %6114 = vmatprep.subr.bf16.mxu0 %v6113_v57 }
 0x873   : > { %6116 = vmatpush3.bf16.msra.mxu0 %v6113_v57 }
 0x874   : > { %v6330_v25 = vpop.permute.xlu0 %6329 }
 0x875   : > { %v6332_v28 = vunpack.i.h.bf16 %v6330_v25  ;;  %v6331_v61 = vunpack.i.l.bf16 %v6330_v25 }
 0x877   : > { %v4260_v54 = vsel %vm1644_vm1, %v6331_v61, %v6336_v33  ;;  %v4261_v0 = vsel %vm1644_vm1, %v6332_v28, %v6337_v24  ;;  %vm9485_vm1 = vcmask 523264  }
 0x878   : > { %v6117_v37 = vpack.c.bf16 %v4261_v0, %v4260_v54 }
 0x87a   : > { %6118 = vmatprep.subr.bf16.mxu0 %v6117_v37 }
 0x87b   : > { %6120 = vmatpush3.bf16.msra.mxu0 %v6117_v37 }
 0x87e   : > { %5850 = vmatmul.mubr.msk.f32.vlgmr.msra.gmra.mrb[160].mxu0 %vm4284_vm4, %v9484_v44  ;;  %vm9486_vm4 = vmmov %vm9485_vm1 }
 0x87f   : > { %5852 = vmatprep.mubr.msk.f32.mxu0 %vm4285_vm5, %v9484_v44  ;;  %vm9488_vm5 = vmmov %vm9485_vm1 }
 0x882   : > { %5853 = vmatmul.mubr.msk.f32.gmra.mrb[162].mxu0 %vm4286_vm6, %v9484_v44  ;;  %vm9489_vm6 = vmmov %vm9485_vm1 }
 0x883   : > { %5855 = vmatprep.mubr.msk.f32.mxu0 %vm4287_vm7, %v9484_v44  ;;  %vm9490_vm7 = vmmov %vm9485_vm1 }
 0x886   : > { %5856 = vmatmul.mubr.msk.f32.gmra.mrb[164].mxu0 %vm4288_vm8, %v9484_v44  ;;  %vm9491_vm8 = vmmov %vm9485_vm1 }
 0x887   : > { %5858 = vmatprep.mubr.msk.f32.mxu0 %vm4289_vm9, %v9484_v44  ;;  %vm9492_vm9 = vmmov %vm9485_vm1 }
 0x88a   : > { %5859 = vmatmul.mubr.msk.f32.gmra.mrb[166].mxu0 %vm4290_vm10, %v9484_v44  ;;  %vm9493_vm10 = vmmov %vm9485_vm1 }
 0x88b   : > { %5861 = vmatprep.mubr.msk.f32.mxu0 %vm4291_vm11, %v9484_v44  ;;  %vm9494_vm11 = vmmov %vm9485_vm1 }
 0x88e   : > { %5862 = vmatmul.mubr.msk.f32.gmra.mrb[168].mxu0 %vm4292_vm12, %v9484_v44  ;;  %vm9495_vm12 = vmmov %vm9485_vm1 }
 0x88f   : > { %5864 = vmatprep.mubr.msk.f32.mxu0 %vm4293_vm13, %v9484_v44  ;;  %vm9496_vm13 = vmmov %vm9485_vm1 }
 0x892   : > { %5865 = vmatmul.mubr.msk.f32.gmra.mrb[170].mxu0 %vm4294_vm14, %v9484_v44  ;;  %vm9497_vm14 = vmmov %vm9485_vm1 }
 0x893   : > { %5867 = vmatprep.mubr.msk.f32.mxu0 %vm4295_vm15, %v9484_v44  ;;  %vm9498_vm15 = vmmov %vm9485_vm1 }
 0x896   : > { %5868 = vmatmul.mubr.msk.f32.gmra.mrb[172].mxu0 %vm4296_vm0, %v9484_v44  ;;  %vm9499_vm0 = vmmov %vm9485_vm1 }
 0x897   : > { %5870 = vmatprep.mubr.msk.f32.mxu0 %vm4297_vm3, %v9484_v44  ;;  %vm9500_vm3 = vmmov %vm9499_vm0 }
 0x89a   : > { %5871 = vmatmul.mubr.msk.f32.gmra.mrb[174].mxu0 %vm4298_vm2, %v9484_v44  ;;  %v6788_v44 = vld [vmem:[%s9308_s9 + $0x18] sm:$0xff]  ;;  %vm9487_vm2 = vmmov %vm9485_vm1 }
 0x951   : > { %v5851_v18 = vpop.f32.mrb[160].mxu0 }
 0x952   : > { %v4477_v52 = vadd.f32 %v6786_v3, %v5851_v18  ;;  %v4397_v16 = vpop.f32.mrb[161].mxu0 }
 0x953   : > { %v4476_v12 = vadd.f32 %v6787_v7, %v4397_v16 }
 0x954   : > { %4493 = vst.msk [vmem:[%s9308_s9 + $0x8] sm:$0xff] %vm9485_vm1, %v4477_v52 }
 0x955   : > { %4492 = vst.msk [vmem:[%s9308_s9] sm:$0xff] %vm9486_vm4, %v4476_v12  ;;  %v5854_v6 = vpop.f32.mrb[162].mxu0 }
 0x956   : > { %v4479_v5 = vadd.f32 %v6788_v44, %v5854_v6  ;;  %v4407_v47 = vpop.f32.mrb[163].mxu0 }
 0x957   : > { %v4478_v1 = vadd.f32 %v6789_v59, %v4407_v47 }
 0x958   : > { %4495 = vst.msk [vmem:[%s9308_s9 + $0x18] sm:$0xff] %vm9487_vm2, %v4479_v5 }
 0x959   : > { %4494 = vst.msk [vmem:[%s9308_s9 + $0x10] sm:$0xff] %vm9488_vm5, %v4478_v1  ;;  %v5857_v53 = vpop.f32.mrb[164].mxu0 }
 0x95a   : > { %v4481_v41 = vadd.f32 %v6790_v4, %v5857_v53  ;;  %v4417_v35 = vpop.f32.mrb[165].mxu0 }
 0x95b   : > { %v4480_v56 = vadd.f32 %v6791_v20, %v4417_v35 }
 0x95c   : > { %4497 = vst.msk [vmem:[%s9308_s9 + $0x28] sm:$0xff] %vm9489_vm6, %v4481_v41 }
 0x95d   : > { %4496 = vst.msk [vmem:[%s9308_s9 + $0x20] sm:$0xff] %vm9490_vm7, %v4480_v56  ;;  %v5860_v58 = vpop.f32.mrb[166].mxu0 }
 0x95e   : > { %v4483_v60 = vadd.f32 %v6792_v30, %v5860_v58  ;;  %v4427_v8 = vpop.f32.mrb[167].mxu0 }
 0x95f   : > { %v4482_v62 = vadd.f32 %v6793_v11, %v4427_v8 }
 0x960   : > { %4499 = vst.msk [vmem:[%s9308_s9 + $0x38] sm:$0xff] %vm9491_vm8, %v4483_v60 }
 0x961   : > { %4498 = vst.msk [vmem:[%s9308_s9 + $0x30] sm:$0xff] %vm9492_vm9, %v4482_v62  ;;  %v5863_v21 = vpop.f32.mrb[168].mxu0 }
 0x962   : > { %v4485_v51 = vadd.f32 %v6794_v14, %v5863_v21  ;;  %v4437_v29 = vpop.f32.mrb[169].mxu0 }
 0x963   : > { %v4484_v23 = vadd.f32 %v6795_v26, %v4437_v29 }
 0x964   : > { %4501 = vst.msk [vmem:[%s9308_s9 + $0x48] sm:$0xff] %vm9493_vm10, %v4485_v51 }
 0x965   : > { %4500 = vst.msk [vmem:[%s9308_s9 + $0x40] sm:$0xff] %vm9494_vm11, %v4484_v23  ;;  %v5866_v43 = vpop.f32.mrb[170].mxu0 }
 0x966   : > { %v4487_v34 = vadd.f32 %v6796_v31, %v5866_v43  ;;  %v4447_v63 = vpop.f32.mrb[171].mxu0 }
 0x967   : > { %v4486_v32 = vadd.f32 %v6797_v36, %v4447_v63 }
 0x968   : > { %4503 = vst.msk [vmem:[%s9308_s9 + $0x58] sm:$0xff] %vm9495_vm12, %v4487_v34 }
 0x969   : > { %4502 = vst.msk [vmem:[%s9308_s9 + $0x50] sm:$0xff] %vm9496_vm13, %v4486_v32  ;;  %v5869_v13 = vpop.f32.mrb[172].mxu0 }
 0x96a   : > { %v4489_v17 = vadd.f32 %v6798_v55, %v5869_v13  ;;  %v4457_v15 = vpop.f32.mrb[173].mxu0 }
 0x96b   : > { %v4488_v39 = vadd.f32 %v6799_v42, %v4457_v15 }
 0x96c   : > { %4505 = vst.msk [vmem:[%s9308_s9 + $0x68] sm:$0xff] %vm9497_vm14, %v4489_v17 }
 0x96d   : > { %4504 = vst.msk [vmem:[%s9308_s9 + $0x60] sm:$0xff] %vm9498_vm15, %v4488_v39  ;;  %v5872_v40 = vpop.f32.mrb[174].mxu0 }
 0x96e   : > { %v4491_v19 = vadd.f32 %v6800_v46, %v5872_v40  ;;  %v4467_v50 = vpop.f32.mrb[175].mxu0 }
 0x96f   : > { %v4490_v9 = vadd.f32 %v6801_v22, %v4467_v50 }
 0x970   : > { %4507 = vst.msk [vmem:[%s9308_s9 + $0x78] sm:$0xff] %vm9499_vm0, %v4491_v19 }
 0x971   : > { %4506 = vst.msk [vmem:[%s9308_s9 + $0x70] sm:$0xff] %vm9500_vm3, %v4490_v9 }
 0x972 PF: > { %s25_s14 = sadd.s32 1, %s6822_s14  }
 0x973   : > { %p22_p11 = scmp.ge.s32.totalorder %s25_s14, 5  }
 0x975   :  { %24 = sbr.rel (!%p22_p11) target bundleno = 16 (0x10), region = 92 }

</bundles_post_ra>
